<compile_context>
chip_gen: v7x
topology: tpu7x:2x2x1
jax: 0.10.0
libtpu: 0.0.40
codegen_flags: <defaults>
</compile_context>

<pallas_src>
import functools

import jax
import jax.numpy as jnp
from jax.experimental import pallas as pl
from jax.experimental.pallas import tpu as pltpu

LANE = 128


def _round_up(n, m):
    return ((n + m - 1) // m) * m


def _default_grid_steps():
    """1 grid step on single-TensorCore chips (v5e/v6e), 2 on v7x (2 TCs)."""
    try:
        kind = jax.devices()[0].device_kind.lower()
    except Exception:
        return 1
    return 2 if ("v7" in kind or "tpu7" in kind) else 1


def _mlp_kernel(n_layers, x_ref, *refs):
    # refs = (w0, b0, w1, b1, ..., w_{L-1}, b_{L-1}, o_ref)
    o_ref = refs[-1]
    params = refs[:-1]

    h = x_ref[...]                                  # bf16 input block (batch_tile, i_size)
    for li in range(n_layers):
        w = params[2 * li][...]                     # bf16 (in_d, out_d)
        b = params[2 * li + 1][...]                 # f32  (1, out_d)
        hb = h if h.dtype == jnp.bfloat16 else h.astype(jnp.bfloat16)
        # bf16 operands on the MXU, f32 accumulation; bias add in f32 on the VPU.
        h = jnp.dot(hb, w, preferred_element_type=jnp.float32) + b
        if li < n_layers - 1:
            h = jnp.maximum(h, 0.0)                 # ReLU on all but the last layer
    o_ref[...] = h.astype(o_ref.dtype)


def mlp_forward(x, weights, biases, *, grid_steps=None):
    """Fused MLP forward pass in a single Pallas kernel.

    x:       (B, i_size) float32
    weights: list of (in_i, out_i) float32 arrays (transposed vs. torch.nn.Linear)
    biases:  list of (1, out_i) float32 arrays
    Returns (B, o_size) float32, identical semantics to the PyTorch forward.
    """
    n_layers = len(weights)
    B, i_size = x.shape
    o_size = weights[-1].shape[1]

    if grid_steps is None:
        grid_steps = _default_grid_steps()
    grid_steps = max(1, min(grid_steps, B))

    # Hidden widths lane-padded to 128 (zero padding -> results exact).  The
    # input feature dim and the final output dim keep their true sizes.
    out_dims = [_round_up(w.shape[1], LANE) for w in weights[:-1]] + [o_size]
    in_dims = [i_size] + out_dims[:-1]

    flat_params, param_specs = [], []
    for li, (w, b) in enumerate(zip(weights, biases)):
        in_d, out_d = w.shape
        w_p = jnp.zeros((in_dims[li], out_dims[li]), jnp.bfloat16)
        w_p = w_p.at[:in_d, :out_d].set(w.astype(jnp.bfloat16))
        b_p = jnp.zeros((1, out_dims[li]), jnp.float32)
        b_p = b_p.at[:, :out_d].set(b.astype(jnp.float32))
        flat_params += [w_p, b_p]
        # Constant index_maps: parameters stay resident across the grid.
        param_specs += [
            pl.BlockSpec(w_p.shape, lambda i: (0, 0)),
            pl.BlockSpec(b_p.shape, lambda i: (0, 0)),
        ]

    # Batch tiling: one full-batch block per grid step.
    if grid_steps == 1:
        batch_tile, b_pad = B, B
    else:
        batch_tile = _round_up(pl.cdiv(B, grid_steps), 8)
        b_pad = batch_tile * grid_steps

    x_b = x.astype(jnp.bfloat16)                    # feed bf16 straight to the MXU
    if b_pad != B:
        x_b = jnp.pad(x_b, ((0, b_pad - B), (0, 0)))

    x_spec = pl.BlockSpec((batch_tile, i_size), lambda i: (i, 0))
    out_spec = pl.BlockSpec((batch_tile, o_size), lambda i: (i, 0))

    y = pl.pallas_call(
        functools.partial(_mlp_kernel, n_layers),
        out_shape=jax.ShapeDtypeStruct((b_pad, o_size), jnp.float32),
        grid_spec=pl.GridSpec(
            grid=(grid_steps,),
            in_specs=[x_spec] + param_specs,
            out_specs=out_spec,
        ),
        compiler_params=pltpu.CompilerParams(
            dimension_semantics=("parallel",),      # batch tiles are independent
        ),
    )(x_b, *flat_params)

    # Only strip batch padding when it exists (v7x 2-step path); padding rows
    # are garbage-but-discarded, real rows are exact.
    return y if b_pad == B else y[:B]


def init_params(key, i_size, o_size, n_neuron, n_layer):
    """Deterministic init mimicking torch.nn.Linear default (uniform +-1/sqrt(fan_in))."""
    dims = [i_size] + [n_neuron] * n_layer + [o_size]
    weights, biases = [], []
    for li in range(len(dims) - 1):
        fan_in, fan_out = dims[li], dims[li + 1]
        key, kw, kb = jax.random.split(key, 3)
        bound = 1.0 / jnp.sqrt(jnp.float32(fan_in))
        # stored as (in, out) so the kernel computes h @ W
        w = jax.random.uniform(kw, (fan_in, fan_out), jnp.float32, -bound, bound)
        b = jax.random.uniform(kb, (1, fan_out), jnp.float32, -bound, bound)
        weights.append(w)
        biases.append(b)
    return weights, biases


def reference_forward(x, weights, biases, *, matmul_dtype=jnp.float32):
    h = x.astype(jnp.float32)
    n = len(weights)
    for li, (w, b) in enumerate(zip(weights, biases)):
        h = jnp.dot(h.astype(matmul_dtype), w.astype(matmul_dtype),
                    preferred_element_type=jnp.float32) + b
        if li < n - 1:
            h = jnp.maximum(h, 0.0)
    return h


if __name__ == "__main__":
    # Shapes consistent with the regression demo MLP:
    # i_size=4, o_size=2, n_neuron=32, n_layer=2 -> 3 Linear layers total.
    i_size, o_size, n_neuron, n_layer = 4, 2, 32, 2
    batch = 1000

    key = jax.random.PRNGKey(0)
    key, kx = jax.random.split(key)
    x = jax.random.normal(kx, (batch, i_size), jnp.float32)
    weights, biases = init_params(key, i_size, o_size, n_neuron, n_layer)

    y = mlp_forward(x, weights, biases)             # grid steps auto: 1 (v5e/v6e) / 2 (v7x)
    y = jax.block_until_ready(y)
    assert y.shape == (batch, o_size)

    # Matched-precision reference (bf16 matmul operands, f32 accumulation).
    y_ref = reference_forward(x, weights, biases, matmul_dtype=jnp.bfloat16)
    assert jnp.allclose(y, y_ref, atol=1e-3, rtol=1e-3), "mismatch vs bf16 reference"

    # Sanity vs full-f32 math (loose tolerance only for bf16 matmul rounding).
    y_f32 = reference_forward(x, weights, biases, matmul_dtype=jnp.float32)
    assert jnp.allclose(y, y_f32, atol=5e-2, rtol=5e-2), "mismatch vs f32 reference"

    print("KERNEL_OK")
</pallas_src>

<mosaic_0001>
module attributes {stable_mosaic.version = 11 : i64} {
  func.func @_mlp_kernel(%arg0: i32, %arg1: memref<1000x4xbf16, #tpu.memory_space<vmem>>, %arg2: memref<4x128xbf16, #tpu.memory_space<vmem>>, %arg3: memref<1x128xf32, #tpu.memory_space<vmem>>, %arg4: memref<128x128xbf16, #tpu.memory_space<vmem>>, %arg5: memref<1x128xf32, #tpu.memory_space<vmem>>, %arg6: memref<128x2xbf16, #tpu.memory_space<vmem>>, %arg7: memref<1x2xf32, #tpu.memory_space<vmem>>, %arg8: memref<1000x2xf32, #tpu.memory_space<vmem>>) attributes {dimension_semantics = [#tpu.dimension_semantics<parallel>], iteration_bounds = array<i64: 1>, scalar_prefetch = 0 : i64, scratch_operands = 0 : i64, tpu.core_type = #tpu.core_type<tc>, window_params = [{transform_indices = @transform_0, window_bounds = array<i64: 1000, 4>}, {pipeline_mode = #tpu.pipeline_mode<synchronous>, transform_indices = @transform_1, window_bounds = array<i64: 4, 128>}, {pipeline_mode = #tpu.pipeline_mode<synchronous>, transform_indices = @transform_2, window_bounds = array<i64: 1, 128>}, {pipeline_mode = #tpu.pipeline_mode<synchronous>, transform_indices = @transform_3, window_bounds = array<i64: 128, 128>}, {pipeline_mode = #tpu.pipeline_mode<synchronous>, transform_indices = @transform_4, window_bounds = array<i64: 1, 128>}, {pipeline_mode = #tpu.pipeline_mode<synchronous>, transform_indices = @transform_5, window_bounds = array<i64: 128, 2>}, {pipeline_mode = #tpu.pipeline_mode<synchronous>, transform_indices = @transform_6, window_bounds = array<i64: 1, 2>}, {transform_indices = @transform_7, window_bounds = array<i64: 1000, 2>}]} {
    %c0 = arith.constant 0 : index
    %c0_0 = arith.constant 0 : index
    %0 = vector.load %arg1[%c0, %c0_0] : memref<1000x4xbf16, #tpu.memory_space<vmem>>, vector<1000x4xbf16>
    %c0_1 = arith.constant 0 : index
    %c0_2 = arith.constant 0 : index
    %1 = vector.load %arg2[%c0_1, %c0_2] : memref<4x128xbf16, #tpu.memory_space<vmem>>, vector<4x128xbf16>
    %c0_3 = arith.constant 0 : index
    %c0_4 = arith.constant 0 : index
    %2 = vector.load %arg3[%c0_3, %c0_4] : memref<1x128xf32, #tpu.memory_space<vmem>>, vector<1x128xf32>
    %cst = arith.constant dense<0.000000e+00> : vector<1000x128xf32>
    %3 = tpu.matmul %0, %1, %cst {dimension_numbers = #tpu.dot_dimension_numbers<[1], [0], [0], [1], [0, 0, 1, 1], [], []>} : vector<1000x4xbf16>, vector<4x128xbf16>, vector<1000x128xf32> -> vector<1000x128xf32>
    %4 = vector.broadcast %2 : vector<1x128xf32> to vector<1000x128xf32>
    %5 = arith.addf %3, %4 : vector<1000x128xf32>
    %cst_5 = arith.constant 0.000000e+00 : f32
    %6 = vector.broadcast %cst_5 : f32 to vector<1000x128xf32>
    %7 = arith.maximumf %5, %6 : vector<1000x128xf32>
    %c0_6 = arith.constant 0 : index
    %c0_7 = arith.constant 0 : index
    %8 = vector.load %arg4[%c0_6, %c0_7] : memref<128x128xbf16, #tpu.memory_space<vmem>>, vector<128x128xbf16>
    %c0_8 = arith.constant 0 : index
    %c0_9 = arith.constant 0 : index
    %9 = vector.load %arg5[%c0_8, %c0_9] : memref<1x128xf32, #tpu.memory_space<vmem>>, vector<1x128xf32>
    %10 = arith.truncf %7 : vector<1000x128xf32> to vector<1000x128xbf16>
    %cst_10 = arith.constant dense<0.000000e+00> : vector<1000x128xf32>
    %11 = tpu.matmul %10, %8, %cst_10 {dimension_numbers = #tpu.dot_dimension_numbers<[1], [0], [0], [1], [0, 0, 1, 1], [], []>} : vector<1000x128xbf16>, vector<128x128xbf16>, vector<1000x128xf32> -> vector<1000x128xf32>
    %12 = vector.broadcast %9 : vector<1x128xf32> to vector<1000x128xf32>
    %13 = arith.addf %11, %12 : vector<1000x128xf32>
    %cst_11 = arith.constant 0.000000e+00 : f32
    %14 = vector.broadcast %cst_11 : f32 to vector<1000x128xf32>
    %15 = arith.maximumf %13, %14 : vector<1000x128xf32>
    %c0_12 = arith.constant 0 : index
    %c0_13 = arith.constant 0 : index
    %16 = vector.load %arg6[%c0_12, %c0_13] : memref<128x2xbf16, #tpu.memory_space<vmem>>, vector<128x2xbf16>
    %c0_14 = arith.constant 0 : index
    %c0_15 = arith.constant 0 : index
    %17 = vector.load %arg7[%c0_14, %c0_15] : memref<1x2xf32, #tpu.memory_space<vmem>>, vector<1x2xf32>
    %18 = arith.truncf %15 : vector<1000x128xf32> to vector<1000x128xbf16>
    %cst_16 = arith.constant dense<0.000000e+00> : vector<1000x2xf32>
    %19 = tpu.matmul %18, %16, %cst_16 {dimension_numbers = #tpu.dot_dimension_numbers<[1], [0], [0], [1], [0, 0, 1, 1], [], []>} : vector<1000x128xbf16>, vector<128x2xbf16>, vector<1000x2xf32> -> vector<1000x2xf32>
    %20 = vector.broadcast %17 : vector<1x2xf32> to vector<1000x2xf32>
    %21 = arith.addf %19, %20 : vector<1000x2xf32>
    %c0_17 = arith.constant 0 : index
    %c0_18 = arith.constant 0 : index
    %22 = vector.load %arg8[%c0_17, %c0_18] : memref<1000x2xf32, #tpu.memory_space<vmem>>, vector<1000x2xf32>
    tpu.vector_store %arg8[%c0_17, %c0_18], %21 {strides = array<i32>} : memref<1000x2xf32, #tpu.memory_space<vmem>>, vector<1000x2xf32>,
    return
  }
  func.func @transform_0(%arg0: i32) -> (i32, i32) {
    %c0_i32 = arith.constant 0 : i32
    %c0_i32_0 = arith.constant 0 : i32
    return %arg0, %c0_i32 : i32, i32
  }
  func.func @transform_1(%arg0: i32) -> (i32, i32) {
    %c0_i32 = arith.constant 0 : i32
    %c0_i32_0 = arith.constant 0 : i32
    %c0_i32_1 = arith.constant 0 : i32
    return %c0_i32, %c0_i32_0 : i32, i32
  }
  func.func @transform_2(%arg0: i32) -> (i32, i32) {
    %c0_i32 = arith.constant 0 : i32
    %c0_i32_0 = arith.constant 0 : i32
    %c0_i32_1 = arith.constant 0 : i32
    return %c0_i32, %c0_i32_0 : i32, i32
  }
  func.func @transform_3(%arg0: i32) -> (i32, i32) {
    %c0_i32 = arith.constant 0 : i32
    %c0_i32_0 = arith.constant 0 : i32
    %c0_i32_1 = arith.constant 0 : i32
    return %c0_i32, %c0_i32_0 : i32, i32
  }
  func.func @transform_4(%arg0: i32) -> (i32, i32) {
    %c0_i32 = arith.constant 0 : i32
    %c0_i32_0 = arith.constant 0 : i32
    %c0_i32_1 = arith.constant 0 : i32
    return %c0_i32, %c0_i32_0 : i32, i32
  }
  func.func @transform_5(%arg0: i32) -> (i32, i32) {
    %c0_i32 = arith.constant 0 : i32
    %c0_i32_0 = arith.constant 0 : i32
    %c0_i32_1 = arith.constant 0 : i32
    return %c0_i32, %c0_i32_0 : i32, i32
  }
  func.func @transform_6(%arg0: i32) -> (i32, i32) {
    %c0_i32 = arith.constant 0 : i32
    %c0_i32_0 = arith.constant 0 : i32
    %c0_i32_1 = arith.constant 0 : i32
    return %c0_i32, %c0_i32_0 : i32, i32
  }
  func.func @transform_7(%arg0: i32) -> (i32, i32) {
    %c0_i32 = arith.constant 0 : i32
    %c0_i32_0 = arith.constant 0 : i32
    return %arg0, %c0_i32 : i32, i32
  }
}

</mosaic_0001>

<bundles_post_ra>
// kernel: tpu_custom_call.1
= control target key start
LH: loop header
LB: loop body
LE: loop exit
PB: predicated region body
PF: predicated region fallthrough
CT: control target
= control target key end

     0   :  { %vm663_vm0 = vcmask 1041408   ;;  %v4152_v0 = vmov 0.0   ;;  %vm4153_vm1 = vmmov 0   ;;  %vm473_vm2 = vcmask 31744   ;;  %s5980_s1 = inlined_call_operand.vmem [shape: bf16[4,128], index: 1, kind: input, shape index: {}]   ;;  %s5981_s0 = inlined_call_operand.vmem [shape: bf16[1000,4], index: 0, kind: input, shape index: {}]   ;;  %s5982_s3 = inlined_call_operand.vmem [shape: bf16[128,128], index: 3, kind: input, shape index: {}]   ;;  %s5983_s5 = inlined_call_operand.vmem [shape: bf16[128,2], index: 5, kind: input, shape index: {}]   ;;  %s5984_s2 = inlined_call_operand.vmem [shape: f32[1,128], index: 2, kind: input, shape index: {}]   ;;  %s5985_s4 = inlined_call_operand.vmem [shape: f32[1,128], index: 4, kind: input, shape index: {}]   ;;  %s5986_s6 = inlined_call_operand.vmem [shape: f32[1,2], index: 6, kind: input, shape index: {}]   ;;  %s5987_s7 = inlined_call_operand.vmem [shape: f32[1000,2], index: 7, kind: output, shape index: {}]  }
   0x1   :  { %4064 = vmatprep.subr.bf16.mxu1 %v4152_v0  ;;  %v152_v1 = vld [vmem:[%s5980_s1] sm:$0x3]  ;;  %3404 = vmatprep.mubr.msk.bf16.mxu1 %vm4153_vm1, %v4152_v0  ;;  %v4075_v6 = vld [vmem:[%s5982_s3 + $0x8] sm:$0xff]   ;;  %v4083_v9 = vld [vmem:[%s5982_s3 + $0x10] sm:$0xff]   ;;  %vm2793_vm3 = vcmask 15360  }
   0x2   :  { %v665_v2 = vsel %vm663_vm0, %v152_v1, 0  ;;  %v4068_v3 = vld [vmem:[%s5981_s0 + $0x100] sm:$0xff]   ;;  %3274 = vmatprep.subr.bf16.mxu0 %v4152_v0  ;;  %3276 = vmatprep.mubr.msk.bf16.mxu0 %vm4153_vm1, %v4152_v0  ;;  %v4070_v7 = vld [vmem:[%s5981_s0 + $0x108] sm:$0xff]   ;;  %v4071_v10 = vld [vmem:[%s5981_s0 + $0x110] sm:$0xff]  }
   0x3   :  { %4065 = vmatpush3.bf16.msra.mxu1 %v665_v2  ;;  %v4069_v4 = vld [vmem:[%s5982_s3] sm:$0xff]   ;;  %3275 = vmatpush3.bf16.msra.mxu0 %v665_v2  ;;  %v4076_v8 = vld [vmem:[%s5981_s0 + $0x8] sm:$0xff]   ;;  %v4078_v11 = vld [vmem:[%s5981_s0 + $0x10] sm:$0xff]  }
   0x4   :  { %3528 = vmatprep.subr.bf16.mxu1 %v4152_v0  ;;  %3796 = vmatprep.subr.bf16.mxu0 %v4152_v0  ;;  %v4073_v5 = vld [vmem:[%s5981_s0] sm:$0xff]   ;;  %v4072_v12 = vld [vmem:[%s5981_s0 + $0x118] sm:$0xff]   ;;  %v4077_v18 = vld [vmem:[%s5981_s0 + $0x128] sm:$0xff]  }
   0x5   :  { %v4092_v13 = vld [vmem:[%s5982_s3 + $0x18] sm:$0xff]   ;;  %v4074_v15 = vld [vmem:[%s5981_s0 + $0x120] sm:$0xff]   ;;  %v4110_v19 = vld [vmem:[%s5982_s3 + $0x28] sm:$0xff]  }
   0x6   :  { %3405 = vmatmul.mubr.msk.bf16.vlgmr.msra.gmra.mrb[0].mxu1 %vm473_vm2, %v4068_v3  ;;  %3277 = vmatmul.mubr.msk.bf16.vlgmr.msra.gmra.mrb[0].mxu0 %vm473_vm2, %v4073_v5  ;;  %v4080_v14 = vld [vmem:[%s5981_s0 + $0x18] sm:$0xff]   ;;  %v4101_v16 = vld [vmem:[%s5982_s3 + $0x20] sm:$0xff]   ;;  %v4085_v20 = vld [vmem:[%s5981_s0 + $0x28] sm:$0xff]  }
   0x7   :  { %3529 = vmatpush3.bf16.msra.mxu1 %v4069_v4  ;;  %3408 = vmatprep.mubr.msk.bf16.mxu1 %vm4153_vm1, %v4152_v0  ;;  %v4082_v17 = vld [vmem:[%s5981_s0 + $0x20] sm:$0xff]   ;;  %v4079_v21 = vld [vmem:[%s5981_s0 + $0x130] sm:$0xff]   ;;  %v4081_v23 = vld [vmem:[%s5981_s0 + $0x138] sm:$0xff]  }
   0x8   :  { %3530 = vmatprep.subr.bf16.mxu1 %v4152_v0  ;;  %3280 = vmatprep.mubr.msk.bf16.mxu0 %vm4153_vm1, %v4152_v0  ;;  %v4087_v22 = vld [vmem:[%s5981_s0 + $0x30] sm:$0xff]   ;;  %v4089_v24 = vld [vmem:[%s5981_s0 + $0x38] sm:$0xff]   ;;  %v4084_v26 = vld [vmem:[%s5981_s0 + $0x140] sm:$0xff]  }
   0x9   :  { %v4119_v25 = vld [vmem:[%s5982_s3 + $0x30] sm:$0xff]   ;;  %v4091_v27 = vld [vmem:[%s5981_s0 + $0x40] sm:$0xff]   ;;  %v4086_v28 = vld [vmem:[%s5981_s0 + $0x148] sm:$0xff]  }
   0xa   :  { %v4094_v29 = vld [vmem:[%s5981_s0 + $0x48] sm:$0xff]   ;;  %v4088_v30 = vld [vmem:[%s5981_s0 + $0x150] sm:$0xff]   ;;  %v4090_v32 = vld [vmem:[%s5981_s0 + $0x158] sm:$0xff]  }
   0xb   :  { %3531 = vmatpush3.bf16.msra.mxu1 %v4075_v6  ;;  %v4096_v31 = vld [vmem:[%s5981_s0 + $0x50] sm:$0xff]   ;;  %v4098_v33 = vld [vmem:[%s5981_s0 + $0x58] sm:$0xff]   ;;  %v4126_v35 = vld [vmem:[%s5983_s5] sm:$0xff]  }
   0xc   :  { %3532 = vmatprep.subr.bf16.mxu1 %v4152_v0  ;;  %v4129_v34 = vld [vmem:[%s5982_s3 + $0x38] sm:$0xff]   ;;  %v4093_v36 = vld [vmem:[%s5981_s0 + $0x160] sm:$0xff]   ;;  %3797 = vmatpush3.bf16.msra.mxu0 %v4126_v35  ;;  %v4095_v38 = vld [vmem:[%s5981_s0 + $0x168] sm:$0xff]  }
   0xd   :  { %3798 = vmatprep.subr.bf16.mxu0 %v4152_v0  ;;  %v4100_v37 = vld [vmem:[%s5981_s0 + $0x60] sm:$0xff]   ;;  %v4103_v39 = vld [vmem:[%s5981_s0 + $0x68] sm:$0xff]   ;;  %v4097_v40 = vld [vmem:[%s5981_s0 + $0x170] sm:$0xff]  }
   0xe   :  { %3409 = vmatmul.mubr.msk.bf16.gmra.mrb[4].mxu1 %vm473_vm2, %v4070_v7  ;;  %3281 = vmatmul.mubr.msk.bf16.gmra.mrb[4].mxu0 %vm473_vm2, %v4076_v8  ;;  %v4105_v41 = vld [vmem:[%s5981_s0 + $0x70] sm:$0xff]   ;;  %v4099_v42 = vld [vmem:[%s5981_s0 + $0x178] sm:$0xff]   ;;  %v4136_v44 = vld [vmem:[%s5983_s5 + $0x8] sm:$0xff]  }
   0xf   :  { %3412 = vmatprep.mubr.msk.bf16.mxu1 %vm4153_vm1, %v4152_v0  ;;  %3284 = vmatprep.mubr.msk.bf16.mxu0 %vm4153_vm1, %v4152_v0  ;;  %v4107_v43 = vld [vmem:[%s5981_s0 + $0x78] sm:$0xff]   ;;  %v4102_v45 = vld [vmem:[%s5981_s0 + $0x180] sm:$0xff]   ;;  %v4104_v47 = vld [vmem:[%s5981_s0 + $0x188] sm:$0xff]  }
  0x10   :  { %3533 = vmatpush3.bf16.msra.mxu1 %v4083_v9  ;;  %3799 = vmatpush3.bf16.msra.mxu0 %v4136_v44  ;;  %v4109_v46 = vld [vmem:[%s5981_s0 + $0x80] sm:$0xff]   ;;  %v4112_v48 = vld [vmem:[%s5981_s0 + $0x88] sm:$0xff]   ;;  %v4106_v49 = vld [vmem:[%s5981_s0 + $0x190] sm:$0xff]  }
  0x11   :  { %3534 = vmatprep.subr.bf16.mxu1 %v4152_v0  ;;  %3800 = vmatprep.subr.bf16.mxu0 %v4152_v0  ;;  %v4114_v50 = vld [vmem:[%s5981_s0 + $0x90] sm:$0xff]   ;;  %v4108_v51 = vld [vmem:[%s5981_s0 + $0x198] sm:$0xff]   ;;  %v4111_v54 = vld [vmem:[%s5981_s0 + $0x1a0] sm:$0xff]  }
  0x12   :  { %v4116_v52 = vld [vmem:[%s5981_s0 + $0x98] sm:$0xff]   ;;  %v4141_v53 = vld [vmem:[%s5983_s5 + $0x10] sm:$0xff]   ;;  %v4118_v55 = vld [vmem:[%s5981_s0 + $0xa0] sm:$0xff]  }
  0x13   :  { %v4113_v56 = vld [vmem:[%s5981_s0 + $0x1a8] sm:$0xff]   ;;  %v4115_v58 = vld [vmem:[%s5981_s0 + $0x1b0] sm:$0xff]   ;;  %v4117_v60 = vld [vmem:[%s5981_s0 + $0x1b8] sm:$0xff]  }
  0x14   :  { %3535 = vmatpush3.bf16.msra.mxu1 %v4092_v13  ;;  %3801 = vmatpush3.bf16.msra.mxu0 %v4141_v53  ;;  %v4121_v57 = vld [vmem:[%s5981_s0 + $0xa8] sm:$0xff]   ;;  %v4123_v59 = vld [vmem:[%s5981_s0 + $0xb0] sm:$0xff]   ;;  %v4125_v61 = vld [vmem:[%s5981_s0 + $0xb8] sm:$0xff]  }
  0x15   :  { %3536 = vmatprep.subr.bf16.mxu1 %v4152_v0  ;;  %3802 = vmatprep.subr.bf16.mxu0 %v4152_v0  ;;  %v4142_v62 = vld [vmem:[%s5983_s5 + $0x18] sm:$0xff]   ;;  %v4120_v63 = vld [vmem:[%s5981_s0 + $0x1c0] sm:$0xff]   ;;  %v4122_v2 = vld [vmem:[%s5981_s0 + $0x1c8] sm:$0xff]  }
  0x16   :  { %3413 = vmatmul.mubr.msk.bf16.gmra.mrb[8].mxu1 %vm473_vm2, %v4071_v10  ;;  %3285 = vmatmul.mubr.msk.bf16.gmra.mrb[8].mxu0 %vm473_vm2, %v4078_v11  ;;  %v4128_v1 = vld [vmem:[%s5981_s0 + $0xc0] sm:$0xff]   ;;  %v4131_v3 = vld [vmem:[%s5981_s0 + $0xc8] sm:$0xff]   ;;  %v4124_v4 = vld [vmem:[%s5981_s0 + $0x1d0] sm:$0xff]  }
  0x17   :  { %3416 = vmatprep.mubr.msk.bf16.mxu1 %vm4153_vm1, %v4152_v0  ;;  %3288 = vmatprep.mubr.msk.bf16.mxu0 %vm4153_vm1, %v4152_v0  ;;  %v4133_v5 = vld [vmem:[%s5981_s0 + $0xd0] sm:$0xff]   ;;  %v4574_v6 = vld [vmem:[%s5984_s2] ss:$0 sm:$0xff]  ;;  %v4127_v10 = vld [vmem:[%s5981_s0 + $0x1d8] sm:$0xff]  }
  0x18   :  { %3537 = vmatpush3.bf16.msra.mxu1 %v4101_v16  ;;  %3803 = vmatpush3.bf16.msra.mxu0 %v4142_v62 }
  0x19   :  { %3538 = vmatprep.subr.bf16.mxu1 %v4152_v0  ;;  %3804 = vmatprep.subr.bf16.mxu0 %v4152_v0 }
  0x1c   :  { %3539 = vmatpush3.bf16.msra.mxu1 %v4110_v19 }
  0x1d   :  { %3540 = vmatprep.subr.bf16.mxu1 %v4152_v0 }
  0x1e   :  { %3417 = vmatmul.mubr.msk.bf16.gmra.mrb[12].mxu1 %vm473_vm2, %v4072_v12  ;;  %3289 = vmatmul.mubr.msk.bf16.gmra.mrb[12].mxu0 %vm473_vm2, %v4080_v14 }
  0x1f   :  { %3420 = vmatprep.mubr.msk.bf16.mxu1 %vm4153_vm1, %v4152_v0  ;;  %3292 = vmatprep.mubr.msk.bf16.mxu0 %vm4153_vm1, %v4152_v0 }
  0x20   :  { %3541 = vmatpush3.bf16.msra.mxu1 %v4119_v25 }
  0x21   :  { %3542 = vmatprep.subr.bf16.mxu1 %v4152_v0 }
  0x24   :  { %3543 = vmatpush3.bf16.msra.mxu1 %v4129_v34 }
  0x26   :  { %3421 = vmatmul.mubr.msk.bf16.gmra.mrb[16].mxu1 %vm473_vm2, %v4074_v15  ;;  %3293 = vmatmul.mubr.msk.bf16.gmra.mrb[16].mxu0 %vm473_vm2, %v4082_v17  ;;  %v4135_v17 = vld [vmem:[%s5981_s0 + $0xd8] sm:$0xff]  }
  0x27   :  { %3424 = vmatprep.mubr.msk.bf16.mxu1 %vm4153_vm1, %v4152_v0  ;;  %3296 = vmatprep.mubr.msk.bf16.mxu0 %vm4153_vm1, %v4152_v0 }
  0x2e   :  { %3425 = vmatmul.mubr.msk.bf16.gmra.mrb[20].mxu1 %vm473_vm2, %v4077_v18  ;;  %3297 = vmatmul.mubr.msk.bf16.gmra.mrb[20].mxu0 %vm473_vm2, %v4085_v20 }
  0x2f   :  { %3428 = vmatprep.mubr.msk.bf16.mxu1 %vm4153_vm1, %v4152_v0  ;;  %3300 = vmatprep.mubr.msk.bf16.mxu0 %vm4153_vm1, %v4152_v0 }
  0x36   :  { %3429 = vmatmul.mubr.msk.bf16.gmra.mrb[24].mxu1 %vm473_vm2, %v4079_v21  ;;  %3301 = vmatmul.mubr.msk.bf16.gmra.mrb[24].mxu0 %vm473_vm2, %v4087_v22 }
  0x37   :  { %3432 = vmatprep.mubr.msk.bf16.mxu1 %vm4153_vm1, %v4152_v0  ;;  %3304 = vmatprep.mubr.msk.bf16.mxu0 %vm4153_vm1, %v4152_v0 }
  0x3e   :  { %3433 = vmatmul.mubr.msk.bf16.gmra.mrb[28].mxu1 %vm473_vm2, %v4081_v23  ;;  %3305 = vmatmul.mubr.msk.bf16.gmra.mrb[28].mxu0 %vm473_vm2, %v4089_v24  ;;  %v4143_v24 = vld [vmem:[%s5983_s5 + $0x20] sm:$0xff]  }
  0x3f   :  { %3436 = vmatprep.mubr.msk.bf16.mxu1 %vm4153_vm1, %v4152_v0  ;;  %3308 = vmatprep.mubr.msk.bf16.mxu0 %vm4153_vm1, %v4152_v0 }
  0x40   :  { %3805 = vmatpush3.bf16.msra.mxu0 %v4143_v24 }
  0x41   :  { %3806 = vmatprep.subr.bf16.mxu0 %v4152_v0 }
  0x46   :  { %3437 = vmatmul.mubr.msk.bf16.gmra.mrb[32].mxu1 %vm473_vm2, %v4084_v26  ;;  %3309 = vmatmul.mubr.msk.bf16.gmra.mrb[32].mxu0 %vm473_vm2, %v4091_v27 }
  0x47   :  { %3440 = vmatprep.mubr.msk.bf16.mxu1 %vm4153_vm1, %v4152_v0  ;;  %3312 = vmatprep.mubr.msk.bf16.mxu0 %vm4153_vm1, %v4152_v0 }
  0x4e   :  { %3441 = vmatmul.mubr.msk.bf16.gmra.mrb[36].mxu1 %vm473_vm2, %v4086_v28  ;;  %3313 = vmatmul.mubr.msk.bf16.gmra.mrb[36].mxu0 %vm473_vm2, %v4094_v29 }
  0x4f   :  { %3444 = vmatprep.mubr.msk.bf16.mxu1 %vm4153_vm1, %v4152_v0  ;;  %3316 = vmatprep.mubr.msk.bf16.mxu0 %vm4153_vm1, %v4152_v0 }
  0x56   :  { %3445 = vmatmul.mubr.msk.bf16.gmra.mrb[40].mxu1 %vm473_vm2, %v4088_v30  ;;  %3317 = vmatmul.mubr.msk.bf16.gmra.mrb[40].mxu0 %vm473_vm2, %v4096_v31  ;;  %v4130_v30 = vld [vmem:[%s5981_s0 + $0x1e0] sm:$0xff]  }
  0x57   :  { %3448 = vmatprep.mubr.msk.bf16.mxu1 %vm4153_vm1, %v4152_v0  ;;  %3320 = vmatprep.mubr.msk.bf16.mxu0 %vm4153_vm1, %v4152_v0 }
  0x5e   :  { %3449 = vmatmul.mubr.msk.bf16.gmra.mrb[44].mxu1 %vm473_vm2, %v4090_v32  ;;  %3321 = vmatmul.mubr.msk.bf16.gmra.mrb[44].mxu0 %vm473_vm2, %v4098_v33 }
  0x5f   :  { %3452 = vmatprep.mubr.msk.bf16.mxu1 %vm4153_vm1, %v4152_v0  ;;  %3324 = vmatprep.mubr.msk.bf16.mxu0 %vm4153_vm1, %v4152_v0 }
  0x66   :  { %3453 = vmatmul.mubr.msk.bf16.gmra.mrb[48].mxu1 %vm473_vm2, %v4093_v36  ;;  %3325 = vmatmul.mubr.msk.bf16.gmra.mrb[48].mxu0 %vm473_vm2, %v4100_v37 }
  0x67   :  { %3456 = vmatprep.mubr.msk.bf16.mxu1 %vm4153_vm1, %v4152_v0  ;;  %3328 = vmatprep.mubr.msk.bf16.mxu0 %vm4153_vm1, %v4152_v0 }
  0x6e   :  { %3457 = vmatmul.mubr.msk.bf16.gmra.mrb[52].mxu1 %vm473_vm2, %v4095_v38  ;;  %3329 = vmatmul.mubr.msk.bf16.gmra.mrb[52].mxu0 %vm473_vm2, %v4103_v39  ;;  %v4137_v38 = vld [vmem:[%s5981_s0 + $0xe0] sm:$0xff]  }
  0x6f   :  { %3460 = vmatprep.mubr.msk.bf16.mxu1 %vm4153_vm1, %v4152_v0  ;;  %3332 = vmatprep.mubr.msk.bf16.mxu0 %vm4153_vm1, %v4152_v0 }
  0x76   :  { %3461 = vmatmul.mubr.msk.bf16.gmra.mrb[56].mxu1 %vm473_vm2, %v4097_v40  ;;  %3333 = vmatmul.mubr.msk.bf16.gmra.mrb[56].mxu0 %vm473_vm2, %v4105_v41 }
  0x77   :  { %3464 = vmatprep.mubr.msk.bf16.mxu1 %vm4153_vm1, %v4152_v0  ;;  %3336 = vmatprep.mubr.msk.bf16.mxu0 %vm4153_vm1, %v4152_v0 }
  0x7e   :  { %3465 = vmatmul.mubr.msk.bf16.gmra.mrb[60].mxu1 %vm473_vm2, %v4099_v42  ;;  %3337 = vmatmul.mubr.msk.bf16.gmra.mrb[60].mxu0 %vm473_vm2, %v4107_v43 }
  0x7f   :  { %3468 = vmatprep.mubr.msk.bf16.mxu1 %vm4153_vm1, %v4152_v0  ;;  %3340 = vmatprep.mubr.msk.bf16.mxu0 %vm4153_vm1, %v4152_v0 }
  0x86   :  { %3469 = vmatmul.mubr.msk.bf16.gmra.mrb[64].mxu1 %vm473_vm2, %v4102_v45  ;;  %3341 = vmatmul.mubr.msk.bf16.gmra.mrb[64].mxu0 %vm473_vm2, %v4109_v46 }
  0x87   :  { %3472 = vmatprep.mubr.msk.bf16.mxu1 %vm4153_vm1, %v4152_v0  ;;  %3344 = vmatprep.mubr.msk.bf16.mxu0 %vm4153_vm1, %v4152_v0 }
  0x8e   :  { %3473 = vmatmul.mubr.msk.bf16.gmra.mrb[68].mxu1 %vm473_vm2, %v4104_v47  ;;  %3345 = vmatmul.mubr.msk.bf16.gmra.mrb[68].mxu0 %vm473_vm2, %v4112_v48 }
  0x8f   :  { %3476 = vmatprep.mubr.msk.bf16.mxu1 %vm4153_vm1, %v4152_v0  ;;  %3348 = vmatprep.mubr.msk.bf16.mxu0 %vm4153_vm1, %v4152_v0 }
  0x96   :  { %3477 = vmatmul.mubr.msk.bf16.gmra.mrb[72].mxu1 %vm473_vm2, %v4106_v49  ;;  %3349 = vmatmul.mubr.msk.bf16.gmra.mrb[72].mxu0 %vm473_vm2, %v4114_v50  ;;  %v4132_v50 = vld [vmem:[%s5981_s0 + $0x1e8] sm:$0xff]  }
  0x97   :  { %3480 = vmatprep.mubr.msk.bf16.mxu1 %vm4153_vm1, %v4152_v0  ;;  %3352 = vmatprep.mubr.msk.bf16.mxu0 %vm4153_vm1, %v4152_v0 }
  0x9e   :  { %3481 = vmatmul.mubr.msk.bf16.gmra.mrb[76].mxu1 %vm473_vm2, %v4108_v51  ;;  %3353 = vmatmul.mubr.msk.bf16.gmra.mrb[76].mxu0 %vm473_vm2, %v4116_v52 }
  0x9f   :  { %3484 = vmatprep.mubr.msk.bf16.mxu1 %vm4153_vm1, %v4152_v0  ;;  %3356 = vmatprep.mubr.msk.bf16.mxu0 %vm4153_vm1, %v4152_v0 }
  0xa6   :  { %3485 = vmatmul.mubr.msk.bf16.gmra.mrb[80].mxu1 %vm473_vm2, %v4111_v54  ;;  %3357 = vmatmul.mubr.msk.bf16.gmra.mrb[80].mxu0 %vm473_vm2, %v4118_v55 }
  0xa7   :  { %3488 = vmatprep.mubr.msk.bf16.mxu1 %vm4153_vm1, %v4152_v0  ;;  %3360 = vmatprep.mubr.msk.bf16.mxu0 %vm4153_vm1, %v4152_v0 }
  0xae   :  { %3489 = vmatmul.mubr.msk.bf16.gmra.mrb[84].mxu1 %vm473_vm2, %v4113_v56  ;;  %3361 = vmatmul.mubr.msk.bf16.gmra.mrb[84].mxu0 %vm473_vm2, %v4121_v57 }
  0xaf   :  { %3492 = vmatprep.mubr.msk.bf16.mxu1 %vm4153_vm1, %v4152_v0  ;;  %3364 = vmatprep.mubr.msk.bf16.mxu0 %vm4153_vm1, %v4152_v0 }
  0xb6   :  { %3493 = vmatmul.mubr.msk.bf16.gmra.mrb[88].mxu1 %vm473_vm2, %v4115_v58  ;;  %3365 = vmatmul.mubr.msk.bf16.gmra.mrb[88].mxu0 %vm473_vm2, %v4123_v59  ;;  %v4138_v58 = vld [vmem:[%s5981_s0 + $0xe8] sm:$0xff]  }
  0xb7   :  { %3496 = vmatprep.mubr.msk.bf16.mxu1 %vm4153_vm1, %v4152_v0  ;;  %3368 = vmatprep.mubr.msk.bf16.mxu0 %vm4153_vm1, %v4152_v0 }
  0xbe   :  { %3497 = vmatmul.mubr.msk.bf16.gmra.mrb[92].mxu1 %vm473_vm2, %v4117_v60  ;;  %3369 = vmatmul.mubr.msk.bf16.gmra.mrb[92].mxu0 %vm473_vm2, %v4125_v61 }
  0xbf   :  { %3500 = vmatprep.mubr.msk.bf16.mxu1 %vm4153_vm1, %v4152_v0  ;;  %3372 = vmatprep.mubr.msk.bf16.mxu0 %vm4153_vm1, %v4152_v0 }
  0xc6   :  { %3501 = vmatmul.mubr.msk.bf16.gmra.mrb[96].mxu1 %vm473_vm2, %v4120_v63  ;;  %3373 = vmatmul.mubr.msk.bf16.gmra.mrb[96].mxu0 %vm473_vm2, %v4128_v1 }
  0xc7   :  { %3504 = vmatprep.mubr.msk.bf16.mxu1 %vm4153_vm1, %v4152_v0  ;;  %3376 = vmatprep.mubr.msk.bf16.mxu0 %vm4153_vm1, %v4152_v0 }
  0xce   :  { %3505 = vmatmul.mubr.msk.bf16.gmra.mrb[100].mxu1 %vm473_vm2, %v4122_v2  ;;  %3377 = vmatmul.mubr.msk.bf16.gmra.mrb[100].mxu0 %vm473_vm2, %v4131_v3 }
  0xcf   :  { %3508 = vmatprep.mubr.msk.bf16.mxu1 %vm4153_vm1, %v4152_v0  ;;  %3380 = vmatprep.mubr.msk.bf16.mxu0 %vm4153_vm1, %v4152_v0 }
  0xd6   :  { %3509 = vmatmul.mubr.msk.bf16.gmra.mrb[104].mxu1 %vm473_vm2, %v4124_v4  ;;  %3381 = vmatmul.mubr.msk.bf16.gmra.mrb[104].mxu0 %vm473_vm2, %v4133_v5 }
  0xd7   :  { %3512 = vmatprep.mubr.msk.bf16.mxu1 %vm4153_vm1, %v4152_v0  ;;  %3384 = vmatprep.mubr.msk.bf16.mxu0 %vm4153_vm1, %v4152_v0 }
  0xd9   :  { %v957_v7 = vpop.f32.mrb[0].mxu1  ;;  %v701_v14 = vpop.f32.mrb[0].mxu0 }
  0xda   :  { %v958_v8 = vadd.f32 %v4574_v6, %v957_v7  ;;  %v3406_v9 = vpop.f32.mrb[1].mxu1  ;;  %v702_v15 = vadd.f32 %v4574_v6, %v701_v14  ;;  %v3278_v16 = vpop.f32.mrb[1].mxu0 }
  0xdb   :  { %v960_v11 = vpop.f32.mrb[2].mxu1  ;;  %v704_v20 = vpop.f32.mrb[2].mxu0  ;;  %v4139_v16 = vld [vmem:[%s5981_s0 + $0xf0] sm:$0xff]  }
  0xdc   :  { %v961_v12 = vadd.f32 %v4574_v6, %v960_v11  ;;  %v3407_v13 = vpop.f32.mrb[3].mxu1  ;;  %v1267_v18 = vmax.f32 %v958_v8, 0.0  ;;  %v1203_v21 = vmax.f32 %v702_v15, 0.0  ;;  %v705_v22 = vadd.f32 %v4574_v6, %v704_v20  ;;  %v3279_v23 = vpop.f32.mrb[3].mxu0  ;;  %v4134_v8 = vld [vmem:[%s5981_s0 + $0x1f0] ss:$0 sps:$4 sm:$0xff]  }
  0xde   :  { %v1268_v19 = vmax.f32 %v961_v12, 0.0  ;;  %3513 = vmatmul.mubr.msk.bf16.gmra.mrb[108].mxu1 %vm473_vm2, %v4127_v10  ;;  %v1204_v27 = vmax.f32 %v705_v22, 0.0  ;;  %3385 = vmatmul.mubr.msk.bf16.gmra.mrb[108].mxu0 %vm473_vm2, %v4135_v17 }
  0xdf   :  { %3516 = vmatprep.mubr.msk.bf16.mxu1 %vm4153_vm1, %v4152_v0  ;;  %3388 = vmatprep.mubr.msk.bf16.mxu0 %vm4153_vm1, %v4152_v0 }
  0xe0   :  { %v4597_v25 = vpack.c.bf16 %v1268_v19, %v1267_v18  ;;  %v4606_v32 = vpack.c.bf16 %v1204_v27, %v1203_v21 }
  0xe1   :  { %v965_v26 = vpop.f32.mrb[4].mxu1  ;;  %v709_v35 = vpop.f32.mrb[4].mxu0 }
  0xe2   :  { %v966_v28 = vadd.f32 %v4574_v6, %v965_v26  ;;  %v3410_v29 = vpop.f32.mrb[5].mxu1  ;;  %v710_v36 = vadd.f32 %v4574_v6, %v709_v35  ;;  %v3282_v37 = vpop.f32.mrb[5].mxu0 }
  0xe3   :  { %v968_v31 = vpop.f32.mrb[6].mxu1  ;;  %v712_v41 = vpop.f32.mrb[6].mxu0  ;;  %v4140_v37 = vld [vmem:[%s5981_s0 + $0xf8] sm:$0xff]  }
  0xe4   :  { %v969_v33 = vadd.f32 %v4574_v6, %v968_v31  ;;  %v3411_v34 = vpop.f32.mrb[7].mxu1  ;;  %v1269_v39 = vmax.f32 %v966_v28, 0.0  ;;  %v1205_v42 = vmax.f32 %v710_v36, 0.0  ;;  %v713_v43 = vadd.f32 %v4574_v6, %v712_v41  ;;  %v3283_v44 = vpop.f32.mrb[7].mxu0 }
  0xe6   :  { %v1270_v40 = vmax.f32 %v969_v33, 0.0  ;;  %3517 = vmatmul.mubr.msk.bf16.gmra.mrb[112].mxu1 %vm473_vm2, %v4130_v30  ;;  %v1206_v47 = vmax.f32 %v713_v43, 0.0  ;;  %3389 = vmatmul.mubr.msk.bf16.gmra.mrb[112].mxu0 %vm473_vm2, %v4137_v38 }
  0xe7   :  { %3520 = vmatprep.mubr.msk.bf16.mxu1 %vm4153_vm1, %v4152_v0  ;;  %3392 = vmatprep.mubr.msk.bf16.mxu0 %vm4153_vm1, %v4152_v0 }
  0xe8   :  { %v4618_v45 = vpack.c.bf16 %v1270_v40, %v1269_v39  ;;  %v4627_v52 = vpack.c.bf16 %v1206_v47, %v1205_v42 }
  0xe9   :  { %v973_v46 = vpop.f32.mrb[8].mxu1  ;;  %v717_v55 = vpop.f32.mrb[8].mxu0 }
  0xea   :  { %v974_v48 = vadd.f32 %v4574_v6, %v973_v46  ;;  %v3414_v49 = vpop.f32.mrb[9].mxu1  ;;  %v718_v56 = vadd.f32 %v4574_v6, %v717_v55  ;;  %v3286_v57 = vpop.f32.mrb[9].mxu0  ;;  %v4144_v46 = vld [vmem:[%s5983_s5 + $0x28] sm:$0xff]  }
  0xeb   :  { %v976_v51 = vpop.f32.mrb[10].mxu1  ;;  %v720_v61 = vpop.f32.mrb[10].mxu0  ;;  %3807 = vmatpush3.bf16.msra.mxu0 %v4144_v46 }
  0xec   :  { %v977_v53 = vadd.f32 %v4574_v6, %v976_v51  ;;  %v3415_v54 = vpop.f32.mrb[11].mxu1  ;;  %v1271_v59 = vmax.f32 %v974_v48, 0.0  ;;  %v1207_v62 = vmax.f32 %v718_v56, 0.0  ;;  %v721_v63 = vadd.f32 %v4574_v6, %v720_v61  ;;  %v3287_v1 = vpop.f32.mrb[11].mxu0  ;;  %3808 = vmatprep.subr.bf16.mxu0 %v4152_v0 }
  0xee   :  { %v1272_v60 = vmax.f32 %v977_v53, 0.0  ;;  %3521 = vmatmul.mubr.msk.bf16.gmra.mrb[116].mxu1 %vm473_vm2, %v4132_v50  ;;  %v1208_v4 = vmax.f32 %v721_v63, 0.0  ;;  %3393 = vmatmul.mubr.msk.bf16.gmra.mrb[116].mxu0 %vm473_vm2, %v4138_v58 }
  0xef   :  { %3524 = vmatprep.mubr.msk.bf16.mxu1 %vm4153_vm1, %v4152_v0  ;;  %3396 = vmatprep.mubr.msk.bf16.mxu0 %vm4153_vm1, %v4152_v0 }
  0xf0   :  { %v4638_v2 = vpack.c.bf16 %v1272_v60, %v1271_v59  ;;  %v4647_v10 = vpack.c.bf16 %v1208_v4, %v1207_v62 }
  0xf1   :  { %v981_v3 = vpop.f32.mrb[12].mxu1  ;;  %v725_v13 = vpop.f32.mrb[12].mxu0 }
  0xf2   :  { %v982_v5 = vadd.f32 %v4574_v6, %v981_v3  ;;  %v3418_v7 = vpop.f32.mrb[13].mxu1  ;;  %v726_v14 = vadd.f32 %v4574_v6, %v725_v13  ;;  %v3290_v15 = vpop.f32.mrb[13].mxu0 }
  0xf3   :  { %v984_v9 = vpop.f32.mrb[14].mxu1  ;;  %v728_v19 = vpop.f32.mrb[14].mxu0 }
  0xf4   :  { %v985_v11 = vadd.f32 %v4574_v6, %v984_v9  ;;  %v3419_v12 = vpop.f32.mrb[15].mxu1  ;;  %v1273_v17 = vmax.f32 %v982_v5, 0.0  ;;  %v1209_v20 = vmax.f32 %v726_v14, 0.0  ;;  %v729_v21 = vadd.f32 %v4574_v6, %v728_v19  ;;  %v3291_v22 = vpop.f32.mrb[15].mxu0 }
  0xf6   :  { %v1274_v18 = vmax.f32 %v985_v11, 0.0  ;;  %3525 = vmatmul.mubr.msk.bf16.gmra.mrb[120].mxu1 %vm473_vm2, %v4134_v8  ;;  %v1210_v26 = vmax.f32 %v729_v21, 0.0  ;;  %3397 = vmatmul.mubr.msk.bf16.gmra.mrb[120].mxu0 %vm473_vm2, %v4139_v16 }
  0xf7   :  { %3544 = vmatprep.mubr.msk.bf16.mxu1 %vm4153_vm1, %v4152_v0  ;;  %3400 = vmatprep.mubr.msk.bf16.mxu0 %vm4153_vm1, %v4152_v0 }
  0xf8   :  { %v4658_v23 = vpack.c.bf16 %v1274_v18, %v1273_v17  ;;  %v4664_v30 = vpack.c.bf16 %v1210_v26, %v1209_v20 }
  0xf9   :  { %v989_v24 = vpop.f32.mrb[16].mxu1  ;;  %v733_v34 = vpop.f32.mrb[16].mxu0 }
  0xfa   :  { %v990_v27 = vadd.f32 %v4574_v6, %v989_v24  ;;  %v3422_v28 = vpop.f32.mrb[17].mxu1  ;;  %v734_v35 = vadd.f32 %v4574_v6, %v733_v34  ;;  %v3294_v36 = vpop.f32.mrb[17].mxu0 }
  0xfb   :  { %v992_v29 = vpop.f32.mrb[18].mxu1  ;;  %v736_v40 = vpop.f32.mrb[18].mxu0 }
  0xfc   :  { %v993_v31 = vadd.f32 %v4574_v6, %v992_v29  ;;  %v3423_v33 = vpop.f32.mrb[19].mxu1  ;;  %v1275_v38 = vmax.f32 %v990_v27, 0.0  ;;  %v1211_v41 = vmax.f32 %v734_v35, 0.0  ;;  %v737_v42 = vadd.f32 %v4574_v6, %v736_v40  ;;  %v3295_v43 = vpop.f32.mrb[19].mxu0 }
  0xfe   :  { %v1276_v39 = vmax.f32 %v993_v31, 0.0  ;;  %3545 = vmatmul.mubr.bf16.vlgmr.msra.gmra.mrb[124].mxu1 %v4606_v32  ;;  %v1212_v48 = vmax.f32 %v737_v42, 0.0  ;;  %3401 = vmatmul.mubr.msk.bf16.gmra.mrb[124].mxu0 %vm473_vm2, %v4140_v37 }
  0xff   :  { %3548 = vmatprep.mubr.msk.bf16.mxu1 %vm4153_vm1, %v4152_v0  ;;  %3812 = vmatprep.mubr.msk.bf16.mxu0 %vm4153_vm1, %v4152_v0 }
 0x100   :  { %v4675_v44 = vpack.c.bf16 %v1276_v39, %v1275_v38  ;;  %v4684_v51 = vpack.c.bf16 %v1212_v48, %v1211_v41 }
 0x101   :  { %v997_v47 = vpop.f32.mrb[20].mxu1  ;;  %v741_v55 = vpop.f32.mrb[20].mxu0 }
 0x102   :  { %v998_v32 = vadd.f32 %v4574_v6, %v997_v47  ;;  %v3426_v49 = vpop.f32.mrb[21].mxu1  ;;  %v742_v56 = vadd.f32 %v4574_v6, %v741_v55  ;;  %v3298_v57 = vpop.f32.mrb[21].mxu0 }
 0x103   :  { %v1000_v50 = vpop.f32.mrb[22].mxu1  ;;  %v744_v60 = vpop.f32.mrb[22].mxu0 }
 0x104   :  { %v1001_v53 = vadd.f32 %v4574_v6, %v1000_v50  ;;  %v3427_v54 = vpop.f32.mrb[23].mxu1  ;;  %v1277_v58 = vmax.f32 %v998_v32, 0.0  ;;  %v1213_v61 = vmax.f32 %v742_v56, 0.0  ;;  %v745_v62 = vadd.f32 %v4574_v6, %v744_v60  ;;  %v3299_v63 = vpop.f32.mrb[23].mxu0 }
 0x105   :  { %v4145_v63 = vld [vmem:[%s5983_s5 + $0x30] sm:$0xff]  }
 0x106   :  { %v1278_v59 = vmax.f32 %v1001_v53, 0.0  ;;  %3549 = vmatmul.mubr.bf16.gmra.mrb[128].mxu1 %v4627_v52  ;;  %v1214_v4 = vmax.f32 %v745_v62, 0.0  ;;  %3809 = vmatpush3.bf16.msra.mxu0 %v4145_v63 }
 0x107   :  { %3552 = vmatprep.mubr.msk.bf16.mxu1 %vm4153_vm1, %v4152_v0  ;;  %3810 = vmatprep.subr.bf16.mxu0 %v4152_v0 }
 0x108   :  { %v4693_v1 = vpack.c.bf16 %v1278_v59, %v1277_v58  ;;  %v4696_v9 = vpack.c.bf16 %v1214_v4, %v1213_v61 }
 0x109   :  { %v1005_v3 = vpop.f32.mrb[24].mxu1  ;;  %v749_v12 = vpop.f32.mrb[24].mxu0 }
 0x10a   :  { %v1006_v5 = vadd.f32 %v4574_v6, %v1005_v3  ;;  %v3430_v7 = vpop.f32.mrb[25].mxu1  ;;  %v750_v13 = vadd.f32 %v4574_v6, %v749_v12  ;;  %v3302_v14 = vpop.f32.mrb[25].mxu0 }
 0x10b   :  { %v1008_v8 = vpop.f32.mrb[26].mxu1  ;;  %v752_v17 = vpop.f32.mrb[26].mxu0 }
 0x10c   :  { %v1009_v52 = vadd.f32 %v4574_v6, %v1008_v8  ;;  %v3431_v11 = vpop.f32.mrb[27].mxu1  ;;  %v1279_v15 = vmax.f32 %v1006_v5, 0.0  ;;  %v1215_v18 = vmax.f32 %v750_v13, 0.0  ;;  %v753_v19 = vadd.f32 %v4574_v6, %v752_v17  ;;  %v3303_v20 = vpop.f32.mrb[27].mxu0 }
 0x10e   :  { %v1280_v16 = vmax.f32 %v1009_v52, 0.0  ;;  %3553 = vmatmul.mubr.bf16.gmra.mrb[132].mxu1 %v4647_v10  ;;  %v1216_v24 = vmax.f32 %v753_v19, 0.0 }
 0x10f   :  { %3556 = vmatprep.mubr.msk.bf16.mxu1 %vm4153_vm1, %v4152_v0 }
 0x110   :  { %v4704_v21 = vpack.c.bf16 %v1280_v16, %v1279_v15  ;;  %v4707_v29 = vpack.c.bf16 %v1216_v24, %v1215_v18 }
 0x111   :  { %v1013_v22 = vpop.f32.mrb[28].mxu1  ;;  %v757_v33 = vpop.f32.mrb[28].mxu0 }
 0x112   :  { %v1014_v26 = vadd.f32 %v4574_v6, %v1013_v22  ;;  %v3434_v27 = vpop.f32.mrb[29].mxu1  ;;  %v758_v34 = vadd.f32 %v4574_v6, %v757_v33  ;;  %v3306_v35 = vpop.f32.mrb[29].mxu0 }
 0x113   :  { %v1016_v28 = vpop.f32.mrb[30].mxu1  ;;  %v760_v38 = vpop.f32.mrb[30].mxu0 }
 0x114   :  { %v1017_v10 = vadd.f32 %v4574_v6, %v1016_v28  ;;  %v3435_v31 = vpop.f32.mrb[31].mxu1  ;;  %v1281_v36 = vmax.f32 %v1014_v26, 0.0  ;;  %v1217_v39 = vmax.f32 %v758_v34, 0.0  ;;  %v761_v40 = vadd.f32 %v4574_v6, %v760_v38  ;;  %v3307_v41 = vpop.f32.mrb[31].mxu0 }
 0x116   :  { %v1282_v37 = vmax.f32 %v1017_v10, 0.0  ;;  %3557 = vmatmul.mubr.bf16.gmra.mrb[136].mxu1 %v4664_v30  ;;  %v1218_v46 = vmax.f32 %v761_v40, 0.0 }
 0x117   :  { %3560 = vmatprep.mubr.msk.bf16.mxu1 %vm4153_vm1, %v4152_v0 }
 0x118   :  { %v4715_v42 = vpack.c.bf16 %v1282_v37, %v1281_v36  ;;  %v4718_v49 = vpack.c.bf16 %v1218_v46, %v1217_v39 }
 0x119   :  { %v1021_v43 = vpop.f32.mrb[32].mxu1  ;;  %v765_v53 = vpop.f32.mrb[32].mxu0 }
 0x11a   :  { %v1022_v47 = vadd.f32 %v4574_v6, %v1021_v43  ;;  %v3438_v48 = vpop.f32.mrb[33].mxu1  ;;  %v766_v54 = vadd.f32 %v4574_v6, %v765_v53  ;;  %v3310_v55 = vpop.f32.mrb[33].mxu0 }
 0x11b   :  { %v1024_v32 = vpop.f32.mrb[34].mxu1  ;;  %v768_v58 = vpop.f32.mrb[34].mxu0 }
 0x11c   :  { %v1025_v30 = vadd.f32 %v4574_v6, %v1024_v32  ;;  %v3439_v50 = vpop.f32.mrb[35].mxu1  ;;  %v1283_v56 = vmax.f32 %v1022_v47, 0.0  ;;  %v1219_v59 = vmax.f32 %v766_v54, 0.0  ;;  %v769_v60 = vadd.f32 %v4574_v6, %v768_v58  ;;  %v3311_v61 = vpop.f32.mrb[35].mxu0 }
 0x11e   :  { %v1284_v57 = vmax.f32 %v1025_v30, 0.0  ;;  %3561 = vmatmul.mubr.bf16.gmra.mrb[140].mxu1 %v4684_v51  ;;  %v1220_v4 = vmax.f32 %v769_v60, 0.0 }
 0x11f   :  { %3564 = vmatprep.mubr.msk.bf16.mxu1 %vm4153_vm1, %v4152_v0 }
 0x120   :  { %v4726_v62 = vpack.c.bf16 %v1284_v57, %v1283_v56  ;;  %v4732_v8 = vpack.c.bf16 %v1220_v4, %v1219_v59 }
 0x121   :  { %v1029_v3 = vpop.f32.mrb[36].mxu1  ;;  %v773_v12 = vpop.f32.mrb[36].mxu0 }
 0x122   :  { %v1030_v5 = vadd.f32 %v4574_v6, %v1029_v3  ;;  %v3442_v7 = vpop.f32.mrb[37].mxu1  ;;  %v774_v13 = vadd.f32 %v4574_v6, %v773_v12  ;;  %v3314_v14 = vpop.f32.mrb[37].mxu0 }
 0x123   :  { %v1032_v51 = vpop.f32.mrb[38].mxu1  ;;  %v776_v17 = vpop.f32.mrb[38].mxu0 }
 0x124   :  { %v1033_v52 = vadd.f32 %v4574_v6, %v1032_v51  ;;  %v3443_v11 = vpop.f32.mrb[39].mxu1  ;;  %v1285_v15 = vmax.f32 %v1030_v5, 0.0  ;;  %v1221_v18 = vmax.f32 %v774_v13, 0.0  ;;  %v777_v19 = vadd.f32 %v4574_v6, %v776_v17  ;;  %v3315_v20 = vpop.f32.mrb[39].mxu0 }
 0x126   :  { %v1286_v16 = vmax.f32 %v1033_v52, 0.0  ;;  %3565 = vmatmul.mubr.bf16.gmra.mrb[144].mxu1 %v4696_v9  ;;  %v1222_v26 = vmax.f32 %v777_v19, 0.0 }
 0x127   :  { %3568 = vmatprep.mubr.msk.bf16.mxu1 %vm4153_vm1, %v4152_v0 }
 0x128   :  { %v4741_v22 = vpack.c.bf16 %v1286_v16, %v1285_v15  ;;  %v4744_v31 = vpack.c.bf16 %v1222_v26, %v1221_v18 }
 0x129   :  { %v1037_v24 = vpop.f32.mrb[40].mxu1  ;;  %v781_v34 = vpop.f32.mrb[40].mxu0 }
 0x12a   :  { %v1038_v27 = vadd.f32 %v4574_v6, %v1037_v24  ;;  %v3446_v28 = vpop.f32.mrb[41].mxu1  ;;  %v782_v35 = vadd.f32 %v4574_v6, %v781_v34  ;;  %v3318_v36 = vpop.f32.mrb[41].mxu0 }
 0x12b   :  { %v1040_v10 = vpop.f32.mrb[42].mxu1  ;;  %v784_v39 = vpop.f32.mrb[42].mxu0  ;;  %v4146_v28 = vld [vmem:[%s5983_s5 + $0x38] sm:$0xff]  }
 0x12c   :  { %v1041_v9 = vadd.f32 %v4574_v6, %v1040_v10  ;;  %v3447_v33 = vpop.f32.mrb[43].mxu1  ;;  %v1287_v37 = vmax.f32 %v1038_v27, 0.0  ;;  %v1223_v40 = vmax.f32 %v782_v35, 0.0  ;;  %v785_v41 = vadd.f32 %v4574_v6, %v784_v39  ;;  %v3319_v43 = vpop.f32.mrb[43].mxu0  ;;  %3811 = vmatpush3.bf16.msra.mxu0 %v4146_v28 }
 0x12e   :  { %v1288_v38 = vmax.f32 %v1041_v9, 0.0  ;;  %3569 = vmatmul.mubr.bf16.gmra.mrb[148].mxu1 %v4707_v29  ;;  %v1224_v48 = vmax.f32 %v785_v41, 0.0 }
 0x12f   :  { %3572 = vmatprep.mubr.msk.bf16.mxu1 %vm4153_vm1, %v4152_v0 }
 0x130   :  { %v4752_v46 = vpack.c.bf16 %v1288_v38, %v1287_v37  ;;  %v4755_v53 = vpack.c.bf16 %v1224_v48, %v1223_v40 }
 0x131   :  { %v1045_v47 = vpop.f32.mrb[44].mxu1  ;;  %v789_v55 = vpop.f32.mrb[44].mxu0 }
 0x132   :  { %v1046_v32 = vadd.f32 %v4574_v6, %v1045_v47  ;;  %v3450_v30 = vpop.f32.mrb[45].mxu1  ;;  %v790_v56 = vadd.f32 %v4574_v6, %v789_v55  ;;  %v3322_v57 = vpop.f32.mrb[45].mxu0 }
 0x133   :  { %v1048_v50 = vpop.f32.mrb[46].mxu1  ;;  %v792_v60 = vpop.f32.mrb[46].mxu0 }
 0x134   :  { %v1049_v29 = vadd.f32 %v4574_v6, %v1048_v50  ;;  %v3451_v54 = vpop.f32.mrb[47].mxu1  ;;  %v1289_v58 = vmax.f32 %v1046_v32, 0.0  ;;  %v1225_v61 = vmax.f32 %v790_v56, 0.0  ;;  %v793_v63 = vadd.f32 %v4574_v6, %v792_v60  ;;  %v3323_v3 = vpop.f32.mrb[47].mxu0 }
 0x136   :  { %v1290_v59 = vmax.f32 %v1049_v29, 0.0  ;;  %3573 = vmatmul.mubr.bf16.gmra.mrb[152].mxu1 %v4718_v49  ;;  %v1226_v7 = vmax.f32 %v793_v63, 0.0 }
 0x137   :  { %3576 = vmatprep.mubr.msk.bf16.mxu1 %vm4153_vm1, %v4152_v0 }
 0x138   :  { %v4763_v4 = vpack.c.bf16 %v1290_v59, %v1289_v58  ;;  %v4766_v12 = vpack.c.bf16 %v1226_v7, %v1225_v61 }
 0x139   :  { %v1053_v5 = vpop.f32.mrb[48].mxu1  ;;  %v797_v14 = vpop.f32.mrb[48].mxu0 }
 0x13a   :  { %v1054_v51 = vadd.f32 %v4574_v6, %v1053_v5  ;;  %v3454_v52 = vpop.f32.mrb[49].mxu1  ;;  %v798_v15 = vadd.f32 %v4574_v6, %v797_v14  ;;  %v3326_v16 = vpop.f32.mrb[49].mxu0 }
 0x13b   :  { %v1056_v11 = vpop.f32.mrb[50].mxu1  ;;  %v800_v19 = vpop.f32.mrb[50].mxu0 }
 0x13c   :  { %v1057_v49 = vadd.f32 %v4574_v6, %v1056_v11  ;;  %v3455_v13 = vpop.f32.mrb[51].mxu1  ;;  %v1291_v17 = vmax.f32 %v1054_v51, 0.0  ;;  %v1227_v20 = vmax.f32 %v798_v15, 0.0  ;;  %v801_v24 = vadd.f32 %v4574_v6, %v800_v19  ;;  %v3327_v26 = vpop.f32.mrb[51].mxu0 }
 0x13e   :  { %v1292_v18 = vmax.f32 %v1057_v49, 0.0  ;;  %3577 = vmatmul.mubr.bf16.gmra.mrb[156].mxu1 %v4732_v8  ;;  %v1228_v9 = vmax.f32 %v801_v24, 0.0 }
 0x13f   :  { %3580 = vmatprep.mubr.msk.bf16.mxu1 %vm4153_vm1, %v4152_v0 }
 0x140   :  { %v4774_v27 = vpack.c.bf16 %v1292_v18, %v1291_v17  ;;  %v4780_v35 = vpack.c.bf16 %v1228_v9, %v1227_v20 }
 0x141   :  { %v1061_v10 = vpop.f32.mrb[52].mxu1  ;;  %v805_v38 = vpop.f32.mrb[52].mxu0 }
 0x142   :  { %v1062_v33 = vadd.f32 %v4574_v6, %v1061_v10  ;;  %v3458_v34 = vpop.f32.mrb[53].mxu1  ;;  %v806_v39 = vadd.f32 %v4574_v6, %v805_v38  ;;  %v3330_v40 = vpop.f32.mrb[53].mxu0 }
 0x143   :  { %v1064_v8 = vpop.f32.mrb[54].mxu1  ;;  %v808_v47 = vpop.f32.mrb[54].mxu0 }
 0x144   :  { %v1065_v36 = vadd.f32 %v4574_v6, %v1064_v8  ;;  %v3459_v37 = vpop.f32.mrb[55].mxu1  ;;  %v1293_v41 = vmax.f32 %v1062_v33, 0.0  ;;  %v1229_v48 = vmax.f32 %v806_v39, 0.0  ;;  %v809_v32 = vadd.f32 %v4574_v6, %v808_v47  ;;  %v3331_v30 = vpop.f32.mrb[55].mxu0 }
 0x146   :  { %v1294_v43 = vmax.f32 %v1065_v36, 0.0  ;;  %3581 = vmatmul.mubr.bf16.gmra.mrb[160].mxu1 %v4744_v31  ;;  %v1230_v54 = vmax.f32 %v809_v32, 0.0 }
 0x147   :  { %3584 = vmatprep.mubr.msk.bf16.mxu1 %vm4153_vm1, %v4152_v0 }
 0x148   :  { %v4788_v50 = vpack.c.bf16 %v1294_v43, %v1293_v41  ;;  %v4791_v58 = vpack.c.bf16 %v1230_v54, %v1229_v48 }
 0x149   :  { %v1069_v29 = vpop.f32.mrb[56].mxu1  ;;  %v813_v60 = vpop.f32.mrb[56].mxu0 }
 0x14a   :  { %v1070_v55 = vadd.f32 %v4574_v6, %v1069_v29  ;;  %v3462_v56 = vpop.f32.mrb[57].mxu1  ;;  %v814_v61 = vadd.f32 %v4574_v6, %v813_v60  ;;  %v3334_v63 = vpop.f32.mrb[57].mxu0 }
 0x14b   :  { %v1072_v57 = vpop.f32.mrb[58].mxu1  ;;  %v816_v7 = vpop.f32.mrb[58].mxu0 }
 0x14c   :  { %v1073_v31 = vadd.f32 %v4574_v6, %v1072_v57  ;;  %v3463_v59 = vpop.f32.mrb[59].mxu1  ;;  %v1295_v3 = vmax.f32 %v1070_v55, 0.0  ;;  %v1231_v51 = vmax.f32 %v814_v61, 0.0  ;;  %v817_v52 = vadd.f32 %v4574_v6, %v816_v7  ;;  %v3335_v11 = vpop.f32.mrb[59].mxu0 }
 0x14e   :  { %v1296_v5 = vmax.f32 %v1073_v31, 0.0  ;;  %3585 = vmatmul.mubr.bf16.gmra.mrb[164].mxu1 %v4755_v53  ;;  %v1232_v14 = vmax.f32 %v817_v52, 0.0 }
 0x14f   :  { %3588 = vmatprep.mubr.msk.bf16.mxu1 %vm4153_vm1, %v4152_v0 }
 0x150   :  { %v4799_v49 = vpack.c.bf16 %v1296_v5, %v1295_v3  ;;  %v4802_v18 = vpack.c.bf16 %v1232_v14, %v1231_v51 }
 0x151   :  { %v1077_v13 = vpop.f32.mrb[60].mxu1  ;;  %v821_v20 = vpop.f32.mrb[60].mxu0 }
 0x152   :  { %v1078_v15 = vadd.f32 %v4574_v6, %v1077_v13  ;;  %v3466_v16 = vpop.f32.mrb[61].mxu1  ;;  %v822_v24 = vadd.f32 %v4574_v6, %v821_v20  ;;  %v3338_v26 = vpop.f32.mrb[61].mxu0 }
 0x153   :  { %v1080_v17 = vpop.f32.mrb[62].mxu1  ;;  %v824_v9 = vpop.f32.mrb[62].mxu0 }
 0x154   :  { %v1081_v53 = vadd.f32 %v4574_v6, %v1080_v17  ;;  %v3467_v19 = vpop.f32.mrb[63].mxu1  ;;  %v1297_v28 = vmax.f32 %v1078_v15, 0.0  ;;  %v1233_v33 = vmax.f32 %v822_v24, 0.0  ;;  %v825_v34 = vadd.f32 %v4574_v6, %v824_v9  ;;  %v3339_v8 = vpop.f32.mrb[63].mxu0 }
 0x156   :  { %v1298_v10 = vmax.f32 %v1081_v53, 0.0  ;;  %3589 = vmatmul.mubr.bf16.gmra.mrb[168].mxu1 %v4766_v12  ;;  %v1234_v38 = vmax.f32 %v825_v34, 0.0 }
 0x157   :  { %3592 = vmatprep.mubr.msk.bf16.mxu1 %vm4153_vm1, %v4152_v0 }
 0x158   :  { %v4810_v36 = vpack.c.bf16 %v1298_v10, %v1297_v28  ;;  %v4813_v43 = vpack.c.bf16 %v1234_v38, %v1233_v33 }
 0x159   :  { %v1085_v37 = vpop.f32.mrb[64].mxu1  ;;  %v829_v48 = vpop.f32.mrb[64].mxu0 }
 0x15a   :  { %v1086_v39 = vadd.f32 %v4574_v6, %v1085_v37  ;;  %v3470_v40 = vpop.f32.mrb[65].mxu1  ;;  %v830_v32 = vadd.f32 %v4574_v6, %v829_v48  ;;  %v3342_v30 = vpop.f32.mrb[65].mxu0 }
 0x15b   :  { %v1088_v41 = vpop.f32.mrb[66].mxu1  ;;  %v832_v55 = vpop.f32.mrb[66].mxu0 }
 0x15c   :  { %v1089_v12 = vadd.f32 %v4574_v6, %v1088_v41  ;;  %v3471_v47 = vpop.f32.mrb[67].mxu1  ;;  %v1299_v29 = vmax.f32 %v1086_v39, 0.0  ;;  %v1235_v56 = vmax.f32 %v830_v32, 0.0  ;;  %v833_v57 = vadd.f32 %v4574_v6, %v832_v55  ;;  %v3343_v31 = vpop.f32.mrb[67].mxu0 }
 0x15e   :  { %v1300_v54 = vmax.f32 %v1089_v12, 0.0  ;;  %3593 = vmatmul.mubr.bf16.gmra.mrb[172].mxu1 %v4780_v35  ;;  %v1236_v61 = vmax.f32 %v833_v57, 0.0 }
 0x15f   :  { %3596 = vmatprep.mubr.msk.bf16.mxu1 %vm4153_vm1, %v4152_v0 }
 0x160   :  { %v4821_v59 = vpack.c.bf16 %v1300_v54, %v1299_v29  ;;  %v4824_v7 = vpack.c.bf16 %v1236_v61, %v1235_v56 }
 0x161   :  { %v1093_v60 = vpop.f32.mrb[68].mxu1  ;;  %v837_v52 = vpop.f32.mrb[68].mxu0 }
 0x162   :  { %v1094_v63 = vadd.f32 %v4574_v6, %v1093_v60  ;;  %v3474_v3 = vpop.f32.mrb[69].mxu1  ;;  %v838_v11 = vadd.f32 %v4574_v6, %v837_v52  ;;  %v3346_v13 = vpop.f32.mrb[69].mxu0 }
 0x163   :  { %v1096_v5 = vpop.f32.mrb[70].mxu1  ;;  %v840_v16 = vpop.f32.mrb[70].mxu0 }
 0x164   :  { %v1097_v35 = vadd.f32 %v4574_v6, %v1096_v5  ;;  %v3475_v51 = vpop.f32.mrb[71].mxu1  ;;  %v1301_v14 = vmax.f32 %v1094_v63, 0.0  ;;  %v1237_v17 = vmax.f32 %v838_v11, 0.0  ;;  %v841_v53 = vadd.f32 %v4574_v6, %v840_v16  ;;  %v3347_v19 = vpop.f32.mrb[71].mxu0 }
 0x166   :  { %v1302_v15 = vmax.f32 %v1097_v35, 0.0  ;;  %3597 = vmatmul.mubr.bf16.gmra.mrb[176].mxu1 %v4791_v58  ;;  %v1238_v26 = vmax.f32 %v841_v53, 0.0 }
 0x167   :  { %3600 = vmatprep.mubr.msk.bf16.mxu1 %vm4153_vm1, %v4152_v0 }
 0x168   :  { %v4832_v20 = vpack.c.bf16 %v1302_v15, %v1301_v14  ;;  %v4835_v33 = vpack.c.bf16 %v1238_v26, %v1237_v17 }
 0x169   :  { %v1101_v24 = vpop.f32.mrb[72].mxu1  ;;  %v845_v8 = vpop.f32.mrb[72].mxu0 }
 0x16a   :  { %v1102_v28 = vadd.f32 %v4574_v6, %v1101_v24  ;;  %v3478_v10 = vpop.f32.mrb[73].mxu1  ;;  %v846_v37 = vadd.f32 %v4574_v6, %v845_v8  ;;  %v3350_v38 = vpop.f32.mrb[73].mxu0 }
 0x16b   :  { %v1104_v9 = vpop.f32.mrb[74].mxu1  ;;  %v848_v41 = vpop.f32.mrb[74].mxu0 }
 0x16c   :  { %v1105_v58 = vadd.f32 %v4574_v6, %v1104_v9  ;;  %v3479_v34 = vpop.f32.mrb[75].mxu1  ;;  %v1303_v39 = vmax.f32 %v1102_v28, 0.0  ;;  %v1239_v12 = vmax.f32 %v846_v37, 0.0  ;;  %v849_v47 = vadd.f32 %v4574_v6, %v848_v41  ;;  %v3351_v48 = vpop.f32.mrb[75].mxu0 }
 0x16e   :  { %v1304_v40 = vmax.f32 %v1105_v58, 0.0  ;;  %3601 = vmatmul.mubr.bf16.gmra.mrb[180].mxu1 %v4802_v18  ;;  %v1240_v29 = vmax.f32 %v849_v47, 0.0 }
 0x16f   :  { %3604 = vmatprep.mubr.msk.bf16.mxu1 %vm4153_vm1, %v4152_v0 }
 0x170   :  { %v4843_v32 = vpack.c.bf16 %v1304_v40, %v1303_v39  ;;  %v4846_v57 = vpack.c.bf16 %v1240_v29, %v1239_v12 }
 0x171   :  { %v1109_v30 = vpop.f32.mrb[76].mxu1  ;;  %v853_v60 = vpop.f32.mrb[76].mxu0 }
 0x172   :  { %v1110_v54 = vadd.f32 %v4574_v6, %v1109_v30  ;;  %v3482_v55 = vpop.f32.mrb[77].mxu1  ;;  %v854_v61 = vadd.f32 %v4574_v6, %v853_v60  ;;  %v3354_v63 = vpop.f32.mrb[77].mxu0 }
 0x173   :  { %v1112_v56 = vpop.f32.mrb[78].mxu1  ;;  %v856_v35 = vpop.f32.mrb[78].mxu0 }
 0x174   :  { %v1113_v18 = vadd.f32 %v4574_v6, %v1112_v56  ;;  %v3483_v31 = vpop.f32.mrb[79].mxu1  ;;  %v1305_v3 = vmax.f32 %v1110_v54, 0.0  ;;  %v1241_v51 = vmax.f32 %v854_v61, 0.0  ;;  %v857_v52 = vadd.f32 %v4574_v6, %v856_v35  ;;  %v3355_v11 = vpop.f32.mrb[79].mxu0 }
 0x176   :  { %v1306_v5 = vmax.f32 %v1113_v18, 0.0  ;;  %3605 = vmatmul.mubr.bf16.gmra.mrb[184].mxu1 %v4813_v43  ;;  %v1242_v15 = vmax.f32 %v857_v52, 0.0 }
 0x177   :  { %3608 = vmatprep.mubr.msk.bf16.mxu1 %vm4153_vm1, %v4152_v0 }
 0x178   :  { %v4854_v13 = vpack.c.bf16 %v1306_v5, %v1305_v3  ;;  %v4857_v19 = vpack.c.bf16 %v1242_v15, %v1241_v51 }
 0x179   :  { %v1117_v14 = vpop.f32.mrb[80].mxu1  ;;  %v861_v26 = vpop.f32.mrb[80].mxu0 }
 0x17a   :  { %v1118_v16 = vadd.f32 %v4574_v6, %v1117_v14  ;;  %v3486_v17 = vpop.f32.mrb[81].mxu1  ;;  %v862_v28 = vadd.f32 %v4574_v6, %v861_v26  ;;  %v3358_v10 = vpop.f32.mrb[81].mxu0 }
 0x17b   :  { %v1120_v53 = vpop.f32.mrb[82].mxu1  ;;  %v864_v34 = vpop.f32.mrb[82].mxu0 }
 0x17c   :  { %v1121_v43 = vadd.f32 %v4574_v6, %v1120_v53  ;;  %v3487_v24 = vpop.f32.mrb[83].mxu1  ;;  %v1307_v9 = vmax.f32 %v1118_v16, 0.0  ;;  %v1243_v8 = vmax.f32 %v862_v28, 0.0  ;;  %v865_v37 = vadd.f32 %v4574_v6, %v864_v34  ;;  %v3359_v38 = vpop.f32.mrb[83].mxu0 }
 0x17e   :  { %v1308_v58 = vmax.f32 %v1121_v43, 0.0  ;;  %3609 = vmatmul.mubr.bf16.gmra.mrb[188].mxu1 %v4824_v7  ;;  %v1244_v41 = vmax.f32 %v865_v37, 0.0 }
 0x17f   :  { %3612 = vmatprep.mubr.msk.bf16.mxu1 %vm4153_vm1, %v4152_v0 }
 0x180   :  { %v4865_v39 = vpack.c.bf16 %v1308_v58, %v1307_v9  ;;  %v4868_v30 = vpack.c.bf16 %v1244_v41, %v1243_v8 }
 0x181   :  { %v1125_v40 = vpop.f32.mrb[84].mxu1  ;;  %v869_v54 = vpop.f32.mrb[84].mxu0 }
 0x182   :  { %v1126_v12 = vadd.f32 %v4574_v6, %v1125_v40  ;;  %v3490_v47 = vpop.f32.mrb[85].mxu1  ;;  %v870_v55 = vadd.f32 %v4574_v6, %v869_v54  ;;  %v3362_v56 = vpop.f32.mrb[85].mxu0 }
 0x183   :  { %v1128_v48 = vpop.f32.mrb[86].mxu1  ;;  %v872_v60 = vpop.f32.mrb[86].mxu0 }
 0x184   :  { %v1129_v7 = vadd.f32 %v4574_v6, %v1128_v48  ;;  %v3491_v29 = vpop.f32.mrb[87].mxu1  ;;  %v1309_v18 = vmax.f32 %v1126_v12, 0.0  ;;  %v1245_v61 = vmax.f32 %v870_v55, 0.0  ;;  %v873_v63 = vadd.f32 %v4574_v6, %v872_v60  ;;  %v3363_v3 = vpop.f32.mrb[87].mxu0 }
 0x186   :  { %v1310_v31 = vmax.f32 %v1129_v7, 0.0  ;;  %3613 = vmatmul.mubr.bf16.gmra.mrb[192].mxu1 %v4835_v33  ;;  %v1246_v51 = vmax.f32 %v873_v63, 0.0 }
 0x187   :  { %3616 = vmatprep.mubr.msk.bf16.mxu1 %vm4153_vm1, %v4152_v0 }
 0x188   :  { %v4876_v5 = vpack.c.bf16 %v1310_v31, %v1309_v18  ;;  %v4879_v15 = vpack.c.bf16 %v1246_v51, %v1245_v61 }
 0x189   :  { %v1133_v35 = vpop.f32.mrb[88].mxu1  ;;  %v877_v17 = vpop.f32.mrb[88].mxu0 }
 0x18a   :  { %v1134_v52 = vadd.f32 %v4574_v6, %v1133_v35  ;;  %v3494_v11 = vpop.f32.mrb[89].mxu1  ;;  %v878_v53 = vadd.f32 %v4574_v6, %v877_v17  ;;  %v3366_v43 = vpop.f32.mrb[89].mxu0  ;;  %v4903_v35 = vld [vmem:[%s5984_s2] ss:$0 sm:$0xff] }
 0x18b   :  { %v1136_v14 = vpop.f32.mrb[90].mxu1  ;;  %v880_v28 = vpop.f32.mrb[90].mxu0 }
 0x18c   :  { %v1137_v33 = vadd.f32 %v4574_v6, %v1136_v14  ;;  %v3495_v16 = vpop.f32.mrb[91].mxu1  ;;  %v1311_v24 = vmax.f32 %v1134_v52, 0.0  ;;  %v1247_v10 = vmax.f32 %v878_v53, 0.0  ;;  %v881_v9 = vadd.f32 %v4574_v6, %v880_v28  ;;  %v3367_v58 = vpop.f32.mrb[91].mxu0 }
 0x18e   :  { %v1312_v26 = vmax.f32 %v1137_v33, 0.0  ;;  %3617 = vmatmul.mubr.bf16.gmra.mrb[196].mxu1 %v4846_v57  ;;  %v1248_v37 = vmax.f32 %v881_v9, 0.0 }
 0x18f   :  { %3620 = vmatprep.mubr.msk.bf16.mxu1 %vm4153_vm1, %v4152_v0 }
 0x190   :  { %v4887_v34 = vpack.c.bf16 %v1312_v26, %v1311_v24  ;;  %v4890_v12 = vpack.c.bf16 %v1248_v37, %v1247_v10 }
 0x191   :  { %v1141_v8 = vpop.f32.mrb[92].mxu1  ;;  %v885_v48 = vpop.f32.mrb[92].mxu0 }
 0x192   :  { %v1142_v38 = vadd.f32 %v4574_v6, %v1141_v8  ;;  %v3498_v40 = vpop.f32.mrb[93].mxu1  ;;  %v886_v7 = vadd.f32 %v4574_v6, %v885_v48  ;;  %v3370_v29 = vpop.f32.mrb[93].mxu0 }
 0x193   :  { %v1144_v41 = vpop.f32.mrb[94].mxu1  ;;  %v888_v56 = vpop.f32.mrb[94].mxu0 }
 0x194   :  { %v1145_v57 = vadd.f32 %v4574_v6, %v1144_v41  ;;  %v3499_v47 = vpop.f32.mrb[95].mxu1  ;;  %v1313_v54 = vmax.f32 %v1142_v38, 0.0  ;;  %v1249_v18 = vmax.f32 %v886_v7, 0.0  ;;  %v889_v31 = vadd.f32 %v4574_v6, %v888_v56  ;;  %v3371_v60 = vpop.f32.mrb[95].mxu0 }
 0x196   :  { %v1314_v55 = vmax.f32 %v1145_v57, 0.0  ;;  %3621 = vmatmul.mubr.bf16.gmra.mrb[200].mxu1 %v4857_v19  ;;  %v1250_v3 = vmax.f32 %v889_v31, 0.0 }
 0x197   :  { %3624 = vmatprep.mubr.msk.bf16.mxu1 %vm4153_vm1, %v4152_v0 }
 0x198   :  { %v4898_v61 = vpack.c.bf16 %v1314_v55, %v1313_v54  ;;  %v4906_v11 = vpack.c.bf16 %v1250_v3, %v1249_v18 }
 0x199   :  { %v1149_v63 = vpop.f32.mrb[96].mxu1  ;;  %v893_v6 = vpop.f32.mrb[96].mxu0 }
 0x19a   :  { %v1150_v51 = vadd.f32 %v4903_v35, %v1149_v63  ;;  %v3502_v19 = vpop.f32.mrb[97].mxu1  ;;  %v894_v16 = vadd.f32 %v4903_v35, %v893_v6  ;;  %v3374_v17 = vpop.f32.mrb[97].mxu0 }
 0x19b   :  { %v1152_v52 = vpop.f32.mrb[98].mxu1  ;;  %v896_v24 = vpop.f32.mrb[98].mxu0 }
 0x19c   :  { %v1153_v14 = vadd.f32 %v4903_v35, %v1152_v52  ;;  %v3503_v33 = vpop.f32.mrb[99].mxu1  ;;  %v1315_v53 = vmax.f32 %v1150_v51, 0.0  ;;  %v1251_v26 = vmax.f32 %v894_v16, 0.0  ;;  %v897_v28 = vadd.f32 %v4903_v35, %v896_v24  ;;  %v3375_v10 = vpop.f32.mrb[99].mxu0 }
 0x19e   :  { %v1316_v43 = vmax.f32 %v1153_v14, 0.0  ;;  %3625 = vmatmul.mubr.bf16.gmra.mrb[204].mxu1 %v4868_v30  ;;  %v1252_v8 = vmax.f32 %v897_v28, 0.0 }
 0x19f   :  { %3628 = vmatprep.mubr.msk.bf16.mxu1 %vm4153_vm1, %v4152_v0 }
 0x1a0   :  { %v4914_v9 = vpack.c.bf16 %v1316_v43, %v1315_v53  ;;  %v4917_v41 = vpack.c.bf16 %v1252_v8, %v1251_v26 }
 0x1a1   :  { %v1157_v58 = vpop.f32.mrb[100].mxu1  ;;  %v901_v47 = vpop.f32.mrb[100].mxu0 }
 0x1a2   :  { %v1158_v37 = vadd.f32 %v4903_v35, %v1157_v58  ;;  %v3506_v38 = vpop.f32.mrb[101].mxu1  ;;  %v902_v48 = vadd.f32 %v4903_v35, %v901_v47  ;;  %v3378_v7 = vpop.f32.mrb[101].mxu0 }
 0x1a3   :  { %v1160_v40 = vpop.f32.mrb[102].mxu1  ;;  %v904_v55 = vpop.f32.mrb[102].mxu0 }
 0x1a4   :  { %v1161_v30 = vadd.f32 %v4903_v35, %v1160_v40  ;;  %v3507_v57 = vpop.f32.mrb[103].mxu1  ;;  %v1317_v29 = vmax.f32 %v1158_v37, 0.0  ;;  %v1253_v56 = vmax.f32 %v902_v48, 0.0  ;;  %v905_v18 = vadd.f32 %v4903_v35, %v904_v55  ;;  %v3379_v31 = vpop.f32.mrb[103].mxu0 }
 0x1a6   :  { %v1318_v54 = vmax.f32 %v1161_v30, 0.0  ;;  %3629 = vmatmul.mubr.bf16.gmra.mrb[208].mxu1 %v4879_v15  ;;  %v1254_v3 = vmax.f32 %v905_v18, 0.0 }
 0x1a7   :  { %3632 = vmatprep.mubr.msk.bf16.mxu1 %vm4153_vm1, %v4152_v0 }
 0x1a8   :  { %v4925_v60 = vpack.c.bf16 %v1318_v54, %v1317_v29  ;;  %v4928_v14 = vpack.c.bf16 %v1254_v3, %v1253_v56 }
 0x1a9   :  { %v1165_v63 = vpop.f32.mrb[104].mxu1  ;;  %v909_v6 = vpop.f32.mrb[104].mxu0 }
 0x1aa   :  { %v1166_v51 = vadd.f32 %v4903_v35, %v1165_v63  ;;  %v3510_v19 = vpop.f32.mrb[105].mxu1  ;;  %v910_v16 = vadd.f32 %v4903_v35, %v909_v6  ;;  %v3382_v17 = vpop.f32.mrb[105].mxu0 }
 0x1ab   :  { %v1168_v52 = vpop.f32.mrb[106].mxu1  ;;  %v912_v24 = vpop.f32.mrb[106].mxu0 }
 0x1ac   :  { %v1169_v15 = vadd.f32 %v4903_v35, %v1168_v52  ;;  %v3511_v33 = vpop.f32.mrb[107].mxu1  ;;  %v1319_v53 = vmax.f32 %v1166_v51, 0.0  ;;  %v1255_v26 = vmax.f32 %v910_v16, 0.0  ;;  %v913_v28 = vadd.f32 %v4903_v35, %v912_v24  ;;  %v3383_v10 = vpop.f32.mrb[107].mxu0 }
 0x1ae   :  { %v1320_v43 = vmax.f32 %v1169_v15, 0.0  ;;  %3633 = vmatmul.mubr.bf16.gmra.mrb[212].mxu1 %v4890_v12  ;;  %v1256_v37 = vmax.f32 %v913_v28, 0.0 }
 0x1af   :  { %3636 = vmatprep.mubr.msk.bf16.mxu1 %vm4153_vm1, %v4152_v0 }
 0x1b0   :  { %v4936_v58 = vpack.c.bf16 %v1320_v43, %v1319_v53  ;;  %v4939_v57 = vpack.c.bf16 %v1256_v37, %v1255_v26 }
 0x1b1   :  { %v1173_v8 = vpop.f32.mrb[108].mxu1  ;;  %v917_v48 = vpop.f32.mrb[108].mxu0 }
 0x1b2   :  { %v1174_v38 = vadd.f32 %v4903_v35, %v1173_v8  ;;  %v3514_v40 = vpop.f32.mrb[109].mxu1  ;;  %v918_v7 = vadd.f32 %v4903_v35, %v917_v48  ;;  %v3386_v29 = vpop.f32.mrb[109].mxu0 }
 0x1b3   :  { %v1176_v30 = vpop.f32.mrb[110].mxu1  ;;  %v920_v56 = vpop.f32.mrb[110].mxu0 }
 0x1b4   :  { %v1177_v12 = vadd.f32 %v4903_v35, %v1176_v30  ;;  %v3515_v47 = vpop.f32.mrb[111].mxu1  ;;  %v1321_v54 = vmax.f32 %v1174_v38, 0.0  ;;  %v1257_v18 = vmax.f32 %v918_v7, 0.0  ;;  %v921_v31 = vadd.f32 %v4903_v35, %v920_v56  ;;  %v3387_v63 = vpop.f32.mrb[111].mxu0 }
 0x1b6   :  { %v1322_v55 = vmax.f32 %v1177_v12, 0.0  ;;  %3637 = vmatmul.mubr.bf16.gmra.mrb[216].mxu1 %v4906_v11  ;;  %v1258_v19 = vmax.f32 %v921_v31, 0.0 }
 0x1b7   :  { %3640 = vmatprep.mubr.msk.bf16.mxu1 %vm4153_vm1, %v4152_v0 }
 0x1b8   :  { %v4947_v3 = vpack.c.bf16 %v1322_v55, %v1321_v54  ;;  %v4950_v6 = vpack.c.bf16 %v1258_v19, %v1257_v18 }
 0x1b9   :  { %v1181_v51 = vpop.f32.mrb[112].mxu1  ;;  %v925_v17 = vpop.f32.mrb[112].mxu0 }
 0x1ba   :  { %v1182_v52 = vadd.f32 %v4903_v35, %v1181_v51  ;;  %v3518_v15 = vpop.f32.mrb[113].mxu1  ;;  %v926_v53 = vadd.f32 %v4903_v35, %v925_v17  ;;  %v3390_v43 = vpop.f32.mrb[113].mxu0 }
 0x1bb   :  { %v1184_v33 = vpop.f32.mrb[114].mxu1  ;;  %v928_v28 = vpop.f32.mrb[114].mxu0 }
 0x1bc   :  { %v1185_v11 = vadd.f32 %v4903_v35, %v1184_v33  ;;  %v3519_v16 = vpop.f32.mrb[115].mxu1  ;;  %v1323_v24 = vmax.f32 %v1182_v52, 0.0  ;;  %v1259_v10 = vmax.f32 %v926_v53, 0.0  ;;  %v929_v8 = vadd.f32 %v4903_v35, %v928_v28  ;;  %v3391_v37 = vpop.f32.mrb[115].mxu0 }
 0x1be   :  { %v1324_v26 = vmax.f32 %v1185_v11, 0.0  ;;  %3641 = vmatmul.mubr.bf16.gmra.mrb[220].mxu1 %v4917_v41  ;;  %v1260_v30 = vmax.f32 %v929_v8, 0.0 }
 0x1bf   :  { %3644 = vmatprep.mubr.msk.bf16.mxu1 %vm4153_vm1, %v4152_v0 }
 0x1c0   :  { %v4958_v38 = vpack.c.bf16 %v1324_v26, %v1323_v24  ;;  %v4961_v7 = vpack.c.bf16 %v1260_v30, %v1259_v10  ;;  %v4978_v10 = vld [vmem:[%s5985_s4] ss:$0 sm:$0xff] }
 0x1c1   :  { %v1189_v40 = vpop.f32.mrb[116].mxu1  ;;  %v933_v54 = vpop.f32.mrb[116].mxu0 }
 0x1c2   :  { %v1190_v12 = vadd.f32 %v4903_v35, %v1189_v40  ;;  %v3522_v47 = vpop.f32.mrb[117].mxu1  ;;  %v934_v55 = vadd.f32 %v4903_v35, %v933_v54  ;;  %v3394_v56 = vpop.f32.mrb[117].mxu0 }
 0x1c3   :  { %v1192_v48 = vpop.f32.mrb[118].mxu1  ;;  %v936_v63 = vpop.f32.mrb[118].mxu0 }
 0x1c4   :  { %v1193_v41 = vadd.f32 %v4903_v35, %v1192_v48  ;;  %v3523_v29 = vpop.f32.mrb[119].mxu1  ;;  %v1325_v18 = vmax.f32 %v1190_v12, 0.0  ;;  %v1261_v51 = vmax.f32 %v934_v55, 0.0  ;;  %v937_v19 = vadd.f32 %v4903_v35, %v936_v63  ;;  %v3395_v52 = vpop.f32.mrb[119].mxu0 }
 0x1c6   :  { %v1326_v31 = vmax.f32 %v1193_v41, 0.0  ;;  %3645 = vmatmul.mubr.bf16.gmra.mrb[224].mxu1 %v4928_v14  ;;  %v1262_v11 = vmax.f32 %v937_v19, 0.0 }
 0x1c7   :  { %3648 = vmatprep.mubr.msk.bf16.mxu1 %vm4153_vm1, %v4152_v0 }
 0x1c8   :  { %v4969_v15 = vpack.c.bf16 %v1326_v31, %v1325_v18  ;;  %v1374_v53 = vpack.c.bf16 %v1262_v11, %v1261_v51 }
 0x1c9   :  { %v4971_v33 = vpop.f32.mrb[120].mxu1  ;;  %v941_v24 = vpop.f32.mrb[120].mxu0 }
 0x1ca   :  { %v3526_v16 = vpop.f32.mrb[121].mxu1  ;;  %v942_v14 = vadd.f32 %v4903_v35, %v941_v24  ;;  %v3398_v26 = vpop.f32.mrb[121].mxu0 }
 0x1cb   :  { %v1200_v17 = vpop.f32.mrb[122].mxu1  ;;  %v944_v28 = vpop.f32.mrb[122].mxu0 }
 0x1cc   :  { %v3527_v43 = vpop.f32.mrb[123].mxu1  ;;  %v1263_v8 = vmax.f32 %v942_v14, 0.0  ;;  %v945_v37 = vadd.f32 %v4903_v35, %v944_v28  ;;  %v3399_v40 = vpop.f32.mrb[123].mxu0 }
 0x1ce   :  { %3649 = vmatmul.mubr.bf16.gmra.mrb[228].mxu1 %v4939_v57  ;;  %v1264_v12 = vmax.f32 %v945_v37, 0.0 }
 0x1cf   :  { %3652 = vmatprep.mubr.msk.bf16.mxu1 %vm4153_vm1, %v4152_v0 }
 0x1d0   :  { %v1375_v57 = vpack.c.bf16 %v1264_v12, %v1263_v8 }
 0x1d1   :  { %v1496_v30 = vpop.f32.mrb[124].mxu1  ;;  %v949_v55 = vpop.f32.mrb[124].mxu0 }
 0x1d2   :  { %v1497_v47 = vadd.f32 %v4978_v10, %v1496_v30  ;;  %v3546_v48 = vpop.f32.mrb[125].mxu1  ;;  %v950_v56 = vadd.f32 %v4903_v35, %v949_v55  ;;  %v3402_v18 = vpop.f32.mrb[125].mxu0 }
 0x1d3   :  { %v1499_v41 = vpop.f32.mrb[126].mxu1  ;;  %v952_v51 = vpop.f32.mrb[126].mxu0 }
 0x1d4   :  { %v1500_v29 = vadd.f32 %v4978_v10, %v1499_v41  ;;  %v3547_v54 = vpop.f32.mrb[127].mxu1  ;;  %v1998_v31 = vmax.f32 %v1497_v47, 0.0  ;;  %v1265_v19 = vmax.f32 %v950_v56, 0.0  ;;  %v953_v52 = vadd.f32 %v4903_v35, %v952_v51  ;;  %v3403_v11 = vpop.f32.mrb[127].mxu0 }
 0x1d6   :  { %v1999_v63 = vmax.f32 %v1500_v29, 0.0  ;;  %3653 = vmatmul.mubr.bf16.gmra.mrb[232].mxu1 %v4950_v6  ;;  %v1266_v43 = vmax.f32 %v953_v52, 0.0 }
 0x1d7   :  { %3656 = vmatprep.mubr.msk.bf16.mxu1 %vm4153_vm1, %v4152_v0 }
 0x1d8   :  { %v2140_v16 = vpack.c.bf16 %v1999_v63, %v1998_v31  ;;  %v1376_v6 = vpack.c.bf16 %v1266_v43, %v1265_v19 }
 0x1d9   :  { %v1504_v17 = vpop.f32.mrb[128].mxu1 }
 0x1da   :  { %v1505_v24 = vadd.f32 %v4978_v10, %v1504_v17  ;;  %v3550_v14 = vpop.f32.mrb[129].mxu1  ;;  %3813 = vmatmul.mubr.bf16.vlgmr.msra.gmra.mrb[128].mxu0 %v2140_v16 }
 0x1db   :  { %v1507_v26 = vpop.f32.mrb[130].mxu1  ;;  %3816 = vmatprep.mubr.msk.bf16.mxu0 %vm4153_vm1, %v4152_v0 }
 0x1dc   :  { %v1508_v28 = vadd.f32 %v4978_v10, %v1507_v26  ;;  %v3551_v8 = vpop.f32.mrb[131].mxu1  ;;  %v2000_v37 = vmax.f32 %v1505_v24, 0.0 }
 0x1de   :  { %v2001_v40 = vmax.f32 %v1508_v28, 0.0  ;;  %3657 = vmatmul.mubr.bf16.gmra.mrb[236].mxu1 %v4961_v7 }
 0x1df   :  { %3660 = vmatprep.mubr.msk.bf16.mxu1 %vm4153_vm1, %v4152_v0 }
 0x1e0   :  { %v2141_v35 = vpack.c.bf16 %v2001_v40, %v2000_v37 }
 0x1e1   :  { %v1512_v30 = vpop.f32.mrb[132].mxu1 }
 0x1e2   :  { %v1513_v12 = vadd.f32 %v4978_v10, %v1512_v30  ;;  %v3554_v47 = vpop.f32.mrb[133].mxu1  ;;  %3817 = vmatmul.mubr.bf16.gmra.mrb[132].mxu0 %v2141_v35 }
 0x1e3   :  { %v1515_v48 = vpop.f32.mrb[134].mxu1  ;;  %3820 = vmatprep.mubr.msk.bf16.mxu0 %vm4153_vm1, %v4152_v0 }
 0x1e4   :  { %v1516_v41 = vadd.f32 %v4978_v10, %v1515_v48  ;;  %v3555_v29 = vpop.f32.mrb[135].mxu1  ;;  %v2002_v54 = vmax.f32 %v1513_v12, 0.0 }
 0x1e6   :  { %v2003_v55 = vmax.f32 %v1516_v41, 0.0  ;;  %3661 = vmatmul.mubr.bf16.gmra.mrb[240].mxu1 %v1374_v53 }
 0x1e7   :  { %3664 = vmatprep.mubr.msk.bf16.mxu1 %vm4153_vm1, %v4152_v0 }
 0x1e8   :  { %v2142_v7 = vpack.c.bf16 %v2003_v55, %v2002_v54 }
 0x1e9   :  { %v1520_v56 = vpop.f32.mrb[136].mxu1 }
 0x1ea   :  { %v1521_v18 = vadd.f32 %v4978_v10, %v1520_v56  ;;  %v3558_v31 = vpop.f32.mrb[137].mxu1  ;;  %3821 = vmatmul.mubr.bf16.gmra.mrb[136].mxu0 %v2142_v7 }
 0x1eb   :  { %v1523_v63 = vpop.f32.mrb[138].mxu1  ;;  %3824 = vmatprep.mubr.msk.bf16.mxu0 %vm4153_vm1, %v4152_v0 }
 0x1ec   :  { %v1524_v51 = vadd.f32 %v4978_v10, %v1523_v63  ;;  %v3559_v19 = vpop.f32.mrb[139].mxu1  ;;  %v2004_v52 = vmax.f32 %v1521_v18, 0.0 }
 0x1ee   :  { %v2005_v11 = vmax.f32 %v1524_v51, 0.0  ;;  %3665 = vmatmul.mubr.bf16.gmra.mrb[244].mxu1 %v1375_v57 }
 0x1ef   :  { %3668 = vmatprep.mubr.msk.bf16.mxu1 %vm4153_vm1, %v4152_v0 }
 0x1f0   :  { %v2143_v53 = vpack.c.bf16 %v2005_v11, %v2004_v52 }
 0x1f1   :  { %v1528_v16 = vpop.f32.mrb[140].mxu1 }
 0x1f2   :  { %v1529_v17 = vadd.f32 %v4978_v10, %v1528_v16  ;;  %v3562_v43 = vpop.f32.mrb[141].mxu1  ;;  %3825 = vmatmul.mubr.bf16.gmra.mrb[140].mxu0 %v2143_v53 }
 0x1f3   :  { %v1531_v24 = vpop.f32.mrb[142].mxu1  ;;  %3828 = vmatprep.mubr.msk.bf16.mxu0 %vm4153_vm1, %v4152_v0 }
 0x1f4   :  { %v1532_v14 = vadd.f32 %v4978_v10, %v1531_v24  ;;  %v3563_v26 = vpop.f32.mrb[143].mxu1  ;;  %v2006_v28 = vmax.f32 %v1529_v17, 0.0 }
 0x1f6   :  { %v2007_v8 = vmax.f32 %v1532_v14, 0.0  ;;  %3669 = vmatmul.mubr.bf16.gmra.mrb[248].mxu1 %v1376_v6 }
 0x1f7   :  { %3672 = vmatprep.mubr.msk.bf16.mxu1 %vm4153_vm1, %v4152_v0 }
 0x1f8   :  { %v2144_v57 = vpack.c.bf16 %v2007_v8, %v2006_v28 }
 0x1f9   :  { %v1536_v37 = vpop.f32.mrb[144].mxu1 }
 0x1fa   :  { %v1537_v40 = vadd.f32 %v4978_v10, %v1536_v37  ;;  %v3566_v35 = vpop.f32.mrb[145].mxu1  ;;  %3829 = vmatmul.mubr.bf16.gmra.mrb[144].mxu0 %v2144_v57 }
 0x1fb   :  { %v1539_v30 = vpop.f32.mrb[146].mxu1  ;;  %3832 = vmatprep.mubr.msk.bf16.mxu0 %vm4153_vm1, %v4152_v0 }
 0x1fc   :  { %v1540_v12 = vadd.f32 %v4978_v10, %v1539_v30  ;;  %v3567_v47 = vpop.f32.mrb[147].mxu1  ;;  %v2008_v48 = vmax.f32 %v1537_v40, 0.0 }
 0x1fe   :  { %v2009_v41 = vmax.f32 %v1540_v12, 0.0  ;;  %3673 = vmatmul.mubr.bf16.gmra.mrb[252].mxu1 %v4597_v25 }
 0x1ff   :  { %3676 = vmatprep.mubr.msk.bf16.mxu1 %vm4153_vm1, %v4152_v0 }
 0x200   :  { %v2145_v6 = vpack.c.bf16 %v2009_v41, %v2008_v48 }
 0x201   :  { %v1544_v29 = vpop.f32.mrb[148].mxu1 }
 0x202   :  { %v1545_v54 = vadd.f32 %v4978_v10, %v1544_v29  ;;  %v3570_v55 = vpop.f32.mrb[149].mxu1  ;;  %3833 = vmatmul.mubr.bf16.gmra.mrb[148].mxu0 %v2145_v6 }
 0x203   :  { %v1547_v7 = vpop.f32.mrb[150].mxu1  ;;  %3836 = vmatprep.mubr.msk.bf16.mxu0 %vm4153_vm1, %v4152_v0 }
 0x204   :  { %v1548_v56 = vadd.f32 %v4978_v10, %v1547_v7  ;;  %v3571_v18 = vpop.f32.mrb[151].mxu1  ;;  %v2010_v31 = vmax.f32 %v1545_v54, 0.0 }
 0x206   :  { %v2011_v63 = vmax.f32 %v1548_v56, 0.0  ;;  %3677 = vmatmul.mubr.bf16.gmra.mrb[0].mxu1 %v4618_v45 }
 0x207   :  { %3680 = vmatprep.mubr.msk.bf16.mxu1 %vm4153_vm1, %v4152_v0 }
 0x208   :  { %v2146_v25 = vpack.c.bf16 %v2011_v63, %v2010_v31 }
 0x209   :  { %v1552_v51 = vpop.f32.mrb[152].mxu1 }
 0x20a   :  { %v1553_v19 = vadd.f32 %v4978_v10, %v1552_v51  ;;  %v3574_v52 = vpop.f32.mrb[153].mxu1  ;;  %3837 = vmatmul.mubr.bf16.gmra.mrb[152].mxu0 %v2146_v25 }
 0x20b   :  { %v1555_v11 = vpop.f32.mrb[154].mxu1  ;;  %3840 = vmatprep.mubr.msk.bf16.mxu0 %vm4153_vm1, %v4152_v0 }
 0x20c   :  { %v1556_v53 = vadd.f32 %v4978_v10, %v1555_v11  ;;  %v3575_v16 = vpop.f32.mrb[155].mxu1  ;;  %v2012_v17 = vmax.f32 %v1553_v19, 0.0 }
 0x20e   :  { %v2013_v43 = vmax.f32 %v1556_v53, 0.0  ;;  %3681 = vmatmul.mubr.bf16.gmra.mrb[4].mxu1 %v4638_v2 }
 0x20f   :  { %3684 = vmatprep.mubr.msk.bf16.mxu1 %vm4153_vm1, %v4152_v0 }
 0x210   :  { %v2147_v45 = vpack.c.bf16 %v2013_v43, %v2012_v17 }
 0x211   :  { %v1560_v24 = vpop.f32.mrb[156].mxu1 }
 0x212   :  { %v1561_v14 = vadd.f32 %v4978_v10, %v1560_v24  ;;  %v3578_v26 = vpop.f32.mrb[157].mxu1  ;;  %3841 = vmatmul.mubr.bf16.gmra.mrb[156].mxu0 %v2147_v45 }
 0x213   :  { %v1563_v28 = vpop.f32.mrb[158].mxu1  ;;  %3844 = vmatprep.mubr.msk.bf16.mxu0 %vm4153_vm1, %v4152_v0 }
 0x214   :  { %v1564_v8 = vadd.f32 %v4978_v10, %v1563_v28  ;;  %v3579_v57 = vpop.f32.mrb[159].mxu1  ;;  %v2014_v37 = vmax.f32 %v1561_v14, 0.0 }
 0x216   :  { %v2015_v40 = vmax.f32 %v1564_v8, 0.0  ;;  %3685 = vmatmul.mubr.bf16.gmra.mrb[8].mxu1 %v4658_v23 }
 0x217   :  { %3688 = vmatprep.mubr.msk.bf16.mxu1 %vm4153_vm1, %v4152_v0 }
 0x218   :  { %v2148_v2 = vpack.c.bf16 %v2015_v40, %v2014_v37 }
 0x219   :  { %v1568_v35 = vpop.f32.mrb[160].mxu1 }
 0x21a   :  { %v1569_v30 = vadd.f32 %v4978_v10, %v1568_v35  ;;  %v3582_v12 = vpop.f32.mrb[161].mxu1  ;;  %3845 = vmatmul.mubr.bf16.gmra.mrb[160].mxu0 %v2148_v2 }
 0x21b   :  { %v1571_v47 = vpop.f32.mrb[162].mxu1  ;;  %3848 = vmatprep.mubr.msk.bf16.mxu0 %vm4153_vm1, %v4152_v0 }
 0x21c   :  { %v1572_v48 = vadd.f32 %v4978_v10, %v1571_v47  ;;  %v3583_v41 = vpop.f32.mrb[163].mxu1  ;;  %v2016_v6 = vmax.f32 %v1569_v30, 0.0 }
 0x21e   :  { %v2017_v29 = vmax.f32 %v1572_v48, 0.0  ;;  %3689 = vmatmul.mubr.bf16.gmra.mrb[12].mxu1 %v4675_v44 }
 0x21f   :  { %3692 = vmatprep.mubr.msk.bf16.mxu1 %vm4153_vm1, %v4152_v0 }
 0x220   :  { %v2149_v23 = vpack.c.bf16 %v2017_v29, %v2016_v6 }
 0x221   :  { %v1576_v54 = vpop.f32.mrb[164].mxu1 }
 0x222   :  { %v1577_v55 = vadd.f32 %v4978_v10, %v1576_v54  ;;  %v3586_v7 = vpop.f32.mrb[165].mxu1  ;;  %3849 = vmatmul.mubr.bf16.gmra.mrb[164].mxu0 %v2149_v23 }
 0x223   :  { %v1579_v56 = vpop.f32.mrb[166].mxu1  ;;  %3852 = vmatprep.mubr.msk.bf16.mxu0 %vm4153_vm1, %v4152_v0 }
 0x224   :  { %v1580_v18 = vadd.f32 %v4978_v10, %v1579_v56  ;;  %v3587_v31 = vpop.f32.mrb[167].mxu1  ;;  %v2018_v63 = vmax.f32 %v1577_v55, 0.0 }
 0x226   :  { %v2019_v25 = vmax.f32 %v1580_v18, 0.0  ;;  %3693 = vmatmul.mubr.bf16.gmra.mrb[16].mxu1 %v4693_v1 }
 0x227   :  { %3696 = vmatprep.mubr.msk.bf16.mxu1 %vm4153_vm1, %v4152_v0 }
 0x228   :  { %v2150_v44 = vpack.c.bf16 %v2019_v25, %v2018_v63 }
 0x229   :  { %v1584_v51 = vpop.f32.mrb[168].mxu1 }
 0x22a   :  { %v1585_v19 = vadd.f32 %v4978_v10, %v1584_v51  ;;  %v3590_v52 = vpop.f32.mrb[169].mxu1  ;;  %3853 = vmatmul.mubr.bf16.gmra.mrb[168].mxu0 %v2150_v44 }
 0x22b   :  { %v1587_v11 = vpop.f32.mrb[170].mxu1  ;;  %3856 = vmatprep.mubr.msk.bf16.mxu0 %vm4153_vm1, %v4152_v0 }
 0x22c   :  { %v1588_v53 = vadd.f32 %v4978_v10, %v1587_v11  ;;  %v3591_v16 = vpop.f32.mrb[171].mxu1  ;;  %v2020_v17 = vmax.f32 %v1585_v19, 0.0 }
 0x22e   :  { %v2021_v43 = vmax.f32 %v1588_v53, 0.0  ;;  %3697 = vmatmul.mubr.bf16.gmra.mrb[20].mxu1 %v4704_v21 }
 0x22f   :  { %3700 = vmatprep.mubr.msk.bf16.mxu1 %vm4153_vm1, %v4152_v0 }
 0x230   :  { %v2151_v1 = vpack.c.bf16 %v2021_v43, %v2020_v17 }
 0x231   :  { %v1592_v45 = vpop.f32.mrb[172].mxu1 }
 0x232   :  { %v1593_v24 = vadd.f32 %v4978_v10, %v1592_v45  ;;  %v3594_v14 = vpop.f32.mrb[173].mxu1  ;;  %3857 = vmatmul.mubr.bf16.gmra.mrb[172].mxu0 %v2151_v1 }
 0x233   :  { %v1595_v26 = vpop.f32.mrb[174].mxu1  ;;  %3860 = vmatprep.mubr.msk.bf16.mxu0 %vm4153_vm1, %v4152_v0 }
 0x234   :  { %v1596_v28 = vadd.f32 %v4978_v10, %v1595_v26  ;;  %v3595_v8 = vpop.f32.mrb[175].mxu1  ;;  %v2022_v57 = vmax.f32 %v1593_v24, 0.0 }
 0x236   :  { %v2023_v37 = vmax.f32 %v1596_v28, 0.0  ;;  %3701 = vmatmul.mubr.bf16.gmra.mrb[24].mxu1 %v4715_v42 }
 0x237   :  { %3704 = vmatprep.mubr.msk.bf16.mxu1 %vm4153_vm1, %v4152_v0 }
 0x238   :  { %v2152_v21 = vpack.c.bf16 %v2023_v37, %v2022_v57 }
 0x239   :  { %v1600_v40 = vpop.f32.mrb[176].mxu1 }
 0x23a   :  { %v1601_v2 = vadd.f32 %v4978_v10, %v1600_v40  ;;  %v3598_v35 = vpop.f32.mrb[177].mxu1  ;;  %3861 = vmatmul.mubr.bf16.gmra.mrb[176].mxu0 %v2152_v21 }
 0x23b   :  { %v1603_v30 = vpop.f32.mrb[178].mxu1  ;;  %3864 = vmatprep.mubr.msk.bf16.mxu0 %vm4153_vm1, %v4152_v0 }
 0x23c   :  { %v1604_v12 = vadd.f32 %v4978_v10, %v1603_v30  ;;  %v3599_v47 = vpop.f32.mrb[179].mxu1  ;;  %v2024_v48 = vmax.f32 %v1601_v2, 0.0 }
 0x23e   :  { %v2025_v41 = vmax.f32 %v1604_v12, 0.0  ;;  %3705 = vmatmul.mubr.bf16.gmra.mrb[28].mxu1 %v4726_v62 }
 0x23f   :  { %3708 = vmatprep.mubr.msk.bf16.mxu1 %vm4153_vm1, %v4152_v0 }
 0x240   :  { %v2153_v42 = vpack.c.bf16 %v2025_v41, %v2024_v48 }
 0x241   :  { %v1608_v6 = vpop.f32.mrb[180].mxu1 }
 0x242   :  { %v1609_v29 = vadd.f32 %v4978_v10, %v1608_v6  ;;  %v3602_v23 = vpop.f32.mrb[181].mxu1  ;;  %3865 = vmatmul.mubr.bf16.gmra.mrb[180].mxu0 %v2153_v42 }
 0x243   :  { %v1611_v54 = vpop.f32.mrb[182].mxu1  ;;  %3868 = vmatprep.mubr.msk.bf16.mxu0 %vm4153_vm1, %v4152_v0 }
 0x244   :  { %v1612_v55 = vadd.f32 %v4978_v10, %v1611_v54  ;;  %v3603_v7 = vpop.f32.mrb[183].mxu1  ;;  %v2026_v56 = vmax.f32 %v1609_v29, 0.0 }
 0x246   :  { %v2027_v18 = vmax.f32 %v1612_v55, 0.0  ;;  %3709 = vmatmul.mubr.bf16.gmra.mrb[32].mxu1 %v4741_v22 }
 0x247   :  { %3712 = vmatprep.mubr.msk.bf16.mxu1 %vm4153_vm1, %v4152_v0 }
 0x248   :  { %v2154_v62 = vpack.c.bf16 %v2027_v18, %v2026_v56 }
 0x249   :  { %v1616_v31 = vpop.f32.mrb[184].mxu1 }
 0x24a   :  { %v1617_v63 = vadd.f32 %v4978_v10, %v1616_v31  ;;  %v3606_v25 = vpop.f32.mrb[185].mxu1  ;;  %3869 = vmatmul.mubr.bf16.gmra.mrb[184].mxu0 %v2154_v62 }
 0x24b   :  { %v1619_v44 = vpop.f32.mrb[186].mxu1  ;;  %3872 = vmatprep.mubr.msk.bf16.mxu0 %vm4153_vm1, %v4152_v0 }
 0x24c   :  { %v1620_v51 = vadd.f32 %v4978_v10, %v1619_v44  ;;  %v3607_v19 = vpop.f32.mrb[187].mxu1  ;;  %v2028_v52 = vmax.f32 %v1617_v63, 0.0 }
 0x24e   :  { %v2029_v11 = vmax.f32 %v1620_v51, 0.0  ;;  %3713 = vmatmul.mubr.bf16.gmra.mrb[36].mxu1 %v4752_v46 }
 0x24f   :  { %3716 = vmatprep.mubr.msk.bf16.mxu1 %vm4153_vm1, %v4152_v0 }
 0x250   :  { %v2155_v22 = vpack.c.bf16 %v2029_v11, %v2028_v52 }
 0x251   :  { %v1624_v53 = vpop.f32.mrb[188].mxu1 }
 0x252   :  { %v1625_v16 = vadd.f32 %v4978_v10, %v1624_v53  ;;  %v3610_v17 = vpop.f32.mrb[189].mxu1  ;;  %3873 = vmatmul.mubr.bf16.gmra.mrb[188].mxu0 %v2155_v22 }
 0x253   :  { %v1627_v43 = vpop.f32.mrb[190].mxu1  ;;  %3876 = vmatprep.mubr.msk.bf16.mxu0 %vm4153_vm1, %v4152_v0 }
 0x254   :  { %v1628_v1 = vadd.f32 %v4978_v10, %v1627_v43  ;;  %v3611_v45 = vpop.f32.mrb[191].mxu1  ;;  %v2030_v24 = vmax.f32 %v1625_v16, 0.0 }
 0x256   :  { %v2031_v14 = vmax.f32 %v1628_v1, 0.0  ;;  %3717 = vmatmul.mubr.bf16.gmra.mrb[40].mxu1 %v4763_v4 }
 0x257   :  { %3720 = vmatprep.mubr.msk.bf16.mxu1 %vm4153_vm1, %v4152_v0 }
 0x258   :  { %v2156_v46 = vpack.c.bf16 %v2031_v14, %v2030_v24 }
 0x259   :  { %v1632_v26 = vpop.f32.mrb[192].mxu1 }
 0x25a   :  { %v1633_v28 = vadd.f32 %v4978_v10, %v1632_v26  ;;  %v3614_v8 = vpop.f32.mrb[193].mxu1  ;;  %3877 = vmatmul.mubr.bf16.gmra.mrb[192].mxu0 %v2156_v46 }
 0x25b   :  { %v1635_v57 = vpop.f32.mrb[194].mxu1  ;;  %3880 = vmatprep.mubr.msk.bf16.mxu0 %vm4153_vm1, %v4152_v0 }
 0x25c   :  { %v1636_v37 = vadd.f32 %v4978_v10, %v1635_v57  ;;  %v3615_v21 = vpop.f32.mrb[195].mxu1  ;;  %v2032_v40 = vmax.f32 %v1633_v28, 0.0 }
 0x25e   :  { %v2033_v2 = vmax.f32 %v1636_v37, 0.0  ;;  %3721 = vmatmul.mubr.bf16.gmra.mrb[44].mxu1 %v4774_v27 }
 0x25f   :  { %3724 = vmatprep.mubr.msk.bf16.mxu1 %vm4153_vm1, %v4152_v0 }
 0x260   :  { %v2157_v4 = vpack.c.bf16 %v2033_v2, %v2032_v40 }
 0x261   :  { %v1640_v35 = vpop.f32.mrb[196].mxu1 }
 0x262   :  { %v1641_v30 = vadd.f32 %v4978_v10, %v1640_v35  ;;  %v3618_v12 = vpop.f32.mrb[197].mxu1  ;;  %3881 = vmatmul.mubr.bf16.gmra.mrb[196].mxu0 %v2157_v4 }
 0x263   :  { %v1643_v47 = vpop.f32.mrb[198].mxu1  ;;  %3884 = vmatprep.mubr.msk.bf16.mxu0 %vm4153_vm1, %v4152_v0 }
 0x264   :  { %v1644_v48 = vadd.f32 %v4978_v10, %v1643_v47  ;;  %v3619_v41 = vpop.f32.mrb[199].mxu1  ;;  %v2034_v42 = vmax.f32 %v1641_v30, 0.0 }
 0x266   :  { %v2035_v6 = vmax.f32 %v1644_v48, 0.0  ;;  %3725 = vmatmul.mubr.bf16.gmra.mrb[48].mxu1 %v4788_v50 }
 0x267   :  { %3728 = vmatprep.mubr.msk.bf16.mxu1 %vm4153_vm1, %v4152_v0 }
 0x268   :  { %v2158_v27 = vpack.c.bf16 %v2035_v6, %v2034_v42 }
 0x269   :  { %v1648_v29 = vpop.f32.mrb[200].mxu1 }
 0x26a   :  { %v1649_v23 = vadd.f32 %v4978_v10, %v1648_v29  ;;  %v3622_v54 = vpop.f32.mrb[201].mxu1  ;;  %3885 = vmatmul.mubr.bf16.gmra.mrb[200].mxu0 %v2158_v27 }
 0x26b   :  { %v1651_v55 = vpop.f32.mrb[202].mxu1  ;;  %3888 = vmatprep.mubr.msk.bf16.mxu0 %vm4153_vm1, %v4152_v0 }
 0x26c   :  { %v1652_v7 = vadd.f32 %v4978_v10, %v1651_v55  ;;  %v3623_v56 = vpop.f32.mrb[203].mxu1  ;;  %v2036_v18 = vmax.f32 %v1649_v23, 0.0 }
 0x26e   :  { %v2037_v62 = vmax.f32 %v1652_v7, 0.0  ;;  %3729 = vmatmul.mubr.bf16.gmra.mrb[52].mxu1 %v4799_v49 }
 0x26f   :  { %3732 = vmatprep.mubr.msk.bf16.mxu1 %vm4153_vm1, %v4152_v0 }
 0x270   :  { %v2159_v50 = vpack.c.bf16 %v2037_v62, %v2036_v18 }
 0x271   :  { %v1656_v31 = vpop.f32.mrb[204].mxu1 }
 0x272   :  { %v1657_v63 = vadd.f32 %v4978_v10, %v1656_v31  ;;  %v3626_v25 = vpop.f32.mrb[205].mxu1  ;;  %3889 = vmatmul.mubr.bf16.gmra.mrb[204].mxu0 %v2159_v50 }
 0x273   :  { %v1659_v44 = vpop.f32.mrb[206].mxu1  ;;  %3892 = vmatprep.mubr.msk.bf16.mxu0 %vm4153_vm1, %v4152_v0 }
 0x274   :  { %v1660_v51 = vadd.f32 %v4978_v10, %v1659_v44  ;;  %v3627_v19 = vpop.f32.mrb[207].mxu1  ;;  %v2038_v52 = vmax.f32 %v1657_v63, 0.0 }
 0x276   :  { %v2039_v11 = vmax.f32 %v1660_v51, 0.0  ;;  %3733 = vmatmul.mubr.bf16.gmra.mrb[56].mxu1 %v4810_v36 }
 0x277   :  { %3736 = vmatprep.mubr.msk.bf16.mxu1 %vm4153_vm1, %v4152_v0 }
 0x278   :  { %v2160_v49 = vpack.c.bf16 %v2039_v11, %v2038_v52 }
 0x279   :  { %v1664_v22 = vpop.f32.mrb[208].mxu1 }
 0x27a   :  { %v1665_v53 = vadd.f32 %v4978_v10, %v1664_v22  ;;  %v3630_v16 = vpop.f32.mrb[209].mxu1  ;;  %3893 = vmatmul.mubr.bf16.gmra.mrb[208].mxu0 %v2160_v49 }
 0x27b   :  { %v1667_v17 = vpop.f32.mrb[210].mxu1  ;;  %3896 = vmatprep.mubr.msk.bf16.mxu0 %vm4153_vm1, %v4152_v0 }
 0x27c   :  { %v1668_v43 = vadd.f32 %v4978_v10, %v1667_v17  ;;  %v3631_v1 = vpop.f32.mrb[211].mxu1  ;;  %v2040_v45 = vmax.f32 %v1665_v53, 0.0 }
 0x27e   :  { %v2041_v24 = vmax.f32 %v1668_v43, 0.0  ;;  %3737 = vmatmul.mubr.bf16.gmra.mrb[60].mxu1 %v4821_v59 }
 0x27f   :  { %3740 = vmatprep.mubr.msk.bf16.mxu1 %vm4153_vm1, %v4152_v0 }
 0x280   :  { %v2161_v36 = vpack.c.bf16 %v2041_v24, %v2040_v45  ;;  %v5173_v45 = vld [vmem:[%s5986_s6] ss:$0 sm:$0xff] }
 0x281   :  { %v1672_v14 = vpop.f32.mrb[212].mxu1 }
 0x282   :  { %v1673_v46 = vadd.f32 %v4978_v10, %v1672_v14  ;;  %v3634_v26 = vpop.f32.mrb[213].mxu1  ;;  %3897 = vmatmul.mubr.bf16.gmra.mrb[212].mxu0 %v2161_v36 }
 0x283   :  { %v1675_v28 = vpop.f32.mrb[214].mxu1  ;;  %3900 = vmatprep.mubr.msk.bf16.mxu0 %vm4153_vm1, %v4152_v0 }
 0x284   :  { %v1676_v8 = vadd.f32 %v4978_v10, %v1675_v28  ;;  %v3635_v57 = vpop.f32.mrb[215].mxu1  ;;  %v2042_v37 = vmax.f32 %v1673_v46, 0.0 }
 0x286   :  { %v2043_v21 = vmax.f32 %v1676_v8, 0.0  ;;  %3741 = vmatmul.mubr.bf16.gmra.mrb[64].mxu1 %v4832_v20 }
 0x287   :  { %3744 = vmatprep.mubr.msk.bf16.mxu1 %vm4153_vm1, %v4152_v0 }
 0x288   :  { %v2162_v59 = vpack.c.bf16 %v2043_v21, %v2042_v37 }
 0x289   :  { %v1680_v40 = vpop.f32.mrb[216].mxu1 }
 0x28a   :  { %v1681_v2 = vadd.f32 %v4978_v10, %v1680_v40  ;;  %v3638_v4 = vpop.f32.mrb[217].mxu1  ;;  %3901 = vmatmul.mubr.bf16.gmra.mrb[216].mxu0 %v2162_v59 }
 0x28b   :  { %v1683_v35 = vpop.f32.mrb[218].mxu1  ;;  %3904 = vmatprep.mubr.msk.bf16.mxu0 %vm4153_vm1, %v4152_v0 }
 0x28c   :  { %v1684_v30 = vadd.f32 %v4978_v10, %v1683_v35  ;;  %v3639_v12 = vpop.f32.mrb[219].mxu1  ;;  %v2044_v47 = vmax.f32 %v1681_v2, 0.0 }
 0x28e   :  { %v2045_v48 = vmax.f32 %v1684_v30, 0.0  ;;  %3745 = vmatmul.mubr.bf16.gmra.mrb[68].mxu1 %v4843_v32 }
 0x28f   :  { %3748 = vmatprep.mubr.msk.bf16.mxu1 %vm4153_vm1, %v4152_v0 }
 0x290   :  { %v2163_v20 = vpack.c.bf16 %v2045_v48, %v2044_v47 }
 0x291   :  { %v1688_v41 = vpop.f32.mrb[220].mxu1 }
 0x292   :  { %v1689_v42 = vadd.f32 %v4978_v10, %v1688_v41  ;;  %v3642_v6 = vpop.f32.mrb[221].mxu1  ;;  %3905 = vmatmul.mubr.bf16.gmra.mrb[220].mxu0 %v2163_v20 }
 0x293   :  { %v1691_v27 = vpop.f32.mrb[222].mxu1  ;;  %3908 = vmatprep.mubr.msk.bf16.mxu0 %vm4153_vm1, %v4152_v0 }
 0x294   :  { %v1692_v29 = vadd.f32 %v4978_v10, %v1691_v27  ;;  %v3643_v23 = vpop.f32.mrb[223].mxu1  ;;  %v2046_v54 = vmax.f32 %v1689_v42, 0.0 }
 0x296   :  { %v2047_v55 = vmax.f32 %v1692_v29, 0.0  ;;  %3749 = vmatmul.mubr.bf16.gmra.mrb[72].mxu1 %v4854_v13 }
 0x297   :  { %3752 = vmatprep.mubr.msk.bf16.mxu1 %vm4153_vm1, %v4152_v0 }
 0x298   :  { %v2164_v32 = vpack.c.bf16 %v2047_v55, %v2046_v54 }
 0x299   :  { %v1696_v7 = vpop.f32.mrb[224].mxu1 }
 0x29a   :  { %v1697_v56 = vadd.f32 %v4978_v10, %v1696_v7  ;;  %v3646_v18 = vpop.f32.mrb[225].mxu1  ;;  %3909 = vmatmul.mubr.bf16.gmra.mrb[224].mxu0 %v2164_v32 }
 0x29b   :  { %v1699_v62 = vpop.f32.mrb[226].mxu1  ;;  %3912 = vmatprep.mubr.msk.bf16.mxu0 %vm4153_vm1, %v4152_v0 }
 0x29c   :  { %v1700_v50 = vadd.f32 %v4978_v10, %v1699_v62  ;;  %v3647_v31 = vpop.f32.mrb[227].mxu1  ;;  %v2048_v63 = vmax.f32 %v1697_v56, 0.0 }
 0x29e   :  { %v2049_v25 = vmax.f32 %v1700_v50, 0.0  ;;  %3753 = vmatmul.mubr.bf16.gmra.mrb[76].mxu1 %v4865_v39 }
 0x29f   :  { %3756 = vmatprep.mubr.msk.bf16.mxu1 %vm4153_vm1, %v4152_v0 }
 0x2a0   :  { %v2165_v13 = vpack.c.bf16 %v2049_v25, %v2048_v63 }
 0x2a1   :  { %v1704_v44 = vpop.f32.mrb[228].mxu1 }
 0x2a2   :  { %v1705_v51 = vadd.f32 %v4978_v10, %v1704_v44  ;;  %v3650_v19 = vpop.f32.mrb[229].mxu1  ;;  %3913 = vmatmul.mubr.bf16.gmra.mrb[228].mxu0 %v2165_v13 }
 0x2a3   :  { %v1707_v52 = vpop.f32.mrb[230].mxu1  ;;  %3916 = vmatprep.mubr.msk.bf16.mxu0 %vm4153_vm1, %v4152_v0 }
 0x2a4   :  { %v1708_v11 = vadd.f32 %v4978_v10, %v1707_v52  ;;  %v3651_v49 = vpop.f32.mrb[231].mxu1  ;;  %v2050_v22 = vmax.f32 %v1705_v51, 0.0 }
 0x2a6   :  { %v2051_v53 = vmax.f32 %v1708_v11, 0.0  ;;  %3757 = vmatmul.mubr.bf16.gmra.mrb[80].mxu1 %v4876_v5 }
 0x2a7   :  { %3760 = vmatprep.mubr.msk.bf16.mxu1 %vm4153_vm1, %v4152_v0 }
 0x2a8   :  { %v2166_v39 = vpack.c.bf16 %v2051_v53, %v2050_v22 }
 0x2a9   :  { %v1712_v16 = vpop.f32.mrb[232].mxu1 }
 0x2aa   :  { %v1713_v17 = vadd.f32 %v4978_v10, %v1712_v16  ;;  %v3654_v43 = vpop.f32.mrb[233].mxu1  ;;  %3917 = vmatmul.mubr.bf16.gmra.mrb[232].mxu0 %v2166_v39 }
 0x2ab   :  { %v1715_v1 = vpop.f32.mrb[234].mxu1  ;;  %3920 = vmatprep.mubr.msk.bf16.mxu0 %vm4153_vm1, %v4152_v0 }
 0x2ac   :  { %v1716_v5 = vadd.f32 %v4978_v10, %v1715_v1  ;;  %v3655_v24 = vpop.f32.mrb[235].mxu1  ;;  %v2052_v14 = vmax.f32 %v1713_v17, 0.0 }
 0x2ad   :  { %v2291_v36 = vpop.f32.mrb[128].mxu0 }
 0x2ae   :  { %v2053_v46 = vmax.f32 %v1716_v5, 0.0  ;;  %v2292_v26 = vadd.f32 %v5173_v45, %v2291_v36  ;;  %3761 = vmatmul.mubr.bf16.gmra.mrb[84].mxu1 %v4887_v34  ;;  %v3814_v28 = vpop.f32.mrb[129].mxu0 }
 0x2af   :  { %v2294_v8 = vpop.f32.mrb[130].mxu0  ;;  %3764 = vmatprep.mubr.msk.bf16.mxu1 %vm4153_vm1, %v4152_v0 }
 0x2b0   :  { %v2167_v57 = vpack.c.bf16 %v2053_v46, %v2052_v14  ;;  %2794 = vst.msk [vmem:[%s5987_s7] sm:$0xff] %vm2793_vm3, %v2292_v26  ;;  %v2295_v37 = vadd.f32 %v5173_v45, %v2294_v8  ;;  %v3815_v21 = vpop.f32.mrb[131].mxu0 }
 0x2b1   :  { %v1720_v59 = vpop.f32.mrb[236].mxu1 }
 0x2b2   :  { %2795 = vst.msk [vmem:[%s5987_s7 + $0x8] sm:$0xff] %vm2793_vm3, %v2295_v37  ;;  %v1721_v34 = vadd.f32 %v4978_v10, %v1720_v59  ;;  %v3658_v40 = vpop.f32.mrb[237].mxu1  ;;  %3921 = vmatmul.mubr.bf16.gmra.mrb[236].mxu0 %v2167_v57 }
 0x2b3   :  { %v1723_v2 = vpop.f32.mrb[238].mxu1  ;;  %3924 = vmatprep.mubr.msk.bf16.mxu0 %vm4153_vm1, %v4152_v0 }
 0x2b4   :  { %v1724_v4 = vadd.f32 %v4978_v10, %v1723_v2  ;;  %v3659_v35 = vpop.f32.mrb[239].mxu1  ;;  %v2054_v12 = vmax.f32 %v1721_v34, 0.0 }
 0x2b5   :  { %v2299_v30 = vpop.f32.mrb[132].mxu0 }
 0x2b6   :  { %v2055_v47 = vmax.f32 %v1724_v4, 0.0  ;;  %v2300_v48 = vadd.f32 %v5173_v45, %v2299_v30  ;;  %3765 = vmatmul.mubr.bf16.gmra.mrb[88].mxu1 %v4898_v61  ;;  %v3818_v20 = vpop.f32.mrb[133].mxu0 }
 0x2b7   :  { %v2302_v41 = vpop.f32.mrb[134].mxu0  ;;  %3768 = vmatprep.mubr.msk.bf16.mxu1 %vm4153_vm1, %v4152_v0 }
 0x2b8   :  { %v2168_v42 = vpack.c.bf16 %v2055_v47, %v2054_v12  ;;  %2796 = vst.msk [vmem:[%s5987_s7 + $0x10] sm:$0xff] %vm2793_vm3, %v2300_v48  ;;  %v2303_v6 = vadd.f32 %v5173_v45, %v2302_v41  ;;  %v3819_v27 = vpop.f32.mrb[135].mxu0 }
 0x2b9   :  { %v1728_v29 = vpop.f32.mrb[240].mxu1 }
 0x2ba   :  { %2797 = vst.msk [vmem:[%s5987_s7 + $0x18] sm:$0xff] %vm2793_vm3, %v2303_v6  ;;  %v1729_v61 = vadd.f32 %v4978_v10, %v1728_v29  ;;  %v3662_v23 = vpop.f32.mrb[241].mxu1  ;;  %3925 = vmatmul.mubr.bf16.gmra.mrb[240].mxu0 %v2168_v42 }
 0x2bb   :  { %v1731_v54 = vpop.f32.mrb[242].mxu1  ;;  %3928 = vmatprep.mubr.msk.bf16.mxu0 %vm4153_vm1, %v4152_v0 }
 0x2bc   :  { %v1732_v55 = vadd.f32 %v4978_v10, %v1731_v54  ;;  %v3663_v32 = vpop.f32.mrb[243].mxu1  ;;  %v2056_v56 = vmax.f32 %v1729_v61, 0.0 }
 0x2bd   :  { %v2307_v7 = vpop.f32.mrb[136].mxu0 }
 0x2be   :  { %v2057_v18 = vmax.f32 %v1732_v55, 0.0  ;;  %v2308_v62 = vadd.f32 %v5173_v45, %v2307_v7  ;;  %3769 = vmatmul.mubr.bf16.gmra.mrb[92].mxu1 %v4914_v9  ;;  %v3822_v50 = vpop.f32.mrb[137].mxu0 }
 0x2bf   :  { %v2310_v31 = vpop.f32.mrb[138].mxu0  ;;  %3772 = vmatprep.mubr.msk.bf16.mxu1 %vm4153_vm1, %v4152_v0 }
 0x2c0   :  { %v2169_v63 = vpack.c.bf16 %v2057_v18, %v2056_v56  ;;  %2798 = vst.msk [vmem:[%s5987_s7 + $0x20] sm:$0xff] %vm2793_vm3, %v2308_v62  ;;  %v2311_v25 = vadd.f32 %v5173_v45, %v2310_v31  ;;  %v3823_v13 = vpop.f32.mrb[139].mxu0 }
 0x2c1   :  { %v1736_v44 = vpop.f32.mrb[244].mxu1 }
 0x2c2   :  { %2799 = vst.msk [vmem:[%s5987_s7 + $0x28] sm:$0xff] %vm2793_vm3, %v2311_v25  ;;  %v1737_v9 = vadd.f32 %v4978_v10, %v1736_v44  ;;  %v3666_v51 = vpop.f32.mrb[245].mxu1  ;;  %3929 = vmatmul.mubr.bf16.gmra.mrb[244].mxu0 %v2169_v63 }
 0x2c3   :  { %v1739_v19 = vpop.f32.mrb[246].mxu1  ;;  %3932 = vmatprep.mubr.msk.bf16.mxu0 %vm4153_vm1, %v4152_v0 }
 0x2c4   :  { %v1740_v52 = vadd.f32 %v4978_v10, %v1739_v19  ;;  %v3667_v11 = vpop.f32.mrb[247].mxu1  ;;  %v2058_v22 = vmax.f32 %v1737_v9, 0.0 }
 0x2c5   :  { %v2315_v49 = vpop.f32.mrb[140].mxu0  ;;  %v4149_v11 = vld [vmem:[%s5984_s2] ss:$0 sm:$0xff] }
 0x2c6   :  { %v2059_v53 = vmax.f32 %v1740_v52, 0.0  ;;  %v2316_v39 = vadd.f32 %v5173_v45, %v2315_v49  ;;  %3773 = vmatmul.mubr.bf16.gmra.mrb[96].mxu1 %v4925_v60  ;;  %v3826_v16 = vpop.f32.mrb[141].mxu0  ;;  %v1198_v49 = vadd.f32 %v4149_v11, %v4971_v33 }
 0x2c7   :  { %v2318_v17 = vpop.f32.mrb[142].mxu0  ;;  %3776 = vmatprep.mubr.msk.bf16.mxu1 %vm4153_vm1, %v4152_v0 }
 0x2c8   :  { %v2170_v43 = vpack.c.bf16 %v2059_v53, %v2058_v22  ;;  %2800 = vst.msk [vmem:[%s5987_s7 + $0x30] sm:$0xff] %vm2793_vm3, %v2316_v39  ;;  %v2319_v1 = vadd.f32 %v5173_v45, %v2318_v17  ;;  %v3827_v5 = vpop.f32.mrb[143].mxu0 }
 0x2c9   :  { %v1744_v24 = vpop.f32.mrb[248].mxu1 }
 0x2ca   :  { %2801 = vst.msk [vmem:[%s5987_s7 + $0x38] sm:$0xff] %vm2793_vm3, %v2319_v1  ;;  %v1745_v60 = vadd.f32 %v4978_v10, %v1744_v24  ;;  %v3670_v36 = vpop.f32.mrb[249].mxu1  ;;  %3933 = vmatmul.mubr.bf16.gmra.mrb[248].mxu0 %v2170_v43  ;;  %v1327_v24 = vmax.f32 %v1198_v49, 0.0 }
 0x2cb   :  { %v1747_v14 = vpop.f32.mrb[250].mxu1  ;;  %3936 = vmatprep.mubr.msk.bf16.mxu0 %vm4153_vm1, %v4152_v0 }
 0x2cc   :  { %v1748_v46 = vadd.f32 %v4978_v10, %v1747_v14  ;;  %v3671_v26 = vpop.f32.mrb[251].mxu1  ;;  %v2060_v8 = vmax.f32 %v1745_v60, 0.0 }
 0x2cd   :  { %v2323_v28 = vpop.f32.mrb[144].mxu0 }
 0x2ce   :  { %v2061_v57 = vmax.f32 %v1748_v46, 0.0  ;;  %v2324_v37 = vadd.f32 %v5173_v45, %v2323_v28  ;;  %3777 = vmatmul.mubr.bf16.gmra.mrb[100].mxu1 %v4936_v58  ;;  %v3830_v21 = vpop.f32.mrb[145].mxu0  ;;  %v1407_v28 = vpack.c.bf16 %v1327_v24, %v1327_v24 }
 0x2cf   :  { %v2326_v59 = vpop.f32.mrb[146].mxu0  ;;  %3780 = vmatprep.mubr.msk.bf16.mxu1 %vm4153_vm1, %v4152_v0 }
 0x2d0   :  { %v2171_v34 = vpack.c.bf16 %v2061_v57, %v2060_v8  ;;  %2802 = vst.msk [vmem:[%s5987_s7 + $0x40] sm:$0xff] %vm2793_vm3, %v2324_v37  ;;  %v2327_v40 = vadd.f32 %v5173_v45, %v2326_v59  ;;  %v3831_v2 = vpop.f32.mrb[147].mxu0 }
 0x2d1   :  { %v1752_v4 = vpop.f32.mrb[252].mxu1 }
 0x2d2   :  { %2803 = vst.msk [vmem:[%s5987_s7 + $0x48] sm:$0xff] %vm2793_vm3, %v2327_v40  ;;  %v1753_v58 = vadd.f32 %v4978_v10, %v1752_v4  ;;  %v3674_v35 = vpop.f32.mrb[253].mxu1  ;;  %3937 = vmatmul.mubr.bf16.gmra.mrb[252].mxu0 %v2171_v34 }
 0x2d3   :  { %v1755_v30 = vpop.f32.mrb[254].mxu1  ;;  %3940 = vmatprep.mubr.msk.bf16.mxu0 %vm4153_vm1, %v4152_v0 }
 0x2d4   :  { %v1756_v12 = vadd.f32 %v4978_v10, %v1755_v30  ;;  %v3675_v47 = vpop.f32.mrb[255].mxu1  ;;  %v2062_v20 = vmax.f32 %v1753_v58, 0.0 }
 0x2d5   :  { %v2331_v48 = vpop.f32.mrb[148].mxu0 }
 0x2d6   :  { %v2063_v41 = vmax.f32 %v1756_v12, 0.0  ;;  %v2332_v42 = vadd.f32 %v5173_v45, %v2331_v48  ;;  %3781 = vmatmul.mubr.bf16.gmra.mrb[104].mxu1 %v4947_v3  ;;  %v3834_v6 = vpop.f32.mrb[149].mxu0 }
 0x2d7   :  { %v2334_v27 = vpop.f32.mrb[150].mxu0  ;;  %3784 = vmatprep.mubr.msk.bf16.mxu1 %vm4153_vm1, %v4152_v0 }
 0x2d8   :  { %v2172_v29 = vpack.c.bf16 %v2063_v41, %v2062_v20  ;;  %2804 = vst.msk [vmem:[%s5987_s7 + $0x50] sm:$0xff] %vm2793_vm3, %v2332_v42  ;;  %v2335_v61 = vadd.f32 %v5173_v45, %v2334_v27  ;;  %v3835_v23 = vpop.f32.mrb[151].mxu0 }
 0x2d9   :  { %v1760_v54 = vpop.f32.mrb[0].mxu1 }
 0x2da   :  { %2805 = vst.msk [vmem:[%s5987_s7 + $0x58] sm:$0xff] %vm2793_vm3, %v2335_v61  ;;  %v1761_v3 = vadd.f32 %v4978_v10, %v1760_v54  ;;  %v3678_v55 = vpop.f32.mrb[1].mxu1  ;;  %3941 = vmatmul.mubr.bf16.gmra.mrb[0].mxu0 %v2172_v29 }
 0x2db   :  { %v1763_v32 = vpop.f32.mrb[2].mxu1  ;;  %3944 = vmatprep.mubr.msk.bf16.mxu0 %vm4153_vm1, %v4152_v0 }
 0x2dc   :  { %v1764_v7 = vadd.f32 %v4978_v10, %v1763_v32  ;;  %v3679_v56 = vpop.f32.mrb[3].mxu1  ;;  %v2064_v62 = vmax.f32 %v1761_v3, 0.0 }
 0x2dd   :  { %v2339_v18 = vpop.f32.mrb[152].mxu0 }
 0x2de   :  { %v2065_v50 = vmax.f32 %v1764_v7, 0.0  ;;  %v2340_v31 = vadd.f32 %v5173_v45, %v2339_v18  ;;  %3785 = vmatmul.mubr.bf16.gmra.mrb[108].mxu1 %v4958_v38  ;;  %v3838_v63 = vpop.f32.mrb[153].mxu0  ;;  %v5296_v38 = vld [vmem:[%s5985_s4] ss:$0 sm:$0xff] }
 0x2df   :  { %v2342_v25 = vpop.f32.mrb[154].mxu0  ;;  %3788 = vmatprep.mubr.msk.bf16.mxu1 %vm4153_vm1, %v4152_v0 }
 0x2e0   :  { %v2173_v13 = vpack.c.bf16 %v2065_v50, %v2064_v62  ;;  %2806 = vst.msk [vmem:[%s5987_s7 + $0x60] sm:$0xff] %vm2793_vm3, %v2340_v31  ;;  %v2343_v10 = vadd.f32 %v5173_v45, %v2342_v25  ;;  %v3839_v44 = vpop.f32.mrb[155].mxu0 }
 0x2e1   :  { %v1768_v9 = vpop.f32.mrb[4].mxu1 }
 0x2e2   :  { %2807 = vst.msk [vmem:[%s5987_s7 + $0x68] sm:$0xff] %vm2793_vm3, %v2343_v10  ;;  %v1769_v51 = vadd.f32 %v5296_v38, %v1768_v9  ;;  %v3682_v19 = vpop.f32.mrb[5].mxu1  ;;  %3945 = vmatmul.mubr.bf16.gmra.mrb[4].mxu0 %v2173_v13 }
 0x2e3   :  { %v1771_v52 = vpop.f32.mrb[6].mxu1  ;;  %3948 = vmatprep.mubr.msk.bf16.mxu0 %vm4153_vm1, %v4152_v0 }
 0x2e4   :  { %v1772_v22 = vadd.f32 %v5296_v38, %v1771_v52  ;;  %v3683_v53 = vpop.f32.mrb[7].mxu1  ;;  %v2066_v16 = vmax.f32 %v1769_v51, 0.0 }
 0x2e5   :  { %v2347_v39 = vpop.f32.mrb[156].mxu0 }
 0x2e6   :  { %v2067_v17 = vmax.f32 %v1772_v22, 0.0  ;;  %v2348_v43 = vadd.f32 %v5173_v45, %v2347_v39  ;;  %3789 = vmatmul.mubr.bf16.gmra.mrb[112].mxu1 %v4969_v15  ;;  %v3842_v1 = vpop.f32.mrb[157].mxu0 }
 0x2e7   :  { %v2350_v5 = vpop.f32.mrb[158].mxu0  ;;  %3792 = vmatprep.mubr.msk.bf16.mxu1 %vm4153_vm1, %v4152_v0 }
 0x2e8   :  { %v2174_v60 = vpack.c.bf16 %v2067_v17, %v2066_v16  ;;  %2808 = vst.msk [vmem:[%s5987_s7 + $0x70] sm:$0xff] %vm2793_vm3, %v2348_v43  ;;  %v2351_v33 = vadd.f32 %v5173_v45, %v2350_v5  ;;  %v3843_v36 = vpop.f32.mrb[159].mxu0 }
 0x2e9   :  { %v1776_v14 = vpop.f32.mrb[8].mxu1 }
 0x2ea   :  { %2809 = vst.msk [vmem:[%s5987_s7 + $0x78] sm:$0xff] %vm2793_vm3, %v2351_v33  ;;  %v1777_v15 = vadd.f32 %v5296_v38, %v1776_v14  ;;  %v3686_v46 = vpop.f32.mrb[9].mxu1  ;;  %3949 = vmatmul.mubr.bf16.gmra.mrb[8].mxu0 %v2174_v60 }
 0x2eb   :  { %v1779_v26 = vpop.f32.mrb[10].mxu1  ;;  %3952 = vmatprep.mubr.msk.bf16.mxu0 %vm4153_vm1, %v4152_v0 }
 0x2ec   :  { %v1780_v8 = vadd.f32 %v5296_v38, %v1779_v26  ;;  %v3687_v57 = vpop.f32.mrb[11].mxu1  ;;  %v2068_v21 = vmax.f32 %v1777_v15, 0.0 }
 0x2ed   :  { %v2355_v37 = vpop.f32.mrb[160].mxu0 }
 0x2ee   :  { %v2069_v59 = vmax.f32 %v1780_v8, 0.0  ;;  %v2356_v34 = vadd.f32 %v5173_v45, %v2355_v37  ;;  %3793 = vmatmul.mubr.bf16.gmra.mrb[116].mxu1 %v1407_v28  ;;  %v3846_v40 = vpop.f32.mrb[161].mxu0 }
 0x2ef   :  { %v2358_v2 = vpop.f32.mrb[162].mxu0 }
 0x2f0   :  { %v2175_v4 = vpack.c.bf16 %v2069_v59, %v2068_v21  ;;  %2810 = vst.msk [vmem:[%s5987_s7 + $0x80] sm:$0xff] %vm2793_vm3, %v2356_v34  ;;  %v2359_v58 = vadd.f32 %v5173_v45, %v2358_v2  ;;  %v3847_v35 = vpop.f32.mrb[163].mxu0 }
 0x2f1   :  { %v1784_v30 = vpop.f32.mrb[12].mxu1 }
 0x2f2   :  { %2811 = vst.msk [vmem:[%s5987_s7 + $0x88] sm:$0xff] %vm2793_vm3, %v2359_v58  ;;  %v1785_v12 = vadd.f32 %v5296_v38, %v1784_v30  ;;  %v3690_v47 = vpop.f32.mrb[13].mxu1  ;;  %3953 = vmatmul.mubr.bf16.gmra.mrb[12].mxu0 %v2175_v4 }
 0x2f3   :  { %v1787_v48 = vpop.f32.mrb[14].mxu1  ;;  %3956 = vmatprep.mubr.msk.bf16.mxu0 %vm4153_vm1, %v4152_v0 }
 0x2f4   :  { %v1788_v20 = vadd.f32 %v5296_v38, %v1787_v48  ;;  %v3691_v41 = vpop.f32.mrb[15].mxu1  ;;  %v2070_v6 = vmax.f32 %v1785_v12, 0.0 }
 0x2f5   :  { %v2363_v42 = vpop.f32.mrb[164].mxu0 }
 0x2f6   :  { %v2071_v27 = vmax.f32 %v1788_v20, 0.0  ;;  %v2364_v29 = vadd.f32 %v5173_v45, %v2363_v42  ;;  %v3850_v61 = vpop.f32.mrb[165].mxu0 }
 0x2f7   :  { %v2366_v23 = vpop.f32.mrb[166].mxu0 }
 0x2f8   :  { %v2176_v54 = vpack.c.bf16 %v2071_v27, %v2070_v6  ;;  %2812 = vst.msk [vmem:[%s5987_s7 + $0x90] sm:$0xff] %vm2793_vm3, %v2364_v29  ;;  %v2367_v3 = vadd.f32 %v5173_v45, %v2366_v23  ;;  %v3851_v55 = vpop.f32.mrb[167].mxu0 }
 0x2f9   :  { %v1792_v32 = vpop.f32.mrb[16].mxu1 }
 0x2fa   :  { %2813 = vst.msk [vmem:[%s5987_s7 + $0x98] sm:$0xff] %vm2793_vm3, %v2367_v3  ;;  %v1793_v7 = vadd.f32 %v5296_v38, %v1792_v32  ;;  %v3694_v56 = vpop.f32.mrb[17].mxu1  ;;  %3957 = vmatmul.mubr.bf16.gmra.mrb[16].mxu0 %v2176_v54 }
 0x2fb   :  { %v1795_v18 = vpop.f32.mrb[18].mxu1  ;;  %3960 = vmatprep.mubr.msk.bf16.mxu0 %vm4153_vm1, %v4152_v0 }
 0x2fc   :  { %v1796_v62 = vadd.f32 %v5296_v38, %v1795_v18  ;;  %v3695_v50 = vpop.f32.mrb[19].mxu1  ;;  %v2072_v63 = vmax.f32 %v1793_v7, 0.0 }
 0x2fd   :  { %v2371_v31 = vpop.f32.mrb[168].mxu0 }
 0x2fe   :  { %v2073_v25 = vmax.f32 %v1796_v62, 0.0  ;;  %v2372_v13 = vadd.f32 %v5173_v45, %v2371_v31  ;;  %v3854_v10 = vpop.f32.mrb[169].mxu0 }
 0x2ff   :  { %v2374_v44 = vpop.f32.mrb[170].mxu0 }
 0x300   :  { %v2177_v9 = vpack.c.bf16 %v2073_v25, %v2072_v63  ;;  %2814 = vst.msk [vmem:[%s5987_s7 + $0xa0] sm:$0xff] %vm2793_vm3, %v2372_v13  ;;  %v2375_v51 = vadd.f32 %v5173_v45, %v2374_v44  ;;  %v3855_v19 = vpop.f32.mrb[171].mxu0 }
 0x301   :  { %v1800_v52 = vpop.f32.mrb[20].mxu1 }
 0x302   :  { %2815 = vst.msk [vmem:[%s5987_s7 + $0xa8] sm:$0xff] %vm2793_vm3, %v2375_v51  ;;  %v1801_v11 = vadd.f32 %v5296_v38, %v1800_v52  ;;  %v3698_v49 = vpop.f32.mrb[21].mxu1  ;;  %3961 = vmatmul.mubr.bf16.gmra.mrb[20].mxu0 %v2177_v9 }
 0x303   :  { %v1803_v22 = vpop.f32.mrb[22].mxu1  ;;  %3964 = vmatprep.mubr.msk.bf16.mxu0 %vm4153_vm1, %v4152_v0 }
 0x304   :  { %v1804_v53 = vadd.f32 %v5296_v38, %v1803_v22  ;;  %v3699_v39 = vpop.f32.mrb[23].mxu1  ;;  %v2074_v17 = vmax.f32 %v1801_v11, 0.0 }
 0x305   :  { %v2379_v16 = vpop.f32.mrb[172].mxu0 }
 0x306   :  { %v2075_v43 = vmax.f32 %v1804_v53, 0.0  ;;  %v2380_v1 = vadd.f32 %v5173_v45, %v2379_v16  ;;  %v3858_v5 = vpop.f32.mrb[173].mxu0 }
 0x307   :  { %v2382_v24 = vpop.f32.mrb[174].mxu0 }
 0x308   :  { %v2178_v60 = vpack.c.bf16 %v2075_v43, %v2074_v17  ;;  %2816 = vst.msk [vmem:[%s5987_s7 + $0xb0] sm:$0xff] %vm2793_vm3, %v2380_v1  ;;  %v2383_v33 = vadd.f32 %v5173_v45, %v2382_v24  ;;  %v3859_v36 = vpop.f32.mrb[175].mxu0 }
 0x309   :  { %v1808_v14 = vpop.f32.mrb[24].mxu1 }
 0x30a   :  { %2817 = vst.msk [vmem:[%s5987_s7 + $0xb8] sm:$0xff] %vm2793_vm3, %v2383_v33  ;;  %v1809_v15 = vadd.f32 %v5296_v38, %v1808_v14  ;;  %v3702_v46 = vpop.f32.mrb[25].mxu1  ;;  %3965 = vmatmul.mubr.bf16.gmra.mrb[24].mxu0 %v2178_v60 }
 0x30b   :  { %v1811_v26 = vpop.f32.mrb[26].mxu1  ;;  %3968 = vmatprep.mubr.msk.bf16.mxu0 %vm4153_vm1, %v4152_v0 }
 0x30c   :  { %v1812_v28 = vadd.f32 %v5296_v38, %v1811_v26  ;;  %v3703_v8 = vpop.f32.mrb[27].mxu1  ;;  %v2076_v37 = vmax.f32 %v1809_v15, 0.0 }
 0x30d   :  { %v2387_v57 = vpop.f32.mrb[176].mxu0 }
 0x30e   :  { %v2077_v21 = vmax.f32 %v1812_v28, 0.0  ;;  %v2388_v59 = vadd.f32 %v5173_v45, %v2387_v57  ;;  %v3862_v34 = vpop.f32.mrb[177].mxu0 }
 0x30f   :  { %v2390_v40 = vpop.f32.mrb[178].mxu0 }
 0x310   :  { %v2179_v2 = vpack.c.bf16 %v2077_v21, %v2076_v37  ;;  %2818 = vst.msk [vmem:[%s5987_s7 + $0xc0] sm:$0xff] %vm2793_vm3, %v2388_v59  ;;  %v2391_v4 = vadd.f32 %v5173_v45, %v2390_v40  ;;  %v3863_v58 = vpop.f32.mrb[179].mxu0 }
 0x311   :  { %v1816_v35 = vpop.f32.mrb[28].mxu1 }
 0x312   :  { %2819 = vst.msk [vmem:[%s5987_s7 + $0xc8] sm:$0xff] %vm2793_vm3, %v2391_v4  ;;  %v1817_v30 = vadd.f32 %v5296_v38, %v1816_v35  ;;  %v3706_v12 = vpop.f32.mrb[29].mxu1  ;;  %3969 = vmatmul.mubr.bf16.gmra.mrb[28].mxu0 %v2179_v2 }
 0x313   :  { %v1819_v47 = vpop.f32.mrb[30].mxu1  ;;  %3972 = vmatprep.mubr.msk.bf16.mxu0 %vm4153_vm1, %v4152_v0 }
 0x314   :  { %v1820_v48 = vadd.f32 %v5296_v38, %v1819_v47  ;;  %v3707_v20 = vpop.f32.mrb[31].mxu1  ;;  %v2078_v42 = vmax.f32 %v1817_v30, 0.0 }
 0x315   :  { %v2395_v41 = vpop.f32.mrb[180].mxu0 }
 0x316   :  { %v2079_v6 = vmax.f32 %v1820_v48, 0.0  ;;  %v2396_v27 = vadd.f32 %v5173_v45, %v2395_v41  ;;  %v3866_v29 = vpop.f32.mrb[181].mxu0 }
 0x317   :  { %v2398_v61 = vpop.f32.mrb[182].mxu0 }
 0x318   :  { %v2180_v23 = vpack.c.bf16 %v2079_v6, %v2078_v42  ;;  %2820 = vst.msk [vmem:[%s5987_s7 + $0xd0] sm:$0xff] %vm2793_vm3, %v2396_v27  ;;  %v2399_v54 = vadd.f32 %v5173_v45, %v2398_v61  ;;  %v3867_v3 = vpop.f32.mrb[183].mxu0 }
 0x319   :  { %v1824_v55 = vpop.f32.mrb[32].mxu1 }
 0x31a   :  { %2821 = vst.msk [vmem:[%s5987_s7 + $0xd8] sm:$0xff] %vm2793_vm3, %v2399_v54  ;;  %v1825_v32 = vadd.f32 %v5296_v38, %v1824_v55  ;;  %v3710_v7 = vpop.f32.mrb[33].mxu1  ;;  %3973 = vmatmul.mubr.bf16.gmra.mrb[32].mxu0 %v2180_v23 }
 0x31b   :  { %v1827_v56 = vpop.f32.mrb[34].mxu1  ;;  %3976 = vmatprep.mubr.msk.bf16.mxu0 %vm4153_vm1, %v4152_v0 }
 0x31c   :  { %v1828_v18 = vadd.f32 %v5296_v38, %v1827_v56  ;;  %v3711_v62 = vpop.f32.mrb[35].mxu1  ;;  %v2080_v31 = vmax.f32 %v1825_v32, 0.0 }
 0x31d   :  { %v2403_v50 = vpop.f32.mrb[184].mxu0 }
 0x31e   :  { %v2081_v63 = vmax.f32 %v1828_v18, 0.0  ;;  %v2404_v25 = vadd.f32 %v5173_v45, %v2403_v50  ;;  %v3870_v13 = vpop.f32.mrb[185].mxu0 }
 0x31f   :  { %v2406_v10 = vpop.f32.mrb[186].mxu0 }
 0x320   :  { %v2181_v44 = vpack.c.bf16 %v2081_v63, %v2080_v31  ;;  %2822 = vst.msk [vmem:[%s5987_s7 + $0xe0] sm:$0xff] %vm2793_vm3, %v2404_v25  ;;  %v2407_v9 = vadd.f32 %v5173_v45, %v2406_v10  ;;  %v3871_v51 = vpop.f32.mrb[187].mxu0 }
 0x321   :  { %v1832_v19 = vpop.f32.mrb[36].mxu1 }
 0x322   :  { %2823 = vst.msk [vmem:[%s5987_s7 + $0xe8] sm:$0xff] %vm2793_vm3, %v2407_v9  ;;  %v1833_v52 = vadd.f32 %v5296_v38, %v1832_v19  ;;  %v3714_v11 = vpop.f32.mrb[37].mxu1  ;;  %3977 = vmatmul.mubr.bf16.gmra.mrb[36].mxu0 %v2181_v44 }
 0x323   :  { %v1835_v49 = vpop.f32.mrb[38].mxu1  ;;  %3980 = vmatprep.mubr.msk.bf16.mxu0 %vm4153_vm1, %v4152_v0 }
 0x324   :  { %v1836_v22 = vadd.f32 %v5296_v38, %v1835_v49  ;;  %v3715_v53 = vpop.f32.mrb[39].mxu1  ;;  %v2082_v16 = vmax.f32 %v1833_v52, 0.0 }
 0x325   :  { %v2411_v39 = vpop.f32.mrb[188].mxu0 }
 0x326   :  { %v2083_v17 = vmax.f32 %v1836_v22, 0.0  ;;  %v2412_v43 = vadd.f32 %v5173_v45, %v2411_v39  ;;  %v3874_v1 = vpop.f32.mrb[189].mxu0 }
 0x327   :  { %v2414_v5 = vpop.f32.mrb[190].mxu0 }
 0x328   :  { %v2182_v24 = vpack.c.bf16 %v2083_v17, %v2082_v16  ;;  %2824 = vst.msk [vmem:[%s5987_s7 + $0xf0] sm:$0xff] %vm2793_vm3, %v2412_v43  ;;  %v2415_v60 = vadd.f32 %v5173_v45, %v2414_v5  ;;  %v3875_v33 = vpop.f32.mrb[191].mxu0 }
 0x329   :  { %v1840_v36 = vpop.f32.mrb[40].mxu1 }
 0x32a   :  { %2825 = vst.msk [vmem:[%s5987_s7 + $0xf8] sm:$0xff] %vm2793_vm3, %v2415_v60  ;;  %v1841_v14 = vadd.f32 %v5296_v38, %v1840_v36  ;;  %v3718_v15 = vpop.f32.mrb[41].mxu1  ;;  %3981 = vmatmul.mubr.bf16.gmra.mrb[40].mxu0 %v2182_v24 }
 0x32b   :  { %v1843_v46 = vpop.f32.mrb[42].mxu1  ;;  %3984 = vmatprep.mubr.msk.bf16.mxu0 %vm4153_vm1, %v4152_v0 }
 0x32c   :  { %v1844_v26 = vadd.f32 %v5296_v38, %v1843_v46  ;;  %v3719_v28 = vpop.f32.mrb[43].mxu1  ;;  %v2084_v57 = vmax.f32 %v1841_v14, 0.0 }
 0x32d   :  { %v2419_v8 = vpop.f32.mrb[192].mxu0 }
 0x32e   :  { %v2085_v37 = vmax.f32 %v1844_v26, 0.0  ;;  %v2420_v21 = vadd.f32 %v5173_v45, %v2419_v8  ;;  %v3878_v59 = vpop.f32.mrb[193].mxu0 }
 0x32f   :  { %v2422_v34 = vpop.f32.mrb[194].mxu0 }
 0x330   :  { %v2183_v40 = vpack.c.bf16 %v2085_v37, %v2084_v57  ;;  %2826 = vst.msk [vmem:[%s5987_s7 + $0x100] sm:$0xff] %vm2793_vm3, %v2420_v21  ;;  %v2423_v2 = vadd.f32 %v5173_v45, %v2422_v34  ;;  %v3879_v4 = vpop.f32.mrb[195].mxu0 }
 0x331   :  { %v1848_v58 = vpop.f32.mrb[44].mxu1 }
 0x332   :  { %2827 = vst.msk [vmem:[%s5987_s7 + $0x108] sm:$0xff] %vm2793_vm3, %v2423_v2  ;;  %v1849_v35 = vadd.f32 %v5296_v38, %v1848_v58  ;;  %v3722_v30 = vpop.f32.mrb[45].mxu1  ;;  %3985 = vmatmul.mubr.bf16.gmra.mrb[44].mxu0 %v2183_v40 }
 0x333   :  { %v1851_v12 = vpop.f32.mrb[46].mxu1  ;;  %3988 = vmatprep.mubr.msk.bf16.mxu0 %vm4153_vm1, %v4152_v0 }
 0x334   :  { %v1852_v47 = vadd.f32 %v5296_v38, %v1851_v12  ;;  %v3723_v48 = vpop.f32.mrb[47].mxu1  ;;  %v2086_v41 = vmax.f32 %v1849_v35, 0.0 }
 0x335   :  { %v2427_v20 = vpop.f32.mrb[196].mxu0 }
 0x336   :  { %v2087_v42 = vmax.f32 %v1852_v47, 0.0  ;;  %v2428_v6 = vadd.f32 %v5173_v45, %v2427_v20  ;;  %v3882_v27 = vpop.f32.mrb[197].mxu0 }
 0x337   :  { %v2430_v29 = vpop.f32.mrb[198].mxu0 }
 0x338   :  { %v2184_v61 = vpack.c.bf16 %v2087_v42, %v2086_v41  ;;  %2828 = vst.msk [vmem:[%s5987_s7 + $0x110] sm:$0xff] %vm2793_vm3, %v2428_v6  ;;  %v2431_v23 = vadd.f32 %v5173_v45, %v2430_v29  ;;  %v3883_v54 = vpop.f32.mrb[199].mxu0 }
 0x339   :  { %v1856_v3 = vpop.f32.mrb[48].mxu1 }
 0x33a   :  { %2829 = vst.msk [vmem:[%s5987_s7 + $0x118] sm:$0xff] %vm2793_vm3, %v2431_v23  ;;  %v1857_v55 = vadd.f32 %v5296_v38, %v1856_v3  ;;  %v3726_v32 = vpop.f32.mrb[49].mxu1  ;;  %3989 = vmatmul.mubr.bf16.gmra.mrb[48].mxu0 %v2184_v61 }
 0x33b   :  { %v1859_v7 = vpop.f32.mrb[50].mxu1  ;;  %3992 = vmatprep.mubr.msk.bf16.mxu0 %vm4153_vm1, %v4152_v0 }
 0x33c   :  { %v1860_v56 = vadd.f32 %v5296_v38, %v1859_v7  ;;  %v3727_v18 = vpop.f32.mrb[51].mxu1  ;;  %v2088_v50 = vmax.f32 %v1857_v55, 0.0 }
 0x33d   :  { %v2435_v62 = vpop.f32.mrb[200].mxu0 }
 0x33e   :  { %v2089_v31 = vmax.f32 %v1860_v56, 0.0  ;;  %v2436_v63 = vadd.f32 %v5173_v45, %v2435_v62  ;;  %v3886_v25 = vpop.f32.mrb[201].mxu0 }
 0x33f   :  { %v2438_v13 = vpop.f32.mrb[202].mxu0 }
 0x340   :  { %v2185_v10 = vpack.c.bf16 %v2089_v31, %v2088_v50  ;;  %2830 = vst.msk [vmem:[%s5987_s7 + $0x120] sm:$0xff] %vm2793_vm3, %v2436_v63  ;;  %v2439_v44 = vadd.f32 %v5173_v45, %v2438_v13  ;;  %v3887_v9 = vpop.f32.mrb[203].mxu0 }
 0x341   :  { %v1864_v51 = vpop.f32.mrb[52].mxu1 }
 0x342   :  { %2831 = vst.msk [vmem:[%s5987_s7 + $0x128] sm:$0xff] %vm2793_vm3, %v2439_v44  ;;  %v1865_v19 = vadd.f32 %v5296_v38, %v1864_v51  ;;  %v3730_v52 = vpop.f32.mrb[53].mxu1  ;;  %3993 = vmatmul.mubr.bf16.gmra.mrb[52].mxu0 %v2185_v10 }
 0x343   :  { %v1867_v11 = vpop.f32.mrb[54].mxu1  ;;  %3996 = vmatprep.mubr.msk.bf16.mxu0 %vm4153_vm1, %v4152_v0 }
 0x344   :  { %v1868_v49 = vadd.f32 %v5296_v38, %v1867_v11  ;;  %v3731_v22 = vpop.f32.mrb[55].mxu1  ;;  %v2090_v39 = vmax.f32 %v1865_v19, 0.0 }
 0x345   :  { %v2443_v53 = vpop.f32.mrb[204].mxu0 }
 0x346   :  { %v2091_v16 = vmax.f32 %v1868_v49, 0.0  ;;  %v2444_v17 = vadd.f32 %v5173_v45, %v2443_v53  ;;  %v3890_v43 = vpop.f32.mrb[205].mxu0 }
 0x347   :  { %v2446_v1 = vpop.f32.mrb[206].mxu0 }
 0x348   :  { %v2186_v5 = vpack.c.bf16 %v2091_v16, %v2090_v39  ;;  %2832 = vst.msk [vmem:[%s5987_s7 + $0x130] sm:$0xff] %vm2793_vm3, %v2444_v17  ;;  %v2447_v24 = vadd.f32 %v5173_v45, %v2446_v1  ;;  %v3891_v60 = vpop.f32.mrb[207].mxu0 }
 0x349   :  { %v1872_v33 = vpop.f32.mrb[56].mxu1 }
 0x34a   :  { %2833 = vst.msk [vmem:[%s5987_s7 + $0x138] sm:$0xff] %vm2793_vm3, %v2447_v24  ;;  %v1873_v36 = vadd.f32 %v5296_v38, %v1872_v33  ;;  %v3734_v14 = vpop.f32.mrb[57].mxu1  ;;  %3997 = vmatmul.mubr.bf16.gmra.mrb[56].mxu0 %v2186_v5 }
 0x34b   :  { %v1875_v15 = vpop.f32.mrb[58].mxu1  ;;  %4000 = vmatprep.mubr.msk.bf16.mxu0 %vm4153_vm1, %v4152_v0 }
 0x34c   :  { %v1876_v46 = vadd.f32 %v5296_v38, %v1875_v15  ;;  %v3735_v26 = vpop.f32.mrb[59].mxu1  ;;  %v2092_v8 = vmax.f32 %v1873_v36, 0.0 }
 0x34d   :  { %v2451_v28 = vpop.f32.mrb[208].mxu0 }
 0x34e   :  { %v2093_v57 = vmax.f32 %v1876_v46, 0.0  ;;  %v2452_v37 = vadd.f32 %v5173_v45, %v2451_v28  ;;  %v3894_v21 = vpop.f32.mrb[209].mxu0 }
 0x34f   :  { %v2454_v59 = vpop.f32.mrb[210].mxu0 }
 0x350   :  { %v2187_v34 = vpack.c.bf16 %v2093_v57, %v2092_v8  ;;  %2834 = vst.msk [vmem:[%s5987_s7 + $0x140] sm:$0xff] %vm2793_vm3, %v2452_v37  ;;  %v2455_v40 = vadd.f32 %v5173_v45, %v2454_v59  ;;  %v3895_v2 = vpop.f32.mrb[211].mxu0 }
 0x351   :  { %v1880_v4 = vpop.f32.mrb[60].mxu1 }
 0x352   :  { %2835 = vst.msk [vmem:[%s5987_s7 + $0x148] sm:$0xff] %vm2793_vm3, %v2455_v40  ;;  %v1881_v58 = vadd.f32 %v5296_v38, %v1880_v4  ;;  %v3738_v35 = vpop.f32.mrb[61].mxu1  ;;  %4001 = vmatmul.mubr.bf16.gmra.mrb[60].mxu0 %v2187_v34 }
 0x353   :  { %v1883_v30 = vpop.f32.mrb[62].mxu1  ;;  %4004 = vmatprep.mubr.msk.bf16.mxu0 %vm4153_vm1, %v4152_v0 }
 0x354   :  { %v1884_v12 = vadd.f32 %v5296_v38, %v1883_v30  ;;  %v3739_v47 = vpop.f32.mrb[63].mxu1  ;;  %v2094_v20 = vmax.f32 %v1881_v58, 0.0 }
 0x355   :  { %v2459_v48 = vpop.f32.mrb[212].mxu0 }
 0x356   :  { %v2095_v41 = vmax.f32 %v1884_v12, 0.0  ;;  %v2460_v42 = vadd.f32 %v5173_v45, %v2459_v48  ;;  %v3898_v6 = vpop.f32.mrb[213].mxu0 }
 0x357   :  { %v2462_v27 = vpop.f32.mrb[214].mxu0 }
 0x358   :  { %v2188_v29 = vpack.c.bf16 %v2095_v41, %v2094_v20  ;;  %2836 = vst.msk [vmem:[%s5987_s7 + $0x150] sm:$0xff] %vm2793_vm3, %v2460_v42  ;;  %v2463_v61 = vadd.f32 %v5173_v45, %v2462_v27  ;;  %v3899_v23 = vpop.f32.mrb[215].mxu0 }
 0x359   :  { %v1888_v54 = vpop.f32.mrb[64].mxu1 }
 0x35a   :  { %2837 = vst.msk [vmem:[%s5987_s7 + $0x158] sm:$0xff] %vm2793_vm3, %v2463_v61  ;;  %v1889_v3 = vadd.f32 %v5296_v38, %v1888_v54  ;;  %v3742_v55 = vpop.f32.mrb[65].mxu1  ;;  %4005 = vmatmul.mubr.bf16.gmra.mrb[64].mxu0 %v2188_v29 }
 0x35b   :  { %v1891_v32 = vpop.f32.mrb[66].mxu1  ;;  %4008 = vmatprep.mubr.msk.bf16.mxu0 %vm4153_vm1, %v4152_v0 }
 0x35c   :  { %v1892_v7 = vadd.f32 %v5296_v38, %v1891_v32  ;;  %v3743_v56 = vpop.f32.mrb[67].mxu1  ;;  %v2096_v62 = vmax.f32 %v1889_v3, 0.0 }
 0x35d   :  { %v2467_v18 = vpop.f32.mrb[216].mxu0 }
 0x35e   :  { %v2097_v50 = vmax.f32 %v1892_v7, 0.0  ;;  %v2468_v31 = vadd.f32 %v5173_v45, %v2467_v18  ;;  %v3902_v63 = vpop.f32.mrb[217].mxu0 }
 0x35f   :  { %v2470_v25 = vpop.f32.mrb[218].mxu0 }
 0x360   :  { %v2189_v13 = vpack.c.bf16 %v2097_v50, %v2096_v62  ;;  %2838 = vst.msk [vmem:[%s5987_s7 + $0x160] sm:$0xff] %vm2793_vm3, %v2468_v31  ;;  %v2471_v10 = vadd.f32 %v5173_v45, %v2470_v25  ;;  %v3903_v44 = vpop.f32.mrb[219].mxu0  ;;  %v5578_v62 = vld [vmem:[%s5986_s6] ss:$0 sm:$0xff] }
 0x361   :  { %v1896_v9 = vpop.f32.mrb[68].mxu1 }
 0x362   :  { %2839 = vst.msk [vmem:[%s5987_s7 + $0x168] sm:$0xff] %vm2793_vm3, %v2471_v10  ;;  %v1897_v51 = vadd.f32 %v5296_v38, %v1896_v9  ;;  %v3746_v19 = vpop.f32.mrb[69].mxu1  ;;  %4009 = vmatmul.mubr.bf16.gmra.mrb[68].mxu0 %v2189_v13 }
 0x363   :  { %v1899_v52 = vpop.f32.mrb[70].mxu1  ;;  %4012 = vmatprep.mubr.msk.bf16.mxu0 %vm4153_vm1, %v4152_v0 }
 0x364   :  { %v1900_v11 = vadd.f32 %v5296_v38, %v1899_v52  ;;  %v3747_v49 = vpop.f32.mrb[71].mxu1  ;;  %v2098_v53 = vmax.f32 %v1897_v51, 0.0 }
 0x365   :  { %v2475_v22 = vpop.f32.mrb[220].mxu0 }
 0x366   :  { %v2099_v39 = vmax.f32 %v1900_v11, 0.0  ;;  %v2476_v16 = vadd.f32 %v5173_v45, %v2475_v22  ;;  %v3906_v17 = vpop.f32.mrb[221].mxu0 }
 0x367   :  { %v2478_v43 = vpop.f32.mrb[222].mxu0 }
 0x368   :  { %v2190_v1 = vpack.c.bf16 %v2099_v39, %v2098_v53  ;;  %2840 = vst.msk [vmem:[%s5987_s7 + $0x170] sm:$0xff] %vm2793_vm3, %v2476_v16  ;;  %v2479_v5 = vadd.f32 %v5173_v45, %v2478_v43  ;;  %v3907_v24 = vpop.f32.mrb[223].mxu0 }
 0x369   :  { %v1904_v60 = vpop.f32.mrb[72].mxu1 }
 0x36a   :  { %2841 = vst.msk [vmem:[%s5987_s7 + $0x178] sm:$0xff] %vm2793_vm3, %v2479_v5  ;;  %v1905_v33 = vadd.f32 %v5296_v38, %v1904_v60  ;;  %v3750_v36 = vpop.f32.mrb[73].mxu1  ;;  %4013 = vmatmul.mubr.bf16.gmra.mrb[72].mxu0 %v2190_v1 }
 0x36b   :  { %v1907_v14 = vpop.f32.mrb[74].mxu1  ;;  %4016 = vmatprep.mubr.msk.bf16.mxu0 %vm4153_vm1, %v4152_v0 }
 0x36c   :  { %v1908_v15 = vadd.f32 %v5296_v38, %v1907_v14  ;;  %v3751_v46 = vpop.f32.mrb[75].mxu1  ;;  %v2100_v28 = vmax.f32 %v1905_v33, 0.0 }
 0x36d   :  { %v2483_v26 = vpop.f32.mrb[224].mxu0 }
 0x36e   :  { %v2101_v8 = vmax.f32 %v1908_v15, 0.0  ;;  %v2484_v57 = vadd.f32 %v5173_v45, %v2483_v26  ;;  %v3910_v37 = vpop.f32.mrb[225].mxu0 }
 0x36f   :  { %v2486_v21 = vpop.f32.mrb[226].mxu0 }
 0x370   :  { %v2191_v59 = vpack.c.bf16 %v2101_v8, %v2100_v28  ;;  %2842 = vst.msk [vmem:[%s5987_s7 + $0x180] sm:$0xff] %vm2793_vm3, %v2484_v57  ;;  %v2487_v34 = vadd.f32 %v5173_v45, %v2486_v21  ;;  %v3911_v40 = vpop.f32.mrb[227].mxu0 }
 0x371   :  { %v1912_v2 = vpop.f32.mrb[76].mxu1 }
 0x372   :  { %2843 = vst.msk [vmem:[%s5987_s7 + $0x188] sm:$0xff] %vm2793_vm3, %v2487_v34  ;;  %v1913_v4 = vadd.f32 %v5296_v38, %v1912_v2  ;;  %v3754_v58 = vpop.f32.mrb[77].mxu1  ;;  %4017 = vmatmul.mubr.bf16.gmra.mrb[76].mxu0 %v2191_v59 }
 0x373   :  { %v1915_v35 = vpop.f32.mrb[78].mxu1  ;;  %4020 = vmatprep.mubr.msk.bf16.mxu0 %vm4153_vm1, %v4152_v0 }
 0x374   :  { %v1916_v30 = vadd.f32 %v5296_v38, %v1915_v35  ;;  %v3755_v12 = vpop.f32.mrb[79].mxu1  ;;  %v2102_v48 = vmax.f32 %v1913_v4, 0.0 }
 0x375   :  { %v2491_v47 = vpop.f32.mrb[228].mxu0 }
 0x376   :  { %v2103_v20 = vmax.f32 %v1916_v30, 0.0  ;;  %v2492_v41 = vadd.f32 %v5173_v45, %v2491_v47  ;;  %v3914_v42 = vpop.f32.mrb[229].mxu0 }
 0x377   :  { %v2494_v6 = vpop.f32.mrb[230].mxu0 }
 0x378   :  { %v2192_v27 = vpack.c.bf16 %v2103_v20, %v2102_v48  ;;  %2844 = vst.msk [vmem:[%s5987_s7 + $0x190] sm:$0xff] %vm2793_vm3, %v2492_v41  ;;  %v2495_v29 = vadd.f32 %v5173_v45, %v2494_v6  ;;  %v3915_v61 = vpop.f32.mrb[231].mxu0 }
 0x379   :  { %v1920_v23 = vpop.f32.mrb[80].mxu1 }
 0x37a   :  { %2845 = vst.msk [vmem:[%s5987_s7 + $0x198] sm:$0xff] %vm2793_vm3, %v2495_v29  ;;  %v1921_v54 = vadd.f32 %v5296_v38, %v1920_v23  ;;  %v3758_v3 = vpop.f32.mrb[81].mxu1  ;;  %4021 = vmatmul.mubr.bf16.gmra.mrb[80].mxu0 %v2192_v27 }
 0x37b   :  { %v1923_v55 = vpop.f32.mrb[82].mxu1  ;;  %4024 = vmatprep.mubr.msk.bf16.mxu0 %vm4153_vm1, %v4152_v0 }
 0x37c   :  { %v1924_v32 = vadd.f32 %v5296_v38, %v1923_v55  ;;  %v3759_v7 = vpop.f32.mrb[83].mxu1  ;;  %v2104_v45 = vmax.f32 %v1921_v54, 0.0 }
 0x37d   :  { %v2499_v56 = vpop.f32.mrb[232].mxu0 }
 0x37e   :  { %v2105_v18 = vmax.f32 %v1924_v32, 0.0  ;;  %v2500_v50 = vadd.f32 %v5578_v62, %v2499_v56  ;;  %v3918_v31 = vpop.f32.mrb[233].mxu0 }
 0x37f   :  { %v2502_v63 = vpop.f32.mrb[234].mxu0 }
 0x380   :  { %v2193_v25 = vpack.c.bf16 %v2105_v18, %v2104_v45  ;;  %2846 = vst.msk [vmem:[%s5987_s7 + $0x1a0] sm:$0xff] %vm2793_vm3, %v2500_v50  ;;  %v2503_v13 = vadd.f32 %v5578_v62, %v2502_v63  ;;  %v3919_v10 = vpop.f32.mrb[235].mxu0 }
 0x381   :  { %v1928_v44 = vpop.f32.mrb[84].mxu1 }
 0x382   :  { %2847 = vst.msk [vmem:[%s5987_s7 + $0x1a8] sm:$0xff] %vm2793_vm3, %v2503_v13  ;;  %v1929_v9 = vadd.f32 %v5296_v38, %v1928_v44  ;;  %v3762_v51 = vpop.f32.mrb[85].mxu1  ;;  %4025 = vmatmul.mubr.bf16.gmra.mrb[84].mxu0 %v2193_v25 }
 0x383   :  { %v1931_v19 = vpop.f32.mrb[86].mxu1  ;;  %4028 = vmatprep.mubr.msk.bf16.mxu0 %vm4153_vm1, %v4152_v0 }
 0x384   :  { %v1932_v52 = vadd.f32 %v5296_v38, %v1931_v19  ;;  %v3763_v11 = vpop.f32.mrb[87].mxu1  ;;  %v2106_v22 = vmax.f32 %v1929_v9, 0.0 }
 0x385   :  { %v2507_v49 = vpop.f32.mrb[236].mxu0 }
 0x386   :  { %v2107_v53 = vmax.f32 %v1932_v52, 0.0  ;;  %v2508_v39 = vadd.f32 %v5578_v62, %v2507_v49  ;;  %v3922_v16 = vpop.f32.mrb[237].mxu0 }
 0x387   :  { %v2510_v17 = vpop.f32.mrb[238].mxu0 }
 0x388   :  { %v2194_v43 = vpack.c.bf16 %v2107_v53, %v2106_v22  ;;  %2848 = vst.msk [vmem:[%s5987_s7 + $0x1b0] sm:$0xff] %vm2793_vm3, %v2508_v39  ;;  %v2511_v1 = vadd.f32 %v5578_v62, %v2510_v17  ;;  %v3923_v5 = vpop.f32.mrb[239].mxu0 }
 0x389   :  { %v1936_v24 = vpop.f32.mrb[88].mxu1 }
 0x38a   :  { %2849 = vst.msk [vmem:[%s5987_s7 + $0x1b8] sm:$0xff] %vm2793_vm3, %v2511_v1  ;;  %v1937_v60 = vadd.f32 %v5296_v38, %v1936_v24  ;;  %v3766_v33 = vpop.f32.mrb[89].mxu1  ;;  %4029 = vmatmul.mubr.bf16.gmra.mrb[88].mxu0 %v2194_v43 }
 0x38b   :  { %v1939_v36 = vpop.f32.mrb[90].mxu1  ;;  %4032 = vmatprep.mubr.msk.bf16.mxu0 %vm4153_vm1, %v4152_v0 }
 0x38c   :  { %v1940_v14 = vadd.f32 %v5296_v38, %v1939_v36  ;;  %v3767_v15 = vpop.f32.mrb[91].mxu1  ;;  %v2108_v26 = vmax.f32 %v1937_v60, 0.0 }
 0x38d   :  { %v2515_v46 = vpop.f32.mrb[240].mxu0 }
 0x38e   :  { %v2109_v28 = vmax.f32 %v1940_v14, 0.0  ;;  %v2516_v8 = vadd.f32 %v5578_v62, %v2515_v46  ;;  %v3926_v57 = vpop.f32.mrb[241].mxu0 }
 0x38f   :  { %v2518_v37 = vpop.f32.mrb[242].mxu0 }
 0x390   :  { %v2195_v21 = vpack.c.bf16 %v2109_v28, %v2108_v26  ;;  %2850 = vst.msk [vmem:[%s5987_s7 + $0x1c0] sm:$0xff] %vm2793_vm3, %v2516_v8  ;;  %v2519_v59 = vadd.f32 %v5578_v62, %v2518_v37  ;;  %v3927_v34 = vpop.f32.mrb[243].mxu0 }
 0x391   :  { %v1944_v40 = vpop.f32.mrb[92].mxu1 }
 0x392   :  { %2851 = vst.msk [vmem:[%s5987_s7 + $0x1c8] sm:$0xff] %vm2793_vm3, %v2519_v59  ;;  %v1945_v2 = vadd.f32 %v5296_v38, %v1944_v40  ;;  %v3770_v4 = vpop.f32.mrb[93].mxu1  ;;  %4033 = vmatmul.mubr.bf16.gmra.mrb[92].mxu0 %v2195_v21 }
 0x393   :  { %v1947_v58 = vpop.f32.mrb[94].mxu1  ;;  %4036 = vmatprep.mubr.msk.bf16.mxu0 %vm4153_vm1, %v4152_v0 }
 0x394   :  { %v1948_v35 = vadd.f32 %v5296_v38, %v1947_v58  ;;  %v3771_v30 = vpop.f32.mrb[95].mxu1  ;;  %v2110_v47 = vmax.f32 %v1945_v2, 0.0 }
 0x395   :  { %v2523_v12 = vpop.f32.mrb[244].mxu0 }
 0x396   :  { %v2111_v48 = vmax.f32 %v1948_v35, 0.0  ;;  %v2524_v20 = vadd.f32 %v5578_v62, %v2523_v12  ;;  %v3930_v41 = vpop.f32.mrb[245].mxu0 }
 0x397   :  { %v2526_v42 = vpop.f32.mrb[246].mxu0 }
 0x398   :  { %v2196_v6 = vpack.c.bf16 %v2111_v48, %v2110_v47  ;;  %2852 = vst.msk [vmem:[%s5987_s7 + $0x1d0] sm:$0xff] %vm2793_vm3, %v2524_v20  ;;  %v2527_v27 = vadd.f32 %v5578_v62, %v2526_v42  ;;  %v3931_v29 = vpop.f32.mrb[247].mxu0 }
 0x399   :  { %v1952_v61 = vpop.f32.mrb[96].mxu1 }
 0x39a   :  { %2853 = vst.msk [vmem:[%s5987_s7 + $0x1d8] sm:$0xff] %vm2793_vm3, %v2527_v27  ;;  %v1953_v23 = vadd.f32 %v5296_v38, %v1952_v61  ;;  %v3774_v54 = vpop.f32.mrb[97].mxu1  ;;  %4037 = vmatmul.mubr.bf16.gmra.mrb[96].mxu0 %v2196_v6 }
 0x39b   :  { %v1955_v3 = vpop.f32.mrb[98].mxu1  ;;  %4040 = vmatprep.mubr.msk.bf16.mxu0 %vm4153_vm1, %v4152_v0 }
 0x39c   :  { %v1956_v55 = vadd.f32 %v5296_v38, %v1955_v3  ;;  %v3775_v32 = vpop.f32.mrb[99].mxu1  ;;  %v2112_v56 = vmax.f32 %v1953_v23, 0.0 }
 0x39d   :  { %v2531_v7 = vpop.f32.mrb[248].mxu0 }
 0x39e   :  { %v2113_v45 = vmax.f32 %v1956_v55, 0.0  ;;  %v2532_v18 = vadd.f32 %v5578_v62, %v2531_v7  ;;  %v3934_v50 = vpop.f32.mrb[249].mxu0 }
 0x39f   :  { %v2534_v31 = vpop.f32.mrb[250].mxu0 }
 0x3a0   :  { %v2197_v63 = vpack.c.bf16 %v2113_v45, %v2112_v56  ;;  %2854 = vst.msk [vmem:[%s5987_s7 + $0x1e0] sm:$0xff] %vm2793_vm3, %v2532_v18  ;;  %v2535_v25 = vadd.f32 %v5578_v62, %v2534_v31  ;;  %v3935_v13 = vpop.f32.mrb[251].mxu0 }
 0x3a1   :  { %v1960_v10 = vpop.f32.mrb[100].mxu1 }
 0x3a2   :  { %2855 = vst.msk [vmem:[%s5987_s7 + $0x1e8] sm:$0xff] %vm2793_vm3, %v2535_v25  ;;  %v1961_v44 = vadd.f32 %v5296_v38, %v1960_v10  ;;  %v3778_v9 = vpop.f32.mrb[101].mxu1  ;;  %4041 = vmatmul.mubr.bf16.gmra.mrb[100].mxu0 %v2197_v63 }
 0x3a3   :  { %v1963_v51 = vpop.f32.mrb[102].mxu1  ;;  %4044 = vmatprep.mubr.msk.bf16.mxu0 %vm4153_vm1, %v4152_v0 }
 0x3a4   :  { %v1964_v19 = vadd.f32 %v5296_v38, %v1963_v51  ;;  %v3779_v52 = vpop.f32.mrb[103].mxu1  ;;  %v2114_v49 = vmax.f32 %v1961_v44, 0.0 }
 0x3a5   :  { %v2539_v11 = vpop.f32.mrb[252].mxu0 }
 0x3a6   :  { %v2115_v22 = vmax.f32 %v1964_v19, 0.0  ;;  %v2540_v53 = vadd.f32 %v5578_v62, %v2539_v11  ;;  %v3938_v39 = vpop.f32.mrb[253].mxu0 }
 0x3a7   :  { %v2542_v16 = vpop.f32.mrb[254].mxu0 }
 0x3a8   :  { %v2198_v17 = vpack.c.bf16 %v2115_v22, %v2114_v49  ;;  %2856 = vst.msk [vmem:[%s5987_s7 + $0x1f0] sm:$0xff] %vm2793_vm3, %v2540_v53  ;;  %v2543_v43 = vadd.f32 %v5578_v62, %v2542_v16  ;;  %v3939_v1 = vpop.f32.mrb[255].mxu0 }
 0x3a9   :  { %v1968_v5 = vpop.f32.mrb[104].mxu1 }
 0x3aa   :  { %2857 = vst.msk [vmem:[%s5987_s7 + $0x1f8] sm:$0xff] %vm2793_vm3, %v2543_v43  ;;  %v1969_v24 = vadd.f32 %v5296_v38, %v1968_v5  ;;  %v3782_v60 = vpop.f32.mrb[105].mxu1  ;;  %4045 = vmatmul.mubr.bf16.gmra.mrb[104].mxu0 %v2198_v17 }
 0x3ab   :  { %v1971_v33 = vpop.f32.mrb[106].mxu1  ;;  %4048 = vmatprep.mubr.msk.bf16.mxu0 %vm4153_vm1, %v4152_v0 }
 0x3ac   :  { %v1972_v36 = vadd.f32 %v5296_v38, %v1971_v33  ;;  %v3783_v14 = vpop.f32.mrb[107].mxu1  ;;  %v2116_v46 = vmax.f32 %v1969_v24, 0.0 }
 0x3ad   :  { %v2547_v15 = vpop.f32.mrb[0].mxu0 }
 0x3ae   :  { %v2117_v26 = vmax.f32 %v1972_v36, 0.0  ;;  %v2548_v28 = vadd.f32 %v5578_v62, %v2547_v15  ;;  %v3942_v8 = vpop.f32.mrb[1].mxu0 }
 0x3af   :  { %v2550_v57 = vpop.f32.mrb[2].mxu0 }
 0x3b0   :  { %v2199_v37 = vpack.c.bf16 %v2117_v26, %v2116_v46  ;;  %2858 = vst.msk [vmem:[%s5987_s7 + $0x200] sm:$0xff] %vm2793_vm3, %v2548_v28  ;;  %v2551_v21 = vadd.f32 %v5578_v62, %v2550_v57  ;;  %v3943_v59 = vpop.f32.mrb[3].mxu0 }
 0x3b1   :  { %v1976_v34 = vpop.f32.mrb[108].mxu1 }
 0x3b2   :  { %2859 = vst.msk [vmem:[%s5987_s7 + $0x208] sm:$0xff] %vm2793_vm3, %v2551_v21  ;;  %v1977_v40 = vadd.f32 %v5296_v38, %v1976_v34  ;;  %v3786_v2 = vpop.f32.mrb[109].mxu1  ;;  %4049 = vmatmul.mubr.bf16.gmra.mrb[108].mxu0 %v2199_v37 }
 0x3b3   :  { %v1979_v4 = vpop.f32.mrb[110].mxu1  ;;  %4052 = vmatprep.mubr.msk.bf16.mxu0 %vm4153_vm1, %v4152_v0 }
 0x3b4   :  { %v1980_v58 = vadd.f32 %v5296_v38, %v1979_v4  ;;  %v3787_v35 = vpop.f32.mrb[111].mxu1  ;;  %v2118_v12 = vmax.f32 %v1977_v40, 0.0  ;;  %v4151_v38 = vld [vmem:[%s5985_s4] ss:$0 sm:$0xff] }
 0x3b5   :  { %v2555_v30 = vpop.f32.mrb[4].mxu0 }
 0x3b6   :  { %v2119_v47 = vmax.f32 %v1980_v58, 0.0  ;;  %v2556_v48 = vadd.f32 %v5578_v62, %v2555_v30  ;;  %v3946_v20 = vpop.f32.mrb[5].mxu0 }
 0x3b7   :  { %v2558_v41 = vpop.f32.mrb[6].mxu0 }
 0x3b8   :  { %v2200_v42 = vpack.c.bf16 %v2119_v47, %v2118_v12  ;;  %2860 = vst.msk [vmem:[%s5987_s7 + $0x210] sm:$0xff] %vm2793_vm3, %v2556_v48  ;;  %v2559_v6 = vadd.f32 %v5578_v62, %v2558_v41  ;;  %v3947_v27 = vpop.f32.mrb[7].mxu0 }
 0x3b9   :  { %v1984_v29 = vpop.f32.mrb[112].mxu1 }
 0x3ba   :  { %2861 = vst.msk [vmem:[%s5987_s7 + $0x218] sm:$0xff] %vm2793_vm3, %v2559_v6  ;;  %v1985_v61 = vadd.f32 %v4151_v38, %v1984_v29  ;;  %v3790_v23 = vpop.f32.mrb[113].mxu1  ;;  %4053 = vmatmul.mubr.bf16.gmra.mrb[112].mxu0 %v2200_v42 }
 0x3bb   :  { %v1987_v54 = vpop.f32.mrb[114].mxu1  ;;  %4056 = vmatprep.mubr.msk.bf16.mxu0 %vm4153_vm1, %v4152_v0 }
 0x3bc   :  { %v1988_v3 = vadd.f32 %v4151_v38, %v1987_v54  ;;  %v3791_v55 = vpop.f32.mrb[115].mxu1  ;;  %v2120_v7 = vmax.f32 %v1985_v61, 0.0 }
 0x3bd   :  { %v2563_v32 = vpop.f32.mrb[8].mxu0 }
 0x3be   :  { %v2121_v56 = vmax.f32 %v1988_v3, 0.0  ;;  %v2564_v45 = vadd.f32 %v5578_v62, %v2563_v32  ;;  %v3950_v18 = vpop.f32.mrb[9].mxu0 }
 0x3bf   :  { %v2566_v50 = vpop.f32.mrb[10].mxu0 }
 0x3c0   :  { %v2201_v31 = vpack.c.bf16 %v2121_v56, %v2120_v7  ;;  %2862 = vst.msk [vmem:[%s5987_s7 + $0x220] sm:$0xff] %vm2793_vm3, %v2564_v45  ;;  %v2567_v63 = vadd.f32 %v5578_v62, %v2566_v50  ;;  %v3951_v25 = vpop.f32.mrb[11].mxu0 }
 0x3c1   :  { %v1992_v13 = vpop.f32.mrb[116].mxu1 }
 0x3c2   :  { %2863 = vst.msk [vmem:[%s5987_s7 + $0x228] sm:$0xff] %vm2793_vm3, %v2567_v63  ;;  %v1993_v10 = vadd.f32 %v4151_v38, %v1992_v13  ;;  %v3794_v44 = vpop.f32.mrb[117].mxu1  ;;  %4057 = vmatmul.mubr.bf16.gmra.mrb[116].mxu0 %v2201_v31 }
 0x3c3   :  { %v1995_v9 = vpop.f32.mrb[118].mxu1  ;;  %4060 = vmatprep.mubr.msk.bf16.mxu0 %vm4153_vm1, %v4152_v0 }
 0x3c4   :  { %v2122_v51 = vmax.f32 %v1993_v10, 0.0  ;;  %v3795_v19 = vpop.f32.mrb[119].mxu1 }
 0x3c5   :  { %v2571_v52 = vpop.f32.mrb[12].mxu0 }
 0x3c6   :  { %v2572_v11 = vadd.f32 %v5578_v62, %v2571_v52  ;;  %v3954_v49 = vpop.f32.mrb[13].mxu0  ;;  %v2202_v53 = vpack.c.bf16 %v2122_v51, %v2122_v51 }
 0x3c7   :  { %v2574_v22 = vpop.f32.mrb[14].mxu0 }
 0x3c8   :  { %2864 = vst.msk [vmem:[%s5987_s7 + $0x230] sm:$0xff] %vm2793_vm3, %v2572_v11  ;;  %v2575_v39 = vadd.f32 %v5578_v62, %v2574_v22  ;;  %v3955_v16 = vpop.f32.mrb[15].mxu0 }
 0x3ca   :  { %2865 = vst.msk [vmem:[%s5987_s7 + $0x238] sm:$0xff] %vm2793_vm3, %v2575_v39  ;;  %4061 = vmatmul.mubr.bf16.gmra.mrb[120].mxu0 %v2202_v53 }
 0x3cd   :  { %v2579_v0 = vpop.f32.mrb[16].mxu0 }
 0x3ce   :  { %v2580_v17 = vadd.f32 %v5578_v62, %v2579_v0  ;;  %v3958_v43 = vpop.f32.mrb[17].mxu0 }
 0x3cf   :  { %v2582_v1 = vpop.f32.mrb[18].mxu0 }
 0x3d0   :  { %2866 = vst.msk [vmem:[%s5987_s7 + $0x240] sm:$0xff] %vm2793_vm3, %v2580_v17  ;;  %v2583_v5 = vadd.f32 %v5578_v62, %v2582_v1  ;;  %v3959_v24 = vpop.f32.mrb[19].mxu0 }
 0x3d2   :  { %2867 = vst.msk [vmem:[%s5987_s7 + $0x248] sm:$0xff] %vm2793_vm3, %v2583_v5 }
 0x3d5   :  { %v2587_v60 = vpop.f32.mrb[20].mxu0 }
 0x3d6   :  { %v2588_v33 = vadd.f32 %v5578_v62, %v2587_v60  ;;  %v3962_v36 = vpop.f32.mrb[21].mxu0 }
 0x3d7   :  { %v2590_v14 = vpop.f32.mrb[22].mxu0 }
 0x3d8   :  { %2868 = vst.msk [vmem:[%s5987_s7 + $0x250] sm:$0xff] %vm2793_vm3, %v2588_v33  ;;  %v2591_v15 = vadd.f32 %v5578_v62, %v2590_v14  ;;  %v3963_v46 = vpop.f32.mrb[23].mxu0 }
 0x3da   :  { %2869 = vst.msk [vmem:[%s5987_s7 + $0x258] sm:$0xff] %vm2793_vm3, %v2591_v15 }
 0x3dd   :  { %v2595_v26 = vpop.f32.mrb[24].mxu0 }
 0x3de   :  { %v2596_v28 = vadd.f32 %v5578_v62, %v2595_v26  ;;  %v3966_v8 = vpop.f32.mrb[25].mxu0 }
 0x3df   :  { %v2598_v57 = vpop.f32.mrb[26].mxu0 }
 0x3e0   :  { %2870 = vst.msk [vmem:[%s5987_s7 + $0x260] sm:$0xff] %vm2793_vm3, %v2596_v28  ;;  %v2599_v37 = vadd.f32 %v5578_v62, %v2598_v57  ;;  %v3967_v21 = vpop.f32.mrb[27].mxu0 }
 0x3e2   :  { %2871 = vst.msk [vmem:[%s5987_s7 + $0x268] sm:$0xff] %vm2793_vm3, %v2599_v37 }
 0x3e5   :  { %v2603_v59 = vpop.f32.mrb[28].mxu0 }
 0x3e6   :  { %v2604_v34 = vadd.f32 %v5578_v62, %v2603_v59  ;;  %v3970_v40 = vpop.f32.mrb[29].mxu0 }
 0x3e7   :  { %v2606_v2 = vpop.f32.mrb[30].mxu0 }
 0x3e8   :  { %2872 = vst.msk [vmem:[%s5987_s7 + $0x270] sm:$0xff] %vm2793_vm3, %v2604_v34  ;;  %v2607_v4 = vadd.f32 %v5578_v62, %v2606_v2  ;;  %v3971_v58 = vpop.f32.mrb[31].mxu0 }
 0x3ea   :  { %2873 = vst.msk [vmem:[%s5987_s7 + $0x278] sm:$0xff] %vm2793_vm3, %v2607_v4 }
 0x3ed   :  { %v2611_v35 = vpop.f32.mrb[32].mxu0 }
 0x3ee   :  { %v2612_v30 = vadd.f32 %v5578_v62, %v2611_v35  ;;  %v3974_v12 = vpop.f32.mrb[33].mxu0 }
 0x3ef   :  { %v2614_v47 = vpop.f32.mrb[34].mxu0 }
 0x3f0   :  { %2874 = vst.msk [vmem:[%s5987_s7 + $0x280] sm:$0xff] %vm2793_vm3, %v2612_v30  ;;  %v2615_v48 = vadd.f32 %v5578_v62, %v2614_v47  ;;  %v3975_v20 = vpop.f32.mrb[35].mxu0 }
 0x3f2   :  { %2875 = vst.msk [vmem:[%s5987_s7 + $0x288] sm:$0xff] %vm2793_vm3, %v2615_v48 }
 0x3f5   :  { %v2619_v41 = vpop.f32.mrb[36].mxu0 }
 0x3f6   :  { %v2620_v42 = vadd.f32 %v5578_v62, %v2619_v41  ;;  %v3978_v6 = vpop.f32.mrb[37].mxu0 }
 0x3f7   :  { %v2622_v27 = vpop.f32.mrb[38].mxu0 }
 0x3f8   :  { %2876 = vst.msk [vmem:[%s5987_s7 + $0x290] sm:$0xff] %vm2793_vm3, %v2620_v42  ;;  %v2623_v29 = vadd.f32 %v5578_v62, %v2622_v27  ;;  %v3979_v38 = vpop.f32.mrb[39].mxu0 }
 0x3fa   :  { %2877 = vst.msk [vmem:[%s5987_s7 + $0x298] sm:$0xff] %vm2793_vm3, %v2623_v29 }
 0x3fd   :  { %v2627_v61 = vpop.f32.mrb[40].mxu0 }
 0x3fe   :  { %v2628_v23 = vadd.f32 %v5578_v62, %v2627_v61  ;;  %v3982_v54 = vpop.f32.mrb[41].mxu0 }
 0x3ff   :  { %v2630_v3 = vpop.f32.mrb[42].mxu0 }
 0x400   :  { %2878 = vst.msk [vmem:[%s5987_s7 + $0x2a0] sm:$0xff] %vm2793_vm3, %v2628_v23  ;;  %v2631_v55 = vadd.f32 %v5578_v62, %v2630_v3  ;;  %v3983_v32 = vpop.f32.mrb[43].mxu0 }
 0x402   :  { %2879 = vst.msk [vmem:[%s5987_s7 + $0x2a8] sm:$0xff] %vm2793_vm3, %v2631_v55 }
 0x405   :  { %v2635_v7 = vpop.f32.mrb[44].mxu0 }
 0x406   :  { %v2636_v56 = vadd.f32 %v5578_v62, %v2635_v7  ;;  %v3986_v45 = vpop.f32.mrb[45].mxu0 }
 0x407   :  { %v2638_v18 = vpop.f32.mrb[46].mxu0 }
 0x408   :  { %2880 = vst.msk [vmem:[%s5987_s7 + $0x2b0] sm:$0xff] %vm2793_vm3, %v2636_v56  ;;  %v2639_v50 = vadd.f32 %v5578_v62, %v2638_v18  ;;  %v3987_v31 = vpop.f32.mrb[47].mxu0 }
 0x40a   :  { %2881 = vst.msk [vmem:[%s5987_s7 + $0x2b8] sm:$0xff] %vm2793_vm3, %v2639_v50 }
 0x40d   :  { %v2643_v63 = vpop.f32.mrb[48].mxu0 }
 0x40e   :  { %v2644_v25 = vadd.f32 %v5578_v62, %v2643_v63  ;;  %v3990_v13 = vpop.f32.mrb[49].mxu0 }
 0x40f   :  { %v2646_v10 = vpop.f32.mrb[50].mxu0 }
 0x410   :  { %2882 = vst.msk [vmem:[%s5987_s7 + $0x2c0] sm:$0xff] %vm2793_vm3, %v2644_v25  ;;  %v2647_v44 = vadd.f32 %v5578_v62, %v2646_v10  ;;  %v3991_v9 = vpop.f32.mrb[51].mxu0 }
 0x412   :  { %2883 = vst.msk [vmem:[%s5987_s7 + $0x2c8] sm:$0xff] %vm2793_vm3, %v2647_v44 }
 0x415   :  { %v2651_v51 = vpop.f32.mrb[52].mxu0 }
 0x416   :  { %v2652_v19 = vadd.f32 %v5578_v62, %v2651_v51  ;;  %v3994_v52 = vpop.f32.mrb[53].mxu0 }
 0x417   :  { %v2654_v11 = vpop.f32.mrb[54].mxu0 }
 0x418   :  { %2884 = vst.msk [vmem:[%s5987_s7 + $0x2d0] sm:$0xff] %vm2793_vm3, %v2652_v19  ;;  %v2655_v49 = vadd.f32 %v5578_v62, %v2654_v11  ;;  %v3995_v22 = vpop.f32.mrb[55].mxu0 }
 0x41a   :  { %2885 = vst.msk [vmem:[%s5987_s7 + $0x2d8] sm:$0xff] %vm2793_vm3, %v2655_v49 }
 0x41d   :  { %v2659_v53 = vpop.f32.mrb[56].mxu0 }
 0x41e   :  { %v2660_v39 = vadd.f32 %v5578_v62, %v2659_v53  ;;  %v3998_v16 = vpop.f32.mrb[57].mxu0 }
 0x41f   :  { %v2662_v0 = vpop.f32.mrb[58].mxu0 }
 0x420   :  { %2886 = vst.msk [vmem:[%s5987_s7 + $0x2e0] sm:$0xff] %vm2793_vm3, %v2660_v39  ;;  %v2663_v17 = vadd.f32 %v5578_v62, %v2662_v0  ;;  %v3999_v43 = vpop.f32.mrb[59].mxu0 }
 0x422   :  { %2887 = vst.msk [vmem:[%s5987_s7 + $0x2e8] sm:$0xff] %vm2793_vm3, %v2663_v17 }
 0x425   :  { %v2667_v1 = vpop.f32.mrb[60].mxu0 }
 0x426   :  { %v2668_v5 = vadd.f32 %v5578_v62, %v2667_v1  ;;  %v4002_v24 = vpop.f32.mrb[61].mxu0 }
 0x427   :  { %v2670_v60 = vpop.f32.mrb[62].mxu0 }
 0x428   :  { %2888 = vst.msk [vmem:[%s5987_s7 + $0x2f0] sm:$0xff] %vm2793_vm3, %v2668_v5  ;;  %v2671_v33 = vadd.f32 %v5578_v62, %v2670_v60  ;;  %v4003_v36 = vpop.f32.mrb[63].mxu0 }
 0x42a   :  { %2889 = vst.msk [vmem:[%s5987_s7 + $0x2f8] sm:$0xff] %vm2793_vm3, %v2671_v33 }
 0x42d   :  { %v2675_v14 = vpop.f32.mrb[64].mxu0 }
 0x42e   :  { %v2676_v15 = vadd.f32 %v5578_v62, %v2675_v14  ;;  %v4006_v46 = vpop.f32.mrb[65].mxu0 }
 0x42f   :  { %v2678_v26 = vpop.f32.mrb[66].mxu0 }
 0x430   :  { %2890 = vst.msk [vmem:[%s5987_s7 + $0x300] sm:$0xff] %vm2793_vm3, %v2676_v15  ;;  %v2679_v28 = vadd.f32 %v5578_v62, %v2678_v26  ;;  %v4007_v8 = vpop.f32.mrb[67].mxu0 }
 0x432   :  { %2891 = vst.msk [vmem:[%s5987_s7 + $0x308] sm:$0xff] %vm2793_vm3, %v2679_v28 }
 0x435   :  { %v2683_v57 = vpop.f32.mrb[68].mxu0 }
 0x436   :  { %v2684_v37 = vadd.f32 %v5578_v62, %v2683_v57  ;;  %v4010_v21 = vpop.f32.mrb[69].mxu0 }
 0x437   :  { %v2686_v59 = vpop.f32.mrb[70].mxu0 }
 0x438   :  { %2892 = vst.msk [vmem:[%s5987_s7 + $0x310] sm:$0xff] %vm2793_vm3, %v2684_v37  ;;  %v2687_v34 = vadd.f32 %v5578_v62, %v2686_v59  ;;  %v4011_v40 = vpop.f32.mrb[71].mxu0 }
 0x43a   :  { %2893 = vst.msk [vmem:[%s5987_s7 + $0x318] sm:$0xff] %vm2793_vm3, %v2687_v34 }
 0x43d   :  { %v2691_v2 = vpop.f32.mrb[72].mxu0 }
 0x43e   :  { %v2692_v4 = vadd.f32 %v5578_v62, %v2691_v2  ;;  %v4014_v58 = vpop.f32.mrb[73].mxu0 }
 0x43f   :  { %v2694_v35 = vpop.f32.mrb[74].mxu0 }
 0x440   :  { %2894 = vst.msk [vmem:[%s5987_s7 + $0x320] sm:$0xff] %vm2793_vm3, %v2692_v4  ;;  %v2695_v30 = vadd.f32 %v5578_v62, %v2694_v35  ;;  %v4015_v12 = vpop.f32.mrb[75].mxu0 }
 0x442   :  { %2895 = vst.msk [vmem:[%s5987_s7 + $0x328] sm:$0xff] %vm2793_vm3, %v2695_v30 }
 0x445   :  { %v2699_v47 = vpop.f32.mrb[76].mxu0 }
 0x446   :  { %v2700_v48 = vadd.f32 %v5578_v62, %v2699_v47  ;;  %v4018_v20 = vpop.f32.mrb[77].mxu0 }
 0x447   :  { %v2702_v41 = vpop.f32.mrb[78].mxu0 }
 0x448   :  { %2896 = vst.msk [vmem:[%s5987_s7 + $0x330] sm:$0xff] %vm2793_vm3, %v2700_v48  ;;  %v2703_v42 = vadd.f32 %v5578_v62, %v2702_v41  ;;  %v4019_v6 = vpop.f32.mrb[79].mxu0 }
 0x44a   :  { %2897 = vst.msk [vmem:[%s5987_s7 + $0x338] sm:$0xff] %vm2793_vm3, %v2703_v42 }
 0x44d   :  { %v2707_v27 = vpop.f32.mrb[80].mxu0 }
 0x44e   :  { %v2708_v29 = vadd.f32 %v5578_v62, %v2707_v27  ;;  %v4022_v38 = vpop.f32.mrb[81].mxu0 }
 0x44f   :  { %v2710_v61 = vpop.f32.mrb[82].mxu0 }
 0x450   :  { %2898 = vst.msk [vmem:[%s5987_s7 + $0x340] sm:$0xff] %vm2793_vm3, %v2708_v29  ;;  %v2711_v23 = vadd.f32 %v5578_v62, %v2710_v61  ;;  %v4023_v54 = vpop.f32.mrb[83].mxu0 }
 0x452   :  { %2899 = vst.msk [vmem:[%s5987_s7 + $0x348] sm:$0xff] %vm2793_vm3, %v2711_v23 }
 0x455   :  { %v2715_v3 = vpop.f32.mrb[84].mxu0 }
 0x456   :  { %v2716_v55 = vadd.f32 %v5578_v62, %v2715_v3  ;;  %v4026_v32 = vpop.f32.mrb[85].mxu0 }
 0x457   :  { %v2718_v7 = vpop.f32.mrb[86].mxu0 }
 0x458   :  { %2900 = vst.msk [vmem:[%s5987_s7 + $0x350] sm:$0xff] %vm2793_vm3, %v2716_v55  ;;  %v2719_v56 = vadd.f32 %v5578_v62, %v2718_v7  ;;  %v4027_v45 = vpop.f32.mrb[87].mxu0 }
 0x45a   :  { %2901 = vst.msk [vmem:[%s5987_s7 + $0x358] sm:$0xff] %vm2793_vm3, %v2719_v56 }
 0x45d   :  { %v2723_v18 = vpop.f32.mrb[88].mxu0 }
 0x45e   :  { %v2724_v50 = vadd.f32 %v5578_v62, %v2723_v18  ;;  %v4030_v31 = vpop.f32.mrb[89].mxu0 }
 0x45f   :  { %v2726_v63 = vpop.f32.mrb[90].mxu0 }
 0x460   :  { %2902 = vst.msk [vmem:[%s5987_s7 + $0x360] sm:$0xff] %vm2793_vm3, %v2724_v50  ;;  %v2727_v25 = vadd.f32 %v5578_v62, %v2726_v63  ;;  %v4031_v13 = vpop.f32.mrb[91].mxu0 }
 0x462   :  { %2903 = vst.msk [vmem:[%s5987_s7 + $0x368] sm:$0xff] %vm2793_vm3, %v2727_v25 }
 0x465   :  { %v2731_v10 = vpop.f32.mrb[92].mxu0 }
 0x466   :  { %v2732_v44 = vadd.f32 %v5578_v62, %v2731_v10  ;;  %v4034_v9 = vpop.f32.mrb[93].mxu0 }
 0x467   :  { %v2734_v51 = vpop.f32.mrb[94].mxu0 }
 0x468   :  { %2904 = vst.msk [vmem:[%s5987_s7 + $0x370] sm:$0xff] %vm2793_vm3, %v2732_v44  ;;  %v2735_v19 = vadd.f32 %v5578_v62, %v2734_v51  ;;  %v4035_v52 = vpop.f32.mrb[95].mxu0 }
 0x46a   :  { %2905 = vst.msk [vmem:[%s5987_s7 + $0x378] sm:$0xff] %vm2793_vm3, %v2735_v19 }
 0x46d   :  { %v2739_v11 = vpop.f32.mrb[96].mxu0 }
 0x46e   :  { %v2740_v49 = vadd.f32 %v5578_v62, %v2739_v11  ;;  %v4038_v22 = vpop.f32.mrb[97].mxu0 }
 0x46f   :  { %v2742_v53 = vpop.f32.mrb[98].mxu0 }
 0x470   :  { %2906 = vst.msk [vmem:[%s5987_s7 + $0x380] sm:$0xff] %vm2793_vm3, %v2740_v49  ;;  %v2743_v39 = vadd.f32 %v5578_v62, %v2742_v53  ;;  %v4039_v16 = vpop.f32.mrb[99].mxu0 }
 0x472   :  { %2907 = vst.msk [vmem:[%s5987_s7 + $0x388] sm:$0xff] %vm2793_vm3, %v2743_v39 }
 0x475   :  { %v2747_v0 = vpop.f32.mrb[100].mxu0 }
 0x476   :  { %v2748_v17 = vadd.f32 %v5578_v62, %v2747_v0  ;;  %v4042_v43 = vpop.f32.mrb[101].mxu0 }
 0x477   :  { %v2750_v1 = vpop.f32.mrb[102].mxu0 }
 0x478   :  { %2908 = vst.msk [vmem:[%s5987_s7 + $0x390] sm:$0xff] %vm2793_vm3, %v2748_v17  ;;  %v2751_v5 = vadd.f32 %v5578_v62, %v2750_v1  ;;  %v4043_v24 = vpop.f32.mrb[103].mxu0 }
 0x47a   :  { %2909 = vst.msk [vmem:[%s5987_s7 + $0x398] sm:$0xff] %vm2793_vm3, %v2751_v5 }
 0x47d   :  { %v2755_v60 = vpop.f32.mrb[104].mxu0 }
 0x47e   :  { %v2756_v33 = vadd.f32 %v5578_v62, %v2755_v60  ;;  %v4046_v36 = vpop.f32.mrb[105].mxu0 }
 0x47f   :  { %v2758_v14 = vpop.f32.mrb[106].mxu0 }
 0x480   :  { %2910 = vst.msk [vmem:[%s5987_s7 + $0x3a0] sm:$0xff] %vm2793_vm3, %v2756_v33  ;;  %v2759_v15 = vadd.f32 %v5578_v62, %v2758_v14  ;;  %v4047_v46 = vpop.f32.mrb[107].mxu0 }
 0x482   :  { %2911 = vst.msk [vmem:[%s5987_s7 + $0x3a8] sm:$0xff] %vm2793_vm3, %v2759_v15 }
 0x485   :  { %v2763_v26 = vpop.f32.mrb[108].mxu0 }
 0x486   :  { %v2764_v28 = vadd.f32 %v5578_v62, %v2763_v26  ;;  %v4050_v8 = vpop.f32.mrb[109].mxu0 }
 0x487   :  { %v2766_v57 = vpop.f32.mrb[110].mxu0 }
 0x488   :  { %2912 = vst.msk [vmem:[%s5987_s7 + $0x3b0] sm:$0xff] %vm2793_vm3, %v2764_v28  ;;  %v2767_v37 = vadd.f32 %v5578_v62, %v2766_v57  ;;  %v4051_v21 = vpop.f32.mrb[111].mxu0 }
 0x48a   :  { %2913 = vst.msk [vmem:[%s5987_s7 + $0x3b8] sm:$0xff] %vm2793_vm3, %v2767_v37 }
 0x48d   :  { %v2771_v59 = vpop.f32.mrb[112].mxu0 }
 0x48e   :  { %v2772_v34 = vadd.f32 %v5578_v62, %v2771_v59  ;;  %v4054_v40 = vpop.f32.mrb[113].mxu0 }
 0x48f   :  { %v2774_v2 = vpop.f32.mrb[114].mxu0 }
 0x490   :  { %2914 = vst.msk [vmem:[%s5987_s7 + $0x3c0] sm:$0xff] %vm2793_vm3, %v2772_v34  ;;  %v2775_v4 = vadd.f32 %v5578_v62, %v2774_v2  ;;  %v4055_v58 = vpop.f32.mrb[115].mxu0 }
 0x492   :  { %2915 = vst.msk [vmem:[%s5987_s7 + $0x3c8] sm:$0xff] %vm2793_vm3, %v2775_v4 }
 0x495   :  { %v2779_v35 = vpop.f32.mrb[116].mxu0 }
 0x496   :  { %v2780_v30 = vadd.f32 %v5578_v62, %v2779_v35  ;;  %v4058_v12 = vpop.f32.mrb[117].mxu0 }
 0x497   :  { %v2782_v47 = vpop.f32.mrb[118].mxu0 }
 0x498   :  { %2916 = vst.msk [vmem:[%s5987_s7 + $0x3d0] sm:$0xff] %vm2793_vm3, %v2780_v30  ;;  %v2783_v48 = vadd.f32 %v5578_v62, %v2782_v47  ;;  %v4059_v20 = vpop.f32.mrb[119].mxu0 }
 0x49a   :  { %2917 = vst.msk [vmem:[%s5987_s7 + $0x3d8] sm:$0xff] %vm2793_vm3, %v2783_v48 }
 0x49d   :  { %v2787_v41 = vpop.f32.mrb[120].mxu0 }
 0x49e   :  { %v2788_v42 = vadd.f32 %v5578_v62, %v2787_v41  ;;  %v4062_v6 = vpop.f32.mrb[121].mxu0 }
 0x49f   :  { %v2790_v27 = vpop.f32.mrb[122].mxu0 }
 0x4a0   :  { %2918 = vst.msk [vmem:[%s5987_s7 + $0x3e0] sm:$0xff] %vm2793_vm3, %v2788_v42  ;;  %v4063_v29 = vpop.f32.mrb[123].mxu0 }

</bundles_post_ra>
